<compile_context>
chip_gen: v5e
topology: v5e:2x2
jax: 0.10.0
libtpu: 0.0.40
codegen_flags: <defaults>
</compile_context>

<pallas_src>
import functools

import numpy as np
import jax
import jax.numpy as jnp
from jax import lax
from jax.experimental import pallas as pl
from jax.experimental.pallas import tpu as pltpu


def _round_up(x, m):
    return (x + m - 1) // m * m


def _gelu(x):
    # tanh approximation of GELU (lowers on the TPU EUP).
    # TODO(synk): PyTorch nn.GELU() default is the exact erf form (~1e-3 max dev);
    # the pure-JAX reference below uses the same tanh approximation.
    c = 0.7978845608028654  # sqrt(2/pi)
    return 0.5 * x * (1.0 + jnp.tanh(c * (x + 0.044715 * x * x * x)))


def _up_matrix_1d(n):
    """(n, 2n) matrix of 2x bilinear upsampling (align_corners=False)."""
    m = np.zeros((n, 2 * n), np.float32)
    for j in range(n):
        m[max(j - 1, 0), 2 * j] += 0.25
        m[j, 2 * j] += 0.75
        m[j, 2 * j + 1] += 0.75
        m[min(j + 1, n - 1), 2 * j + 1] += 0.25
    return m


def _vmem_limit_bytes():
    # Per-generation VMEM budget: ~96 MiB on 128-MiB chips (v5e/v6e),
    # ~48 MiB on v7x (64 MiB physical), with headroom for Mosaic scratch.
    cap = 128 * 1024 * 1024
    try:
        cap = pltpu.get_tpu_info().vmem_capacity_bytes
    except Exception:
        pass
    return max(32 * 1024 * 1024, min(int(cap * 3 // 4), 96 * 1024 * 1024))


# ------------------------------------------------------------------ kernel

def _fused_block_kernel(feat_ref, skip_ref, u_ref, w1_ref, b1_ref, w2_ref,
                        b2_ref, wp_ref, bp_ref, mask_ref, o_ref,
                        xpad_ref, stk_ref, h_ref, *,
                        N, Cin, Cout, Hs, Ws, Wp, L, Lp, S, has_proj):
    """One batch element: N images -> proj(x) + gelu(conv2(gelu(conv1(x)))).

    feat_ref: (1, N, Cin, H*W)   raw feat pixels, row-major flattened.
    skip_ref: (1, Cin, PFp)      skip already in zero-padded flattened layout.
    u_ref:    (H*W, PFp)         constant "2x bilinear upsample into the padded
                                 row-major layout" matrix (zeros at pad cols).
    w1_ref:   (Cout, 9*Cin)      conv1 taps folded into the contraction dim.
    w2_ref:   (Cout, 9*Cout)     conv2 taps folded.
    wp_ref:   (Cout, Cin)        1x1 projection (ignored when has_proj=False).
    mask_ref: (1, Lp)            1.0 on valid output columns, 0.0 on junk cols.
    o_ref:    (1, N, Cout, Hs*Ws) compact, lane-dense output.
    xpad_ref: (Cin, PFp)  f32    scratch: padded x for the current image.
    stk_ref:  (9*Cmax, Lp) f32   scratch: sublane-stacked shifted tap slabs.
    h_ref:    (Cout, SW)  f32    scratch: zero-padded conv1 activation.
    """
    f32 = jnp.float32
    SW = h_ref.shape[1]
    base = S - (Wp + 1)

    # Zero only the conv2 padding halos; the interior [S, S+L) is fully
    # rewritten per image, so it is never re-zeroed.  Done per grid step, so it
    # stays correct when the "parallel" batch axis is split across TensorCores
    # (each core owns its own scratch).
    h_ref[:, :S] = jnp.zeros((Cout, S), f32)
    h_ref[:, S + L:] = jnp.zeros((Cout, SW - S - L), f32)

    # TODO(synk): for production H, W tile each image into row strips with a
    # 1-row halo (extra 'arbitrary' grid axis) so per-step VMEM stays bounded
    # on v7x (64 MiB) and the accumulator stays register-resident.
    for n in range(N):
        # ---- fused bilinear 2x upsample + skip add + SAME padding (1 MXU dot)
        xpad_ref[...] = (jnp.dot(feat_ref[0, n], u_ref[...],
                                 preferred_element_type=f32)
                         + skip_ref[0].astype(f32))

        # ---- conv1: 9 shifted taps stacked along sublanes -> one K=9*Cin dot
        for t in range(9):
            off = (t // 3) * Wp + (t % 3)
            stk_ref[t * Cin:(t + 1) * Cin, :] = xpad_ref[:, off:off + Lp]
        acc1 = jnp.dot(w1_ref[...], stk_ref[0:9 * Cin, :],
                       preferred_element_type=f32)

        # center tap (t=4) is exactly the un-padded x pixels -> reuse for proj
        xc = stk_ref[4 * Cin:5 * Cin, :]
        if has_proj:
            proj = jnp.dot(wp_ref[...], xc, preferred_element_type=f32) + bp_ref[...]
        else:
            proj = xc                      # nn.Identity: no eye-matmul, no bias

        g1 = _gelu(acc1 + b1_ref[...]) * mask_ref[...]   # zero junk/pad columns

        # ---- conv2 on the zero-padded staged activation (same stacked-tap dot)
        h_ref[:, S:S + L] = g1[:, :L]
        for t in range(9):
            off = base + (t // 3) * Wp + (t % 3)
            stk_ref[t * Cout:(t + 1) * Cout, :] = h_ref[:, off:off + Lp]
        acc2 = jnp.dot(w2_ref[...], stk_ref[0:9 * Cout, :],
                       preferred_element_type=f32)
        g2 = _gelu(acc2 + b2_ref[...])

        out = proj + g2                                   # (Cout, Lp)

        # ---- compact rows (drop 2 junk cols/row) -> lane-dense (Cout, Hs*Ws)
        # TODO(synk): for production Ws (multiple of 128) do this with
        # pltpu.roll row strips instead of Hs small stores.
        for r in range(Hs):
            o_ref[0, n, :, r * Ws:(r + 1) * Ws] = (
                out[:, r * Wp:r * Wp + Ws].astype(o_ref.dtype))


# ------------------------------------------------------------------ wrapper

def mask_upsample_forward(feat, skip, params):
    """feat: (B, N, Cin, H, W); skip: (B, Cin, 2H, 2W) -> (B, N, Cout, 2H, 2W)."""
    B, N, Cin, H, W = feat.shape
    Cout = params["w1"].shape[0]
    Hs, Ws = 2 * H, 2 * W
    Hp, Wp = Hs + 2, Ws + 2
    PF = Hp * Wp                     # padded image, flattened row-major
    L = Hs * Wp                      # conv output length (incl. 2 junk cols/row)
    Lp = _round_up(L, 128)           # lane-dense slab width
    PFp = _round_up(2 * Wp + 2 + Lp, 128)   # padded-image lane width (taps in-bounds)
    S = _round_up(Wp + 1, 128)       # aligned offset of g1 inside the h scratch
    SW = _round_up(S + Wp + 1 + Lp, 128)
    HW = H * W
    HsWs = Hs * Ws
    Cmax = max(Cin, Cout)

    # Constant "bilinear 2x upsample + zero-pad + row-major flatten" matrix.
    # TODO(synk): dense-U upsample is only sensible for small H*W; production
    # sizes should use a separable / strided-store upsample inside the kernel.
    U = np.einsum("iy,jx->ijyx", _up_matrix_1d(H), _up_matrix_1d(W)).reshape(HW, HsWs)
    cols = ((np.arange(Hs)[:, None] + 1) * Wp + (np.arange(Ws)[None, :] + 1)).reshape(-1)
    u_pad = np.zeros((HW, PFp), np.float32)
    u_pad[:, cols] = U
    u_pad = jnp.asarray(u_pad, dtype=feat.dtype)

    feat_flat = feat.reshape(B, N, Cin, HW)               # free metadata reshape
    skip_pad = jnp.pad(skip, ((0, 0), (0, 0), (1, 1), (1, 1))).reshape(B, Cin, PF)
    skip_pad = jnp.pad(skip_pad, ((0, 0), (0, 0), (0, PFp - PF)))

    # Conv weights with taps folded into the contraction dimension.
    w1f = jnp.transpose(params["w1"], (0, 2, 3, 1)).reshape(Cout, 9 * Cin)
    w2f = jnp.transpose(params["w2"], (0, 2, 3, 1)).reshape(Cout, 9 * Cout)
    b1 = params["b1"].reshape(Cout, 1)
    b2 = params["b2"].reshape(Cout, 1)
    has_proj = "wp" in params
    if has_proj:
        wp = params["wp"].reshape(Cout, Cin)
        bp = params["bp"].reshape(Cout, 1)
    else:                                                  # nn.Identity
        wp = jnp.zeros((Cout, Cin), feat.dtype)            # dummy, unused
        bp = jnp.zeros((Cout, 1), feat.dtype)

    cols_l = jnp.arange(Lp)
    mask = ((cols_l % Wp < Ws) & (cols_l < L)).astype(jnp.float32).reshape(1, Lp)

    # TODO(synk): bf16 activations/weights (f32 accumulation) would halve HBM
    # traffic and double the MXU rate on v6e/v7x.
    kernel = functools.partial(_fused_block_kernel, N=N, Cin=Cin, Cout=Cout,
                               Hs=Hs, Ws=Ws, Wp=Wp, L=L, Lp=Lp, S=S,
                               has_proj=has_proj)

    out = pl.pallas_call(
        kernel,
        out_shape=jax.ShapeDtypeStruct((B, N, Cout, HsWs), feat.dtype),
        grid=(B,),                                   # one batch element per step
        in_specs=[
            pl.BlockSpec((1, N, Cin, HW), lambda b: (b, 0, 0, 0)),
            pl.BlockSpec((1, Cin, PFp), lambda b: (b, 0, 0)),   # skip: shared over N
            pl.BlockSpec((HW, PFp), lambda b: (0, 0)),
            pl.BlockSpec((Cout, 9 * Cin), lambda b: (0, 0)),
            pl.BlockSpec((Cout, 1), lambda b: (0, 0)),
            pl.BlockSpec((Cout, 9 * Cout), lambda b: (0, 0)),
            pl.BlockSpec((Cout, 1), lambda b: (0, 0)),
            pl.BlockSpec((Cout, Cin), lambda b: (0, 0)),
            pl.BlockSpec((Cout, 1), lambda b: (0, 0)),
            pl.BlockSpec((1, Lp), lambda b: (0, 0)),
        ],
        out_specs=pl.BlockSpec((1, N, Cout, HsWs), lambda b: (b, 0, 0, 0)),
        scratch_shapes=[
            pltpu.VMEM((Cin, PFp), jnp.float32),         # padded x
            pltpu.VMEM((9 * Cmax, Lp), jnp.float32),     # stacked tap slabs
            pltpu.VMEM((Cout, SW), jnp.float32),         # padded conv1 activation
        ],
        compiler_params=pltpu.CompilerParams(
            dimension_semantics=("parallel",),           # megacore over batch
            vmem_limit_bytes=_vmem_limit_bytes()),
    )(feat_flat, skip_pad, u_pad, w1f, b1, w2f, b2, wp, bp, mask)

    return out.reshape(B, N, Cout, Hs, Ws)               # free metadata reshape


# ------------------------------------------------------------------ params / ref

def init_params(key, in_dim, out_dim):
    k1, k2, k3, k4, k5, k6 = jax.random.split(key, 6)
    lim1 = 1.0 / (in_dim * 9) ** 0.5
    lim2 = 1.0 / (out_dim * 9) ** 0.5
    params = {
        "w1": jax.random.uniform(k1, (out_dim, in_dim, 3, 3), jnp.float32, -lim1, lim1),
        "b1": jax.random.uniform(k2, (out_dim,), jnp.float32, -lim1, lim1),
        "w2": jax.random.uniform(k3, (out_dim, out_dim, 3, 3), jnp.float32, -lim2, lim2),
        "b2": jax.random.uniform(k4, (out_dim,), jnp.float32, -lim2, lim2),
    }
    if in_dim != out_dim:
        limp = 1.0 / in_dim ** 0.5
        params["wp"] = jax.random.uniform(k5, (out_dim, in_dim), jnp.float32, -limp, limp)
        params["bp"] = jax.random.uniform(k6, (out_dim,), jnp.float32, -limp, limp)
    return params


def _bilinear_up2(x):
    """F.interpolate(scale_factor=2, mode='bilinear', align_corners=False), NCHW."""
    def up_axis(a, axis):
        n = a.shape[axis]
        prev = jnp.concatenate(
            [lax.slice_in_dim(a, 0, 1, axis=axis),
             lax.slice_in_dim(a, 0, n - 1, axis=axis)], axis=axis)
        nxt = jnp.concatenate(
            [lax.slice_in_dim(a, 1, n, axis=axis),
             lax.slice_in_dim(a, n - 1, n, axis=axis)], axis=axis)
        even = 0.25 * prev + 0.75 * a
        odd = 0.75 * a + 0.25 * nxt
        out = jnp.stack([even, odd], axis=axis + 1)
        shp = list(a.shape)
        shp[axis] = 2 * n
        return out.reshape(shp)
    return up_axis(up_axis(x, 2), 3)


def reference_forward(feat, skip, params):
    B, N, Cin, H, W = feat.shape
    x = _bilinear_up2(feat.reshape(B * N, Cin, H, W)) + jnp.repeat(skip, N, axis=0)

    def conv(z, w, b, pad):
        y = lax.conv_general_dilated(
            z, w, (1, 1), pad, dimension_numbers=("NCHW", "OIHW", "NCHW"),
            precision=lax.Precision.HIGHEST)
        return y + b[None, :, None, None]

    h = _gelu(conv(x, params["w1"], params["b1"], "SAME"))
    h = _gelu(conv(h, params["w2"], params["b2"], "SAME"))
    p = conv(x, params["wp"][:, :, None, None], params["bp"], "VALID") if "wp" in params else x
    Cout = params["w1"].shape[0]
    return (p + h).reshape(B, N, Cout, 2 * H, 2 * W)


if __name__ == "__main__":
    B, N, in_dim, out_dim, H, W = 2, 2, 4, 8, 8, 8

    key = jax.random.PRNGKey(0)
    kf, ks, kp = jax.random.split(key, 3)
    feat = jax.random.normal(kf, (B, N, in_dim, H, W), jnp.float32)
    skip = jax.random.normal(ks, (B, in_dim, 2 * H, 2 * W), jnp.float32)
    params = init_params(kp, in_dim, out_dim)

    fwd = jax.jit(mask_upsample_forward)
    out = jax.block_until_ready(fwd(feat, skip, params))
    assert out.shape == (B, N, out_dim, 2 * H, 2 * W), out.shape

    ref = reference_forward(feat, skip, params)
    err = float(jnp.max(jnp.abs(out - ref)))
    if not jnp.allclose(out, ref, atol=2e-2, rtol=2e-2):
        raise AssertionError(f"mismatch vs reference, max abs err = {err}")
    print("KERNEL_OK")
</pallas_src>

<mosaic_0001>
module attributes {stable_mosaic.version = 11 : i64} {
  func.func @_fused_block_kernel(%arg0: i32, %arg1: memref<1x2x4x64xf32, #tpu.memory_space<vmem>>, %arg2: memref<1x4x512xf32, #tpu.memory_space<vmem>>, %arg3: memref<64x512xf32, #tpu.memory_space<vmem>>, %arg4: memref<8x36xf32, #tpu.memory_space<vmem>>, %arg5: memref<8x1xf32, #tpu.memory_space<vmem>>, %arg6: memref<8x72xf32, #tpu.memory_space<vmem>>, %arg7: memref<8x1xf32, #tpu.memory_space<vmem>>, %arg8: memref<8x4xf32, #tpu.memory_space<vmem>>, %arg9: memref<8x1xf32, #tpu.memory_space<vmem>>, %arg10: memref<1x384xf32, #tpu.memory_space<vmem>>, %arg11: memref<1x2x8x256xf32, #tpu.memory_space<vmem>>, %arg12: memref<4x512xf32, #tpu.memory_space<vmem>>, %arg13: memref<72x384xf32, #tpu.memory_space<vmem>>, %arg14: memref<8x640xf32, #tpu.memory_space<vmem>>) attributes {dimension_semantics = [#tpu.dimension_semantics<parallel>], iteration_bounds = array<i64: 2>, scalar_prefetch = 0 : i64, scratch_operands = 3 : i64, tpu.core_type = #tpu.core_type<tc>, window_params = [{transform_indices = @transform_0, window_bounds = array<i64: 1, 2, 4, 64>}, {transform_indices = @transform_1, window_bounds = array<i64: 1, 4, 512>}, {pipeline_mode = #tpu.pipeline_mode<synchronous>, transform_indices = @transform_2, window_bounds = array<i64: 64, 512>}, {pipeline_mode = #tpu.pipeline_mode<synchronous>, transform_indices = @transform_3, window_bounds = array<i64: 8, 36>}, {pipeline_mode = #tpu.pipeline_mode<synchronous>, transform_indices = @transform_4, window_bounds = array<i64: 8, 1>}, {pipeline_mode = #tpu.pipeline_mode<synchronous>, transform_indices = @transform_5, window_bounds = array<i64: 8, 72>}, {pipeline_mode = #tpu.pipeline_mode<synchronous>, transform_indices = @transform_6, window_bounds = array<i64: 8, 1>}, {pipeline_mode = #tpu.pipeline_mode<synchronous>, transform_indices = @transform_7, window_bounds = array<i64: 8, 4>}, {pipeline_mode = #tpu.pipeline_mode<synchronous>, transform_indices = @transform_8, window_bounds = array<i64: 8, 1>}, {pipeline_mode = #tpu.pipeline_mode<synchronous>, transform_indices = @transform_9, window_bounds = array<i64: 1, 384>}, {transform_indices = @transform_10, window_bounds = array<i64: 1, 2, 8, 256>}]} {
    %cst = arith.constant 0.000000e+00 : f32
    %0 = vector.broadcast %cst : f32 to vector<8x128xf32>
    %c0 = arith.constant 0 : index
    %c0_0 = arith.constant 0 : index
    %1 = vector.load %arg14[%c0, %c0_0] : memref<8x640xf32, #tpu.memory_space<vmem>>, vector<8x128xf32>
    tpu.vector_store %arg14[%c0, %c0_0], %0 {strides = array<i32>} : memref<8x640xf32, #tpu.memory_space<vmem>>, vector<8x128xf32>,
    %cst_1 = arith.constant 0.000000e+00 : f32
    %2 = vector.broadcast %cst_1 : f32 to vector<8x224xf32>
    %c0_2 = arith.constant 0 : index
    %c416 = arith.constant 416 : index
    %3 = vector.load %arg14[%c0_2, %c416] : memref<8x640xf32, #tpu.memory_space<vmem>>, vector<8x224xf32>
    tpu.vector_store %arg14[%c0_2, %c416], %2 {strides = array<i32>} : memref<8x640xf32, #tpu.memory_space<vmem>>, vector<8x224xf32>,
    %c0_3 = arith.constant 0 : index
    %c0_4 = arith.constant 0 : index
    %c0_5 = arith.constant 0 : index
    %c0_6 = arith.constant 0 : index
    %4 = vector.load %arg1[%c0_3, %c0_4, %c0_5, %c0_6] : memref<1x2x4x64xf32, #tpu.memory_space<vmem>>, vector<1x1x4x64xf32>
    %5 = vector.shape_cast %4 : vector<1x1x4x64xf32> to vector<4x64xf32>
    %c0_7 = arith.constant 0 : index
    %c0_8 = arith.constant 0 : index
    %6 = vector.load %arg3[%c0_7, %c0_8] : memref<64x512xf32, #tpu.memory_space<vmem>>, vector<64x512xf32>
    %cst_9 = arith.constant dense<0.000000e+00> : vector<4x512xf32>
    %7 = tpu.matmul %5, %6, %cst_9 {dimension_numbers = #tpu.dot_dimension_numbers<[1], [0], [0], [1], [0, 0, 1, 1], [], []>} : vector<4x64xf32>, vector<64x512xf32>, vector<4x512xf32> -> vector<4x512xf32>
    %c0_10 = arith.constant 0 : index
    %c0_11 = arith.constant 0 : index
    %c0_12 = arith.constant 0 : index
    %8 = vector.load %arg2[%c0_10, %c0_11, %c0_12] : memref<1x4x512xf32, #tpu.memory_space<vmem>>, vector<1x4x512xf32>
    %9 = vector.shape_cast %8 : vector<1x4x512xf32> to vector<4x512xf32>
    %10 = arith.addf %7, %9 : vector<4x512xf32>
    %c0_13 = arith.constant 0 : index
    %c0_14 = arith.constant 0 : index
    %11 = vector.load %arg12[%c0_13, %c0_14] : memref<4x512xf32, #tpu.memory_space<vmem>>, vector<4x512xf32>
    tpu.vector_store %arg12[%c0_13, %c0_14], %10 {strides = array<i32>} : memref<4x512xf32, #tpu.memory_space<vmem>>, vector<4x512xf32>,
    %c0_15 = arith.constant 0 : index
    %c0_16 = arith.constant 0 : index
    %12 = vector.load %arg12[%c0_15, %c0_16] : memref<4x512xf32, #tpu.memory_space<vmem>>, vector<4x384xf32>
    %c0_17 = arith.constant 0 : index
    %c0_18 = arith.constant 0 : index
    %13 = vector.load %arg13[%c0_17, %c0_18] : memref<72x384xf32, #tpu.memory_space<vmem>>, vector<4x384xf32>
    tpu.vector_store %arg13[%c0_17, %c0_18], %12 {strides = array<i32>} : memref<72x384xf32, #tpu.memory_space<vmem>>, vector<4x384xf32>,
    %c0_19 = arith.constant 0 : index
    %c1 = arith.constant 1 : index
    %14 = vector.load %arg12[%c0_19, %c1] : memref<4x512xf32, #tpu.memory_space<vmem>>, vector<4x384xf32>
    %c4 = arith.constant 4 : index
    %c0_20 = arith.constant 0 : index
    %15 = vector.load %arg13[%c4, %c0_20] : memref<72x384xf32, #tpu.memory_space<vmem>>, vector<4x384xf32>
    tpu.vector_store %arg13[%c4, %c0_20], %14 {strides = array<i32>} : memref<72x384xf32, #tpu.memory_space<vmem>>, vector<4x384xf32>,
    %c0_21 = arith.constant 0 : index
    %c2 = arith.constant 2 : index
    %16 = vector.load %arg12[%c0_21, %c2] : memref<4x512xf32, #tpu.memory_space<vmem>>, vector<4x384xf32>
    %c8 = arith.constant 8 : index
    %c0_22 = arith.constant 0 : index
    %17 = vector.load %arg13[%c8, %c0_22] : memref<72x384xf32, #tpu.memory_space<vmem>>, vector<4x384xf32>
    tpu.vector_store %arg13[%c8, %c0_22], %16 {strides = array<i32>} : memref<72x384xf32, #tpu.memory_space<vmem>>, vector<4x384xf32>,
    %c0_23 = arith.constant 0 : index
    %c18 = arith.constant 18 : index
    %18 = vector.load %arg12[%c0_23, %c18] : memref<4x512xf32, #tpu.memory_space<vmem>>, vector<4x384xf32>
    %c12 = arith.constant 12 : index
    %c0_24 = arith.constant 0 : index
    %19 = vector.load %arg13[%c12, %c0_24] : memref<72x384xf32, #tpu.memory_space<vmem>>, vector<4x384xf32>
    tpu.vector_store %arg13[%c12, %c0_24], %18 {strides = array<i32>} : memref<72x384xf32, #tpu.memory_space<vmem>>, vector<4x384xf32>,
    %c0_25 = arith.constant 0 : index
    %c19 = arith.constant 19 : index
    %20 = vector.load %arg12[%c0_25, %c19] : memref<4x512xf32, #tpu.memory_space<vmem>>, vector<4x384xf32>
    %c16 = arith.constant 16 : index
    %c0_26 = arith.constant 0 : index
    %21 = vector.load %arg13[%c16, %c0_26] : memref<72x384xf32, #tpu.memory_space<vmem>>, vector<4x384xf32>
    tpu.vector_store %arg13[%c16, %c0_26], %20 {strides = array<i32>} : memref<72x384xf32, #tpu.memory_space<vmem>>, vector<4x384xf32>,
    %c0_27 = arith.constant 0 : index
    %c20 = arith.constant 20 : index
    %22 = vector.load %arg12[%c0_27, %c20] : memref<4x512xf32, #tpu.memory_space<vmem>>, vector<4x384xf32>
    %c20_28 = arith.constant 20 : index
    %c0_29 = arith.constant 0 : index
    %23 = vector.load %arg13[%c20_28, %c0_29] : memref<72x384xf32, #tpu.memory_space<vmem>>, vector<4x384xf32>
    tpu.vector_store %arg13[%c20_28, %c0_29], %22 {strides = array<i32>} : memref<72x384xf32, #tpu.memory_space<vmem>>, vector<4x384xf32>,
    %c0_30 = arith.constant 0 : index
    %c36 = arith.constant 36 : index
    %24 = vector.load %arg12[%c0_30, %c36] : memref<4x512xf32, #tpu.memory_space<vmem>>, vector<4x384xf32>
    %c24 = arith.constant 24 : index
    %c0_31 = arith.constant 0 : index
    %25 = vector.load %arg13[%c24, %c0_31] : memref<72x384xf32, #tpu.memory_space<vmem>>, vector<4x384xf32>
    tpu.vector_store %arg13[%c24, %c0_31], %24 {strides = array<i32>} : memref<72x384xf32, #tpu.memory_space<vmem>>, vector<4x384xf32>,
    %c0_32 = arith.constant 0 : index
    %c37 = arith.constant 37 : index
    %26 = vector.load %arg12[%c0_32, %c37] : memref<4x512xf32, #tpu.memory_space<vmem>>, vector<4x384xf32>
    %c28 = arith.constant 28 : index
    %c0_33 = arith.constant 0 : index
    %27 = vector.load %arg13[%c28, %c0_33] : memref<72x384xf32, #tpu.memory_space<vmem>>, vector<4x384xf32>
    tpu.vector_store %arg13[%c28, %c0_33], %26 {strides = array<i32>} : memref<72x384xf32, #tpu.memory_space<vmem>>, vector<4x384xf32>,
    %c0_34 = arith.constant 0 : index
    %c38 = arith.constant 38 : index
    %28 = vector.load %arg12[%c0_34, %c38] : memref<4x512xf32, #tpu.memory_space<vmem>>, vector<4x384xf32>
    %c32 = arith.constant 32 : index
    %c0_35 = arith.constant 0 : index
    %29 = vector.load %arg13[%c32, %c0_35] : memref<72x384xf32, #tpu.memory_space<vmem>>, vector<4x384xf32>
    tpu.vector_store %arg13[%c32, %c0_35], %28 {strides = array<i32>} : memref<72x384xf32, #tpu.memory_space<vmem>>, vector<4x384xf32>,
    %c0_36 = arith.constant 0 : index
    %c0_37 = arith.constant 0 : index
    %30 = vector.load %arg4[%c0_36, %c0_37] : memref<8x36xf32, #tpu.memory_space<vmem>>, vector<8x36xf32>
    %c0_38 = arith.constant 0 : index
    %c0_39 = arith.constant 0 : index
    %31 = vector.load %arg13[%c0_38, %c0_39] : memref<72x384xf32, #tpu.memory_space<vmem>>, vector<36x384xf32>
    %cst_40 = arith.constant dense<0.000000e+00> : vector<8x384xf32>
    %32 = tpu.matmul %30, %31, %cst_40 {dimension_numbers = #tpu.dot_dimension_numbers<[1], [0], [0], [1], [0, 0, 1, 1], [], []>} : vector<8x36xf32>, vector<36x384xf32>, vector<8x384xf32> -> vector<8x384xf32>
    %c16_41 = arith.constant 16 : index
    %c0_42 = arith.constant 0 : index
    %33 = vector.load %arg13[%c16_41, %c0_42] : memref<72x384xf32, #tpu.memory_space<vmem>>, vector<4x384xf32>
    %c0_43 = arith.constant 0 : index
    %c0_44 = arith.constant 0 : index
    %34 = vector.load %arg8[%c0_43, %c0_44] : memref<8x4xf32, #tpu.memory_space<vmem>>, vector<8x4xf32>
    %cst_45 = arith.constant dense<0.000000e+00> : vector<8x384xf32>
    %35 = tpu.matmul %34, %33, %cst_45 {dimension_numbers = #tpu.dot_dimension_numbers<[1], [0], [0], [1], [0, 0, 1, 1], [], []>} : vector<8x4xf32>, vector<4x384xf32>, vector<8x384xf32> -> vector<8x384xf32>
    %c0_46 = arith.constant 0 : index
    %c0_47 = arith.constant 0 : index
    %36 = vector.load %arg9[%c0_46, %c0_47] : memref<8x1xf32, #tpu.memory_space<vmem>>, vector<8x1xf32>
    %37 = vector.broadcast %36 : vector<8x1xf32> to vector<8x384xf32>
    %38 = arith.addf %35, %37 : vector<8x384xf32>
    %c0_48 = arith.constant 0 : index
    %c0_49 = arith.constant 0 : index
    %39 = vector.load %arg5[%c0_48, %c0_49] : memref<8x1xf32, #tpu.memory_space<vmem>>, vector<8x1xf32>
    %40 = vector.broadcast %39 : vector<8x1xf32> to vector<8x384xf32>
    %41 = arith.addf %32, %40 : vector<8x384xf32>
    %cst_50 = arith.constant 5.000000e-01 : f32
    %42 = vector.broadcast %cst_50 : f32 to vector<8x384xf32>
    %43 = arith.mulf %42, %41 : vector<8x384xf32>
    %cst_51 = arith.constant 4.471500e-02 : f32
    %44 = vector.broadcast %cst_51 : f32 to vector<8x384xf32>
    %45 = arith.mulf %44, %41 : vector<8x384xf32>
    %46 = arith.mulf %45, %41 : vector<8x384xf32>
    %47 = arith.mulf %46, %41 : vector<8x384xf32>
    %48 = arith.addf %41, %47 : vector<8x384xf32>
    %cst_52 = arith.constant 0.797884583 : f32
    %49 = vector.broadcast %cst_52 : f32 to vector<8x384xf32>
    %50 = arith.mulf %49, %48 : vector<8x384xf32>
    %51 = math.tanh %50 : vector<8x384xf32>
    %cst_53 = arith.constant 1.000000e+00 : f32
    %52 = vector.broadcast %cst_53 : f32 to vector<8x384xf32>
    %53 = arith.addf %52, %51 : vector<8x384xf32>
    %54 = arith.mulf %43, %53 : vector<8x384xf32>
    %c0_54 = arith.constant 0 : index
    %c0_55 = arith.constant 0 : index
    %55 = vector.load %arg10[%c0_54, %c0_55] : memref<1x384xf32, #tpu.memory_space<vmem>>, vector<1x384xf32>
    %56 = vector.broadcast %55 : vector<1x384xf32> to vector<8x384xf32>
    %57 = arith.mulf %54, %56 : vector<8x384xf32>
    %58 = vector.extract_strided_slice %57 {offsets = [0, 0], sizes = [8, 288], strides = [1, 1]} : vector<8x384xf32> to vector<8x288xf32>
    %c0_56 = arith.constant 0 : index
    %c128 = arith.constant 128 : index
    %59 = vector.load %arg14[%c0_56, %c128] : memref<8x640xf32, #tpu.memory_space<vmem>>, vector<8x288xf32>
    tpu.vector_store %arg14[%c0_56, %c128], %58 {strides = array<i32>} : memref<8x640xf32, #tpu.memory_space<vmem>>, vector<8x288xf32>,
    %c0_57 = arith.constant 0 : index
    %c109 = arith.constant 109 : index
    %60 = vector.load %arg14[%c0_57, %c109] : memref<8x640xf32, #tpu.memory_space<vmem>>, vector<8x384xf32>
    %c0_58 = arith.constant 0 : index
    %c0_59 = arith.constant 0 : index
    %61 = vector.load %arg13[%c0_58, %c0_59] : memref<72x384xf32, #tpu.memory_space<vmem>>, vector<8x384xf32>
    tpu.vector_store %arg13[%c0_58, %c0_59], %60 {strides = array<i32>} : memref<72x384xf32, #tpu.memory_space<vmem>>, vector<8x384xf32>,
    %c0_60 = arith.constant 0 : index
    %c110 = arith.constant 110 : index
    %62 = vector.load %arg14[%c0_60, %c110] : memref<8x640xf32, #tpu.memory_space<vmem>>, vector<8x384xf32>
    %c8_61 = arith.constant 8 : index
    %c0_62 = arith.constant 0 : index
    %63 = vector.load %arg13[%c8_61, %c0_62] : memref<72x384xf32, #tpu.memory_space<vmem>>, vector<8x384xf32>
    tpu.vector_store %arg13[%c8_61, %c0_62], %62 {strides = array<i32>} : memref<72x384xf32, #tpu.memory_space<vmem>>, vector<8x384xf32>,
    %c0_63 = arith.constant 0 : index
    %c111 = arith.constant 111 : index
    %64 = vector.load %arg14[%c0_63, %c111] : memref<8x640xf32, #tpu.memory_space<vmem>>, vector<8x384xf32>
    %c16_64 = arith.constant 16 : index
    %c0_65 = arith.constant 0 : index
    %65 = vector.load %arg13[%c16_64, %c0_65] : memref<72x384xf32, #tpu.memory_space<vmem>>, vector<8x384xf32>
    tpu.vector_store %arg13[%c16_64, %c0_65], %64 {strides = array<i32>} : memref<72x384xf32, #tpu.memory_space<vmem>>, vector<8x384xf32>,
    %c0_66 = arith.constant 0 : index
    %c127 = arith.constant 127 : index
    %66 = vector.load %arg14[%c0_66, %c127] : memref<8x640xf32, #tpu.memory_space<vmem>>, vector<8x384xf32>
    %c24_67 = arith.constant 24 : index
    %c0_68 = arith.constant 0 : index
    %67 = vector.load %arg13[%c24_67, %c0_68] : memref<72x384xf32, #tpu.memory_space<vmem>>, vector<8x384xf32>
    tpu.vector_store %arg13[%c24_67, %c0_68], %66 {strides = array<i32>} : memref<72x384xf32, #tpu.memory_space<vmem>>, vector<8x384xf32>,
    %c0_69 = arith.constant 0 : index
    %c128_70 = arith.constant 128 : index
    %68 = vector.load %arg14[%c0_69, %c128_70] : memref<8x640xf32, #tpu.memory_space<vmem>>, vector<8x384xf32>
    %c32_71 = arith.constant 32 : index
    %c0_72 = arith.constant 0 : index
    %69 = vector.load %arg13[%c32_71, %c0_72] : memref<72x384xf32, #tpu.memory_space<vmem>>, vector<8x384xf32>
    tpu.vector_store %arg13[%c32_71, %c0_72], %68 {strides = array<i32>} : memref<72x384xf32, #tpu.memory_space<vmem>>, vector<8x384xf32>,
    %c0_73 = arith.constant 0 : index
    %c129 = arith.constant 129 : index
    %70 = vector.load %arg14[%c0_73, %c129] : memref<8x640xf32, #tpu.memory_space<vmem>>, vector<8x384xf32>
    %c40 = arith.constant 40 : index
    %c0_74 = arith.constant 0 : index
    %71 = vector.load %arg13[%c40, %c0_74] : memref<72x384xf32, #tpu.memory_space<vmem>>, vector<8x384xf32>
    tpu.vector_store %arg13[%c40, %c0_74], %70 {strides = array<i32>} : memref<72x384xf32, #tpu.memory_space<vmem>>, vector<8x384xf32>,
    %c0_75 = arith.constant 0 : index
    %c145 = arith.constant 145 : index
    %72 = vector.load %arg14[%c0_75, %c145] : memref<8x640xf32, #tpu.memory_space<vmem>>, vector<8x384xf32>
    %c48 = arith.constant 48 : index
    %c0_76 = arith.constant 0 : index
    %73 = vector.load %arg13[%c48, %c0_76] : memref<72x384xf32, #tpu.memory_space<vmem>>, vector<8x384xf32>
    tpu.vector_store %arg13[%c48, %c0_76], %72 {strides = array<i32>} : memref<72x384xf32, #tpu.memory_space<vmem>>, vector<8x384xf32>,
    %c0_77 = arith.constant 0 : index
    %c146 = arith.constant 146 : index
    %74 = vector.load %arg14[%c0_77, %c146] : memref<8x640xf32, #tpu.memory_space<vmem>>, vector<8x384xf32>
    %c56 = arith.constant 56 : index
    %c0_78 = arith.constant 0 : index
    %75 = vector.load %arg13[%c56, %c0_78] : memref<72x384xf32, #tpu.memory_space<vmem>>, vector<8x384xf32>
    tpu.vector_store %arg13[%c56, %c0_78], %74 {strides = array<i32>} : memref<72x384xf32, #tpu.memory_space<vmem>>, vector<8x384xf32>,
    %c0_79 = arith.constant 0 : index
    %c147 = arith.constant 147 : index
    %76 = vector.load %arg14[%c0_79, %c147] : memref<8x640xf32, #tpu.memory_space<vmem>>, vector<8x384xf32>
    %c64 = arith.constant 64 : index
    %c0_80 = arith.constant 0 : index
    %77 = vector.load %arg13[%c64, %c0_80] : memref<72x384xf32, #tpu.memory_space<vmem>>, vector<8x384xf32>
    tpu.vector_store %arg13[%c64, %c0_80], %76 {strides = array<i32>} : memref<72x384xf32, #tpu.memory_space<vmem>>, vector<8x384xf32>,
    %c0_81 = arith.constant 0 : index
    %c0_82 = arith.constant 0 : index
    %78 = vector.load %arg6[%c0_81, %c0_82] : memref<8x72xf32, #tpu.memory_space<vmem>>, vector<8x72xf32>
    %c0_83 = arith.constant 0 : index
    %c0_84 = arith.constant 0 : index
    %79 = vector.load %arg13[%c0_83, %c0_84] : memref<72x384xf32, #tpu.memory_space<vmem>>, vector<72x384xf32>
    %cst_85 = arith.constant dense<0.000000e+00> : vector<8x384xf32>
    %80 = tpu.matmul %78, %79, %cst_85 {dimension_numbers = #tpu.dot_dimension_numbers<[1], [0], [0], [1], [0, 0, 1, 1], [], []>} : vector<8x72xf32>, vector<72x384xf32>, vector<8x384xf32> -> vector<8x384xf32>
    %c0_86 = arith.constant 0 : index
    %c0_87 = arith.constant 0 : index
    %81 = vector.load %arg7[%c0_86, %c0_87] : memref<8x1xf32, #tpu.memory_space<vmem>>, vector<8x1xf32>
    %82 = vector.broadcast %81 : vector<8x1xf32> to vector<8x384xf32>
    %83 = arith.addf %80, %82 : vector<8x384xf32>
    %cst_88 = arith.constant 5.000000e-01 : f32
    %84 = vector.broadcast %cst_88 : f32 to vector<8x384xf32>
    %85 = arith.mulf %84, %83 : vector<8x384xf32>
    %cst_89 = arith.constant 4.471500e-02 : f32
    %86 = vector.broadcast %cst_89 : f32 to vector<8x384xf32>
    %87 = arith.mulf %86, %83 : vector<8x384xf32>
    %88 = arith.mulf %87, %83 : vector<8x384xf32>
    %89 = arith.mulf %88, %83 : vector<8x384xf32>
    %90 = arith.addf %83, %89 : vector<8x384xf32>
    %cst_90 = arith.constant 0.797884583 : f32
    %91 = vector.broadcast %cst_90 : f32 to vector<8x384xf32>
    %92 = arith.mulf %91, %90 : vector<8x384xf32>
    %93 = math.tanh %92 : vector<8x384xf32>
    %cst_91 = arith.constant 1.000000e+00 : f32
    %94 = vector.broadcast %cst_91 : f32 to vector<8x384xf32>
    %95 = arith.addf %94, %93 : vector<8x384xf32>
    %96 = arith.mulf %85, %95 : vector<8x384xf32>
    %97 = arith.addf %38, %96 : vector<8x384xf32>
    %98 = vector.extract_strided_slice %97 {offsets = [0, 0], sizes = [8, 16], strides = [1, 1]} : vector<8x384xf32> to vector<8x16xf32>
    %c0_92 = arith.constant 0 : index
    %c0_93 = arith.constant 0 : index
    %c0_94 = arith.constant 0 : index
    %c0_95 = arith.constant 0 : index
    %99 = vector.load %arg11[%c0_92, %c0_93, %c0_94, %c0_95] : memref<1x2x8x256xf32, #tpu.memory_space<vmem>>, vector<1x1x8x16xf32>
    %100 = vector.shape_cast %99 : vector<1x1x8x16xf32> to vector<8x16xf32>
    %101 = vector.shape_cast %98 : vector<8x16xf32> to vector<1x1x8x16xf32>
    tpu.vector_store %arg11[%c0_92, %c0_93, %c0_94, %c0_95], %101 {strides = array<i32>} : memref<1x2x8x256xf32, #tpu.memory_space<vmem>>, vector<1x1x8x16xf32>,
    %102 = vector.extract_strided_slice %97 {offsets = [0, 18], sizes = [8, 16], strides = [1, 1]} : vector<8x384xf32> to vector<8x16xf32>
    %c0_96 = arith.constant 0 : index
    %c0_97 = arith.constant 0 : index
    %c0_98 = arith.constant 0 : index
    %c16_99 = arith.constant 16 : index
    %103 = vector.load %arg11[%c0_96, %c0_97, %c0_98, %c16_99] : memref<1x2x8x256xf32, #tpu.memory_space<vmem>>, vector<1x1x8x16xf32>
    %104 = vector.shape_cast %103 : vector<1x1x8x16xf32> to vector<8x16xf32>
    %105 = vector.shape_cast %102 : vector<8x16xf32> to vector<1x1x8x16xf32>
    tpu.vector_store %arg11[%c0_96, %c0_97, %c0_98, %c16_99], %105 {strides = array<i32>} : memref<1x2x8x256xf32, #tpu.memory_space<vmem>>, vector<1x1x8x16xf32>,
    %106 = vector.extract_strided_slice %97 {offsets = [0, 36], sizes = [8, 16], strides = [1, 1]} : vector<8x384xf32> to vector<8x16xf32>
    %c0_100 = arith.constant 0 : index
    %c0_101 = arith.constant 0 : index
    %c0_102 = arith.constant 0 : index
    %c32_103 = arith.constant 32 : index
    %107 = vector.load %arg11[%c0_100, %c0_101, %c0_102, %c32_103] : memref<1x2x8x256xf32, #tpu.memory_space<vmem>>, vector<1x1x8x16xf32>
    %108 = vector.shape_cast %107 : vector<1x1x8x16xf32> to vector<8x16xf32>
    %109 = vector.shape_cast %106 : vector<8x16xf32> to vector<1x1x8x16xf32>
    tpu.vector_store %arg11[%c0_100, %c0_101, %c0_102, %c32_103], %109 {strides = array<i32>} : memref<1x2x8x256xf32, #tpu.memory_space<vmem>>, vector<1x1x8x16xf32>,
    %110 = vector.extract_strided_slice %97 {offsets = [0, 54], sizes = [8, 16], strides = [1, 1]} : vector<8x384xf32> to vector<8x16xf32>
    %c0_104 = arith.constant 0 : index
    %c0_105 = arith.constant 0 : index
    %c0_106 = arith.constant 0 : index
    %c48_107 = arith.constant 48 : index
    %111 = vector.load %arg11[%c0_104, %c0_105, %c0_106, %c48_107] : memref<1x2x8x256xf32, #tpu.memory_space<vmem>>, vector<1x1x8x16xf32>
    %112 = vector.shape_cast %111 : vector<1x1x8x16xf32> to vector<8x16xf32>
    %113 = vector.shape_cast %110 : vector<8x16xf32> to vector<1x1x8x16xf32>
    tpu.vector_store %arg11[%c0_104, %c0_105, %c0_106, %c48_107], %113 {strides = array<i32>} : memref<1x2x8x256xf32, #tpu.memory_space<vmem>>, vector<1x1x8x16xf32>,
    %114 = vector.extract_strided_slice %97 {offsets = [0, 72], sizes = [8, 16], strides = [1, 1]} : vector<8x384xf32> to vector<8x16xf32>
    %c0_108 = arith.constant 0 : index
    %c0_109 = arith.constant 0 : index
    %c0_110 = arith.constant 0 : index
    %c64_111 = arith.constant 64 : index
    %115 = vector.load %arg11[%c0_108, %c0_109, %c0_110, %c64_111] : memref<1x2x8x256xf32, #tpu.memory_space<vmem>>, vector<1x1x8x16xf32>
    %116 = vector.shape_cast %115 : vector<1x1x8x16xf32> to vector<8x16xf32>
    %117 = vector.shape_cast %114 : vector<8x16xf32> to vector<1x1x8x16xf32>
    tpu.vector_store %arg11[%c0_108, %c0_109, %c0_110, %c64_111], %117 {strides = array<i32>} : memref<1x2x8x256xf32, #tpu.memory_space<vmem>>, vector<1x1x8x16xf32>,
    %118 = vector.extract_strided_slice %97 {offsets = [0, 90], sizes = [8, 16], strides = [1, 1]} : vector<8x384xf32> to vector<8x16xf32>
    %c0_112 = arith.constant 0 : index
    %c0_113 = arith.constant 0 : index
    %c0_114 = arith.constant 0 : index
    %c80 = arith.constant 80 : index
    %119 = vector.load %arg11[%c0_112, %c0_113, %c0_114, %c80] : memref<1x2x8x256xf32, #tpu.memory_space<vmem>>, vector<1x1x8x16xf32>
    %120 = vector.shape_cast %119 : vector<1x1x8x16xf32> to vector<8x16xf32>
    %121 = vector.shape_cast %118 : vector<8x16xf32> to vector<1x1x8x16xf32>
    tpu.vector_store %arg11[%c0_112, %c0_113, %c0_114, %c80], %121 {strides = array<i32>} : memref<1x2x8x256xf32, #tpu.memory_space<vmem>>, vector<1x1x8x16xf32>,
    %122 = vector.extract_strided_slice %97 {offsets = [0, 108], sizes = [8, 16], strides = [1, 1]} : vector<8x384xf32> to vector<8x16xf32>
    %c0_115 = arith.constant 0 : index
    %c0_116 = arith.constant 0 : index
    %c0_117 = arith.constant 0 : index
    %c96 = arith.constant 96 : index
    %123 = vector.load %arg11[%c0_115, %c0_116, %c0_117, %c96] : memref<1x2x8x256xf32, #tpu.memory_space<vmem>>, vector<1x1x8x16xf32>
    %124 = vector.shape_cast %123 : vector<1x1x8x16xf32> to vector<8x16xf32>
    %125 = vector.shape_cast %122 : vector<8x16xf32> to vector<1x1x8x16xf32>
    tpu.vector_store %arg11[%c0_115, %c0_116, %c0_117, %c96], %125 {strides = array<i32>} : memref<1x2x8x256xf32, #tpu.memory_space<vmem>>, vector<1x1x8x16xf32>,
    %126 = vector.extract_strided_slice %97 {offsets = [0, 126], sizes = [8, 16], strides = [1, 1]} : vector<8x384xf32> to vector<8x16xf32>
    %c0_118 = arith.constant 0 : index
    %c0_119 = arith.constant 0 : index
    %c0_120 = arith.constant 0 : index
    %c112 = arith.constant 112 : index
    %127 = vector.load %arg11[%c0_118, %c0_119, %c0_120, %c112] : memref<1x2x8x256xf32, #tpu.memory_space<vmem>>, vector<1x1x8x16xf32>
    %128 = vector.shape_cast %127 : vector<1x1x8x16xf32> to vector<8x16xf32>
    %129 = vector.shape_cast %126 : vector<8x16xf32> to vector<1x1x8x16xf32>
    tpu.vector_store %arg11[%c0_118, %c0_119, %c0_120, %c112], %129 {strides = array<i32>} : memref<1x2x8x256xf32, #tpu.memory_space<vmem>>, vector<1x1x8x16xf32>,
    %130 = vector.extract_strided_slice %97 {offsets = [0, 144], sizes = [8, 16], strides = [1, 1]} : vector<8x384xf32> to vector<8x16xf32>
    %c0_121 = arith.constant 0 : index
    %c0_122 = arith.constant 0 : index
    %c0_123 = arith.constant 0 : index
    %c128_124 = arith.constant 128 : index
    %131 = vector.load %arg11[%c0_121, %c0_122, %c0_123, %c128_124] : memref<1x2x8x256xf32, #tpu.memory_space<vmem>>, vector<1x1x8x16xf32>
    %132 = vector.shape_cast %131 : vector<1x1x8x16xf32> to vector<8x16xf32>
    %133 = vector.shape_cast %130 : vector<8x16xf32> to vector<1x1x8x16xf32>
    tpu.vector_store %arg11[%c0_121, %c0_122, %c0_123, %c128_124], %133 {strides = array<i32>} : memref<1x2x8x256xf32, #tpu.memory_space<vmem>>, vector<1x1x8x16xf32>,
    %134 = vector.extract_strided_slice %97 {offsets = [0, 162], sizes = [8, 16], strides = [1, 1]} : vector<8x384xf32> to vector<8x16xf32>
    %c0_125 = arith.constant 0 : index
    %c0_126 = arith.constant 0 : index
    %c0_127 = arith.constant 0 : index
    %c144 = arith.constant 144 : index
    %135 = vector.load %arg11[%c0_125, %c0_126, %c0_127, %c144] : memref<1x2x8x256xf32, #tpu.memory_space<vmem>>, vector<1x1x8x16xf32>
    %136 = vector.shape_cast %135 : vector<1x1x8x16xf32> to vector<8x16xf32>
    %137 = vector.shape_cast %134 : vector<8x16xf32> to vector<1x1x8x16xf32>
    tpu.vector_store %arg11[%c0_125, %c0_126, %c0_127, %c144], %137 {strides = array<i32>} : memref<1x2x8x256xf32, #tpu.memory_space<vmem>>, vector<1x1x8x16xf32>,
    %138 = vector.extract_strided_slice %97 {offsets = [0, 180], sizes = [8, 16], strides = [1, 1]} : vector<8x384xf32> to vector<8x16xf32>
    %c0_128 = arith.constant 0 : index
    %c0_129 = arith.constant 0 : index
    %c0_130 = arith.constant 0 : index
    %c160 = arith.constant 160 : index
    %139 = vector.load %arg11[%c0_128, %c0_129, %c0_130, %c160] : memref<1x2x8x256xf32, #tpu.memory_space<vmem>>, vector<1x1x8x16xf32>
    %140 = vector.shape_cast %139 : vector<1x1x8x16xf32> to vector<8x16xf32>
    %141 = vector.shape_cast %138 : vector<8x16xf32> to vector<1x1x8x16xf32>
    tpu.vector_store %arg11[%c0_128, %c0_129, %c0_130, %c160], %141 {strides = array<i32>} : memref<1x2x8x256xf32, #tpu.memory_space<vmem>>, vector<1x1x8x16xf32>,
    %142 = vector.extract_strided_slice %97 {offsets = [0, 198], sizes = [8, 16], strides = [1, 1]} : vector<8x384xf32> to vector<8x16xf32>
    %c0_131 = arith.constant 0 : index
    %c0_132 = arith.constant 0 : index
    %c0_133 = arith.constant 0 : index
    %c176 = arith.constant 176 : index
    %143 = vector.load %arg11[%c0_131, %c0_132, %c0_133, %c176] : memref<1x2x8x256xf32, #tpu.memory_space<vmem>>, vector<1x1x8x16xf32>
    %144 = vector.shape_cast %143 : vector<1x1x8x16xf32> to vector<8x16xf32>
    %145 = vector.shape_cast %142 : vector<8x16xf32> to vector<1x1x8x16xf32>
    tpu.vector_store %arg11[%c0_131, %c0_132, %c0_133, %c176], %145 {strides = array<i32>} : memref<1x2x8x256xf32, #tpu.memory_space<vmem>>, vector<1x1x8x16xf32>,
    %146 = vector.extract_strided_slice %97 {offsets = [0, 216], sizes = [8, 16], strides = [1, 1]} : vector<8x384xf32> to vector<8x16xf32>
    %c0_134 = arith.constant 0 : index
    %c0_135 = arith.constant 0 : index
    %c0_136 = arith.constant 0 : index
    %c192 = arith.constant 192 : index
    %147 = vector.load %arg11[%c0_134, %c0_135, %c0_136, %c192] : memref<1x2x8x256xf32, #tpu.memory_space<vmem>>, vector<1x1x8x16xf32>
    %148 = vector.shape_cast %147 : vector<1x1x8x16xf32> to vector<8x16xf32>
    %149 = vector.shape_cast %146 : vector<8x16xf32> to vector<1x1x8x16xf32>
    tpu.vector_store %arg11[%c0_134, %c0_135, %c0_136, %c192], %149 {strides = array<i32>} : memref<1x2x8x256xf32, #tpu.memory_space<vmem>>, vector<1x1x8x16xf32>,
    %150 = vector.extract_strided_slice %97 {offsets = [0, 234], sizes = [8, 16], strides = [1, 1]} : vector<8x384xf32> to vector<8x16xf32>
    %c0_137 = arith.constant 0 : index
    %c0_138 = arith.constant 0 : index
    %c0_139 = arith.constant 0 : index
    %c208 = arith.constant 208 : index
    %151 = vector.load %arg11[%c0_137, %c0_138, %c0_139, %c208] : memref<1x2x8x256xf32, #tpu.memory_space<vmem>>, vector<1x1x8x16xf32>
    %152 = vector.shape_cast %151 : vector<1x1x8x16xf32> to vector<8x16xf32>
    %153 = vector.shape_cast %150 : vector<8x16xf32> to vector<1x1x8x16xf32>
    tpu.vector_store %arg11[%c0_137, %c0_138, %c0_139, %c208], %153 {strides = array<i32>} : memref<1x2x8x256xf32, #tpu.memory_space<vmem>>, vector<1x1x8x16xf32>,
    %154 = vector.extract_strided_slice %97 {offsets = [0, 252], sizes = [8, 16], strides = [1, 1]} : vector<8x384xf32> to vector<8x16xf32>
    %c0_140 = arith.constant 0 : index
    %c0_141 = arith.constant 0 : index
    %c0_142 = arith.constant 0 : index
    %c224 = arith.constant 224 : index
    %155 = vector.load %arg11[%c0_140, %c0_141, %c0_142, %c224] : memref<1x2x8x256xf32, #tpu.memory_space<vmem>>, vector<1x1x8x16xf32>
    %156 = vector.shape_cast %155 : vector<1x1x8x16xf32> to vector<8x16xf32>
    %157 = vector.shape_cast %154 : vector<8x16xf32> to vector<1x1x8x16xf32>
    tpu.vector_store %arg11[%c0_140, %c0_141, %c0_142, %c224], %157 {strides = array<i32>} : memref<1x2x8x256xf32, #tpu.memory_space<vmem>>, vector<1x1x8x16xf32>,
    %158 = vector.extract_strided_slice %97 {offsets = [0, 270], sizes = [8, 16], strides = [1, 1]} : vector<8x384xf32> to vector<8x16xf32>
    %c0_143 = arith.constant 0 : index
    %c0_144 = arith.constant 0 : index
    %c0_145 = arith.constant 0 : index
    %c240 = arith.constant 240 : index
    %159 = vector.load %arg11[%c0_143, %c0_144, %c0_145, %c240] : memref<1x2x8x256xf32, #tpu.memory_space<vmem>>, vector<1x1x8x16xf32>
    %160 = vector.shape_cast %159 : vector<1x1x8x16xf32> to vector<8x16xf32>
    %161 = vector.shape_cast %158 : vector<8x16xf32> to vector<1x1x8x16xf32>
    tpu.vector_store %arg11[%c0_143, %c0_144, %c0_145, %c240], %161 {strides = array<i32>} : memref<1x2x8x256xf32, #tpu.memory_space<vmem>>, vector<1x1x8x16xf32>,
    %c0_146 = arith.constant 0 : index
    %c1_147 = arith.constant 1 : index
    %c0_148 = arith.constant 0 : index
    %c0_149 = arith.constant 0 : index
    %162 = vector.load %arg1[%c0_146, %c1_147, %c0_148, %c0_149] : memref<1x2x4x64xf32, #tpu.memory_space<vmem>>, vector<1x1x4x64xf32>
    %163 = vector.shape_cast %162 : vector<1x1x4x64xf32> to vector<4x64xf32>
    %c0_150 = arith.constant 0 : index
    %c0_151 = arith.constant 0 : index
    %164 = vector.load %arg3[%c0_150, %c0_151] : memref<64x512xf32, #tpu.memory_space<vmem>>, vector<64x512xf32>
    %cst_152 = arith.constant dense<0.000000e+00> : vector<4x512xf32>
    %165 = tpu.matmul %163, %164, %cst_152 {dimension_numbers = #tpu.dot_dimension_numbers<[1], [0], [0], [1], [0, 0, 1, 1], [], []>} : vector<4x64xf32>, vector<64x512xf32>, vector<4x512xf32> -> vector<4x512xf32>
    %c0_153 = arith.constant 0 : index
    %c0_154 = arith.constant 0 : index
    %c0_155 = arith.constant 0 : index
    %166 = vector.load %arg2[%c0_153, %c0_154, %c0_155] : memref<1x4x512xf32, #tpu.memory_space<vmem>>, vector<1x4x512xf32>
    %167 = vector.shape_cast %166 : vector<1x4x512xf32> to vector<4x512xf32>
    %168 = arith.addf %165, %167 : vector<4x512xf32>
    %c0_156 = arith.constant 0 : index
    %c0_157 = arith.constant 0 : index
    %169 = vector.load %arg12[%c0_156, %c0_157] : memref<4x512xf32, #tpu.memory_space<vmem>>, vector<4x512xf32>
    tpu.vector_store %arg12[%c0_156, %c0_157], %168 {strides = array<i32>} : memref<4x512xf32, #tpu.memory_space<vmem>>, vector<4x512xf32>,
    %c0_158 = arith.constant 0 : index
    %c0_159 = arith.constant 0 : index
    %170 = vector.load %arg12[%c0_158, %c0_159] : memref<4x512xf32, #tpu.memory_space<vmem>>, vector<4x384xf32>
    %c0_160 = arith.constant 0 : index
    %c0_161 = arith.constant 0 : index
    %171 = vector.load %arg13[%c0_160, %c0_161] : memref<72x384xf32, #tpu.memory_space<vmem>>, vector<4x384xf32>
    tpu.vector_store %arg13[%c0_160, %c0_161], %170 {strides = array<i32>} : memref<72x384xf32, #tpu.memory_space<vmem>>, vector<4x384xf32>,
    %c0_162 = arith.constant 0 : index
    %c1_163 = arith.constant 1 : index
    %172 = vector.load %arg12[%c0_162, %c1_163] : memref<4x512xf32, #tpu.memory_space<vmem>>, vector<4x384xf32>
    %c4_164 = arith.constant 4 : index
    %c0_165 = arith.constant 0 : index
    %173 = vector.load %arg13[%c4_164, %c0_165] : memref<72x384xf32, #tpu.memory_space<vmem>>, vector<4x384xf32>
    tpu.vector_store %arg13[%c4_164, %c0_165], %172 {strides = array<i32>} : memref<72x384xf32, #tpu.memory_space<vmem>>, vector<4x384xf32>,
    %c0_166 = arith.constant 0 : index
    %c2_167 = arith.constant 2 : index
    %174 = vector.load %arg12[%c0_166, %c2_167] : memref<4x512xf32, #tpu.memory_space<vmem>>, vector<4x384xf32>
    %c8_168 = arith.constant 8 : index
    %c0_169 = arith.constant 0 : index
    %175 = vector.load %arg13[%c8_168, %c0_169] : memref<72x384xf32, #tpu.memory_space<vmem>>, vector<4x384xf32>
    tpu.vector_store %arg13[%c8_168, %c0_169], %174 {strides = array<i32>} : memref<72x384xf32, #tpu.memory_space<vmem>>, vector<4x384xf32>,
    %c0_170 = arith.constant 0 : index
    %c18_171 = arith.constant 18 : index
    %176 = vector.load %arg12[%c0_170, %c18_171] : memref<4x512xf32, #tpu.memory_space<vmem>>, vector<4x384xf32>
    %c12_172 = arith.constant 12 : index
    %c0_173 = arith.constant 0 : index
    %177 = vector.load %arg13[%c12_172, %c0_173] : memref<72x384xf32, #tpu.memory_space<vmem>>, vector<4x384xf32>
    tpu.vector_store %arg13[%c12_172, %c0_173], %176 {strides = array<i32>} : memref<72x384xf32, #tpu.memory_space<vmem>>, vector<4x384xf32>,
    %c0_174 = arith.constant 0 : index
    %c19_175 = arith.constant 19 : index
    %178 = vector.load %arg12[%c0_174, %c19_175] : memref<4x512xf32, #tpu.memory_space<vmem>>, vector<4x384xf32>
    %c16_176 = arith.constant 16 : index
    %c0_177 = arith.constant 0 : index
    %179 = vector.load %arg13[%c16_176, %c0_177] : memref<72x384xf32, #tpu.memory_space<vmem>>, vector<4x384xf32>
    tpu.vector_store %arg13[%c16_176, %c0_177], %178 {strides = array<i32>} : memref<72x384xf32, #tpu.memory_space<vmem>>, vector<4x384xf32>,
    %c0_178 = arith.constant 0 : index
    %c20_179 = arith.constant 20 : index
    %180 = vector.load %arg12[%c0_178, %c20_179] : memref<4x512xf32, #tpu.memory_space<vmem>>, vector<4x384xf32>
    %c20_180 = arith.constant 20 : index
    %c0_181 = arith.constant 0 : index
    %181 = vector.load %arg13[%c20_180, %c0_181] : memref<72x384xf32, #tpu.memory_space<vmem>>, vector<4x384xf32>
    tpu.vector_store %arg13[%c20_180, %c0_181], %180 {strides = array<i32>} : memref<72x384xf32, #tpu.memory_space<vmem>>, vector<4x384xf32>,
    %c0_182 = arith.constant 0 : index
    %c36_183 = arith.constant 36 : index
    %182 = vector.load %arg12[%c0_182, %c36_183] : memref<4x512xf32, #tpu.memory_space<vmem>>, vector<4x384xf32>
    %c24_184 = arith.constant 24 : index
    %c0_185 = arith.constant 0 : index
    %183 = vector.load %arg13[%c24_184, %c0_185] : memref<72x384xf32, #tpu.memory_space<vmem>>, vector<4x384xf32>
    tpu.vector_store %arg13[%c24_184, %c0_185], %182 {strides = array<i32>} : memref<72x384xf32, #tpu.memory_space<vmem>>, vector<4x384xf32>,
    %c0_186 = arith.constant 0 : index
    %c37_187 = arith.constant 37 : index
    %184 = vector.load %arg12[%c0_186, %c37_187] : memref<4x512xf32, #tpu.memory_space<vmem>>, vector<4x384xf32>
    %c28_188 = arith.constant 28 : index
    %c0_189 = arith.constant 0 : index
    %185 = vector.load %arg13[%c28_188, %c0_189] : memref<72x384xf32, #tpu.memory_space<vmem>>, vector<4x384xf32>
    tpu.vector_store %arg13[%c28_188, %c0_189], %184 {strides = array<i32>} : memref<72x384xf32, #tpu.memory_space<vmem>>, vector<4x384xf32>,
    %c0_190 = arith.constant 0 : index
    %c38_191 = arith.constant 38 : index
    %186 = vector.load %arg12[%c0_190, %c38_191] : memref<4x512xf32, #tpu.memory_space<vmem>>, vector<4x384xf32>
    %c32_192 = arith.constant 32 : index
    %c0_193 = arith.constant 0 : index
    %187 = vector.load %arg13[%c32_192, %c0_193] : memref<72x384xf32, #tpu.memory_space<vmem>>, vector<4x384xf32>
    tpu.vector_store %arg13[%c32_192, %c0_193], %186 {strides = array<i32>} : memref<72x384xf32, #tpu.memory_space<vmem>>, vector<4x384xf32>,
    %c0_194 = arith.constant 0 : index
    %c0_195 = arith.constant 0 : index
    %188 = vector.load %arg4[%c0_194, %c0_195] : memref<8x36xf32, #tpu.memory_space<vmem>>, vector<8x36xf32>
    %c0_196 = arith.constant 0 : index
    %c0_197 = arith.constant 0 : index
    %189 = vector.load %arg13[%c0_196, %c0_197] : memref<72x384xf32, #tpu.memory_space<vmem>>, vector<36x384xf32>
    %cst_198 = arith.constant dense<0.000000e+00> : vector<8x384xf32>
    %190 = tpu.matmul %188, %189, %cst_198 {dimension_numbers = #tpu.dot_dimension_numbers<[1], [0], [0], [1], [0, 0, 1, 1], [], []>} : vector<8x36xf32>, vector<36x384xf32>, vector<8x384xf32> -> vector<8x384xf32>
    %c16_199 = arith.constant 16 : index
    %c0_200 = arith.constant 0 : index
    %191 = vector.load %arg13[%c16_199, %c0_200] : memref<72x384xf32, #tpu.memory_space<vmem>>, vector<4x384xf32>
    %c0_201 = arith.constant 0 : index
    %c0_202 = arith.constant 0 : index
    %192 = vector.load %arg8[%c0_201, %c0_202] : memref<8x4xf32, #tpu.memory_space<vmem>>, vector<8x4xf32>
    %cst_203 = arith.constant dense<0.000000e+00> : vector<8x384xf32>
    %193 = tpu.matmul %192, %191, %cst_203 {dimension_numbers = #tpu.dot_dimension_numbers<[1], [0], [0], [1], [0, 0, 1, 1], [], []>} : vector<8x4xf32>, vector<4x384xf32>, vector<8x384xf32> -> vector<8x384xf32>
    %c0_204 = arith.constant 0 : index
    %c0_205 = arith.constant 0 : index
    %194 = vector.load %arg9[%c0_204, %c0_205] : memref<8x1xf32, #tpu.memory_space<vmem>>, vector<8x1xf32>
    %195 = vector.broadcast %194 : vector<8x1xf32> to vector<8x384xf32>
    %196 = arith.addf %193, %195 : vector<8x384xf32>
    %c0_206 = arith.constant 0 : index
    %c0_207 = arith.constant 0 : index
    %197 = vector.load %arg5[%c0_206, %c0_207] : memref<8x1xf32, #tpu.memory_space<vmem>>, vector<8x1xf32>
    %198 = vector.broadcast %197 : vector<8x1xf32> to vector<8x384xf32>
    %199 = arith.addf %190, %198 : vector<8x384xf32>
    %cst_208 = arith.constant 5.000000e-01 : f32
    %200 = vector.broadcast %cst_208 : f32 to vector<8x384xf32>
    %201 = arith.mulf %200, %199 : vector<8x384xf32>
    %cst_209 = arith.constant 4.471500e-02 : f32
    %202 = vector.broadcast %cst_209 : f32 to vector<8x384xf32>
    %203 = arith.mulf %202, %199 : vector<8x384xf32>
    %204 = arith.mulf %203, %199 : vector<8x384xf32>
    %205 = arith.mulf %204, %199 : vector<8x384xf32>
    %206 = arith.addf %199, %205 : vector<8x384xf32>
    %cst_210 = arith.constant 0.797884583 : f32
    %207 = vector.broadcast %cst_210 : f32 to vector<8x384xf32>
    %208 = arith.mulf %207, %206 : vector<8x384xf32>
    %209 = math.tanh %208 : vector<8x384xf32>
    %cst_211 = arith.constant 1.000000e+00 : f32
    %210 = vector.broadcast %cst_211 : f32 to vector<8x384xf32>
    %211 = arith.addf %210, %209 : vector<8x384xf32>
    %212 = arith.mulf %201, %211 : vector<8x384xf32>
    %c0_212 = arith.constant 0 : index
    %c0_213 = arith.constant 0 : index
    %213 = vector.load %arg10[%c0_212, %c0_213] : memref<1x384xf32, #tpu.memory_space<vmem>>, vector<1x384xf32>
    %214 = vector.broadcast %213 : vector<1x384xf32> to vector<8x384xf32>
    %215 = arith.mulf %212, %214 : vector<8x384xf32>
    %216 = vector.extract_strided_slice %215 {offsets = [0, 0], sizes = [8, 288], strides = [1, 1]} : vector<8x384xf32> to vector<8x288xf32>
    %c0_214 = arith.constant 0 : index
    %c128_215 = arith.constant 128 : index
    %217 = vector.load %arg14[%c0_214, %c128_215] : memref<8x640xf32, #tpu.memory_space<vmem>>, vector<8x288xf32>
    tpu.vector_store %arg14[%c0_214, %c128_215], %216 {strides = array<i32>} : memref<8x640xf32, #tpu.memory_space<vmem>>, vector<8x288xf32>,
    %c0_216 = arith.constant 0 : index
    %c109_217 = arith.constant 109 : index
    %218 = vector.load %arg14[%c0_216, %c109_217] : memref<8x640xf32, #tpu.memory_space<vmem>>, vector<8x384xf32>
    %c0_218 = arith.constant 0 : index
    %c0_219 = arith.constant 0 : index
    %219 = vector.load %arg13[%c0_218, %c0_219] : memref<72x384xf32, #tpu.memory_space<vmem>>, vector<8x384xf32>
    tpu.vector_store %arg13[%c0_218, %c0_219], %218 {strides = array<i32>} : memref<72x384xf32, #tpu.memory_space<vmem>>, vector<8x384xf32>,
    %c0_220 = arith.constant 0 : index
    %c110_221 = arith.constant 110 : index
    %220 = vector.load %arg14[%c0_220, %c110_221] : memref<8x640xf32, #tpu.memory_space<vmem>>, vector<8x384xf32>
    %c8_222 = arith.constant 8 : index
    %c0_223 = arith.constant 0 : index
    %221 = vector.load %arg13[%c8_222, %c0_223] : memref<72x384xf32, #tpu.memory_space<vmem>>, vector<8x384xf32>
    tpu.vector_store %arg13[%c8_222, %c0_223], %220 {strides = array<i32>} : memref<72x384xf32, #tpu.memory_space<vmem>>, vector<8x384xf32>,
    %c0_224 = arith.constant 0 : index
    %c111_225 = arith.constant 111 : index
    %222 = vector.load %arg14[%c0_224, %c111_225] : memref<8x640xf32, #tpu.memory_space<vmem>>, vector<8x384xf32>
    %c16_226 = arith.constant 16 : index
    %c0_227 = arith.constant 0 : index
    %223 = vector.load %arg13[%c16_226, %c0_227] : memref<72x384xf32, #tpu.memory_space<vmem>>, vector<8x384xf32>
    tpu.vector_store %arg13[%c16_226, %c0_227], %222 {strides = array<i32>} : memref<72x384xf32, #tpu.memory_space<vmem>>, vector<8x384xf32>,
    %c0_228 = arith.constant 0 : index
    %c127_229 = arith.constant 127 : index
    %224 = vector.load %arg14[%c0_228, %c127_229] : memref<8x640xf32, #tpu.memory_space<vmem>>, vector<8x384xf32>
    %c24_230 = arith.constant 24 : index
    %c0_231 = arith.constant 0 : index
    %225 = vector.load %arg13[%c24_230, %c0_231] : memref<72x384xf32, #tpu.memory_space<vmem>>, vector<8x384xf32>
    tpu.vector_store %arg13[%c24_230, %c0_231], %224 {strides = array<i32>} : memref<72x384xf32, #tpu.memory_space<vmem>>, vector<8x384xf32>,
    %c0_232 = arith.constant 0 : index
    %c128_233 = arith.constant 128 : index
    %226 = vector.load %arg14[%c0_232, %c128_233] : memref<8x640xf32, #tpu.memory_space<vmem>>, vector<8x384xf32>
    %c32_234 = arith.constant 32 : index
    %c0_235 = arith.constant 0 : index
    %227 = vector.load %arg13[%c32_234, %c0_235] : memref<72x384xf32, #tpu.memory_space<vmem>>, vector<8x384xf32>
    tpu.vector_store %arg13[%c32_234, %c0_235], %226 {strides = array<i32>} : memref<72x384xf32, #tpu.memory_space<vmem>>, vector<8x384xf32>,
    %c0_236 = arith.constant 0 : index
    %c129_237 = arith.constant 129 : index
    %228 = vector.load %arg14[%c0_236, %c129_237] : memref<8x640xf32, #tpu.memory_space<vmem>>, vector<8x384xf32>
    %c40_238 = arith.constant 40 : index
    %c0_239 = arith.constant 0 : index
    %229 = vector.load %arg13[%c40_238, %c0_239] : memref<72x384xf32, #tpu.memory_space<vmem>>, vector<8x384xf32>
    tpu.vector_store %arg13[%c40_238, %c0_239], %228 {strides = array<i32>} : memref<72x384xf32, #tpu.memory_space<vmem>>, vector<8x384xf32>,
    %c0_240 = arith.constant 0 : index
    %c145_241 = arith.constant 145 : index
    %230 = vector.load %arg14[%c0_240, %c145_241] : memref<8x640xf32, #tpu.memory_space<vmem>>, vector<8x384xf32>
    %c48_242 = arith.constant 48 : index
    %c0_243 = arith.constant 0 : index
    %231 = vector.load %arg13[%c48_242, %c0_243] : memref<72x384xf32, #tpu.memory_space<vmem>>, vector<8x384xf32>
    tpu.vector_store %arg13[%c48_242, %c0_243], %230 {strides = array<i32>} : memref<72x384xf32, #tpu.memory_space<vmem>>, vector<8x384xf32>,
    %c0_244 = arith.constant 0 : index
    %c146_245 = arith.constant 146 : index
    %232 = vector.load %arg14[%c0_244, %c146_245] : memref<8x640xf32, #tpu.memory_space<vmem>>, vector<8x384xf32>
    %c56_246 = arith.constant 56 : index
    %c0_247 = arith.constant 0 : index
    %233 = vector.load %arg13[%c56_246, %c0_247] : memref<72x384xf32, #tpu.memory_space<vmem>>, vector<8x384xf32>
    tpu.vector_store %arg13[%c56_246, %c0_247], %232 {strides = array<i32>} : memref<72x384xf32, #tpu.memory_space<vmem>>, vector<8x384xf32>,
    %c0_248 = arith.constant 0 : index
    %c147_249 = arith.constant 147 : index
    %234 = vector.load %arg14[%c0_248, %c147_249] : memref<8x640xf32, #tpu.memory_space<vmem>>, vector<8x384xf32>
    %c64_250 = arith.constant 64 : index
    %c0_251 = arith.constant 0 : index
    %235 = vector.load %arg13[%c64_250, %c0_251] : memref<72x384xf32, #tpu.memory_space<vmem>>, vector<8x384xf32>
    tpu.vector_store %arg13[%c64_250, %c0_251], %234 {strides = array<i32>} : memref<72x384xf32, #tpu.memory_space<vmem>>, vector<8x384xf32>,
    %c0_252 = arith.constant 0 : index
    %c0_253 = arith.constant 0 : index
    %236 = vector.load %arg6[%c0_252, %c0_253] : memref<8x72xf32, #tpu.memory_space<vmem>>, vector<8x72xf32>
    %c0_254 = arith.constant 0 : index
    %c0_255 = arith.constant 0 : index
    %237 = vector.load %arg13[%c0_254, %c0_255] : memref<72x384xf32, #tpu.memory_space<vmem>>, vector<72x384xf32>
    %cst_256 = arith.constant dense<0.000000e+00> : vector<8x384xf32>
    %238 = tpu.matmul %236, %237, %cst_256 {dimension_numbers = #tpu.dot_dimension_numbers<[1], [0], [0], [1], [0, 0, 1, 1], [], []>} : vector<8x72xf32>, vector<72x384xf32>, vector<8x384xf32> -> vector<8x384xf32>
    %c0_257 = arith.constant 0 : index
    %c0_258 = arith.constant 0 : index
    %239 = vector.load %arg7[%c0_257, %c0_258] : memref<8x1xf32, #tpu.memory_space<vmem>>, vector<8x1xf32>
    %240 = vector.broadcast %239 : vector<8x1xf32> to vector<8x384xf32>
    %241 = arith.addf %238, %240 : vector<8x384xf32>
    %cst_259 = arith.constant 5.000000e-01 : f32
    %242 = vector.broadcast %cst_259 : f32 to vector<8x384xf32>
    %243 = arith.mulf %242, %241 : vector<8x384xf32>
    %cst_260 = arith.constant 4.471500e-02 : f32
    %244 = vector.broadcast %cst_260 : f32 to vector<8x384xf32>
    %245 = arith.mulf %244, %241 : vector<8x384xf32>
    %246 = arith.mulf %245, %241 : vector<8x384xf32>
    %247 = arith.mulf %246, %241 : vector<8x384xf32>
    %248 = arith.addf %241, %247 : vector<8x384xf32>
    %cst_261 = arith.constant 0.797884583 : f32
    %249 = vector.broadcast %cst_261 : f32 to vector<8x384xf32>
    %250 = arith.mulf %249, %248 : vector<8x384xf32>
    %251 = math.tanh %250 : vector<8x384xf32>
    %cst_262 = arith.constant 1.000000e+00 : f32
    %252 = vector.broadcast %cst_262 : f32 to vector<8x384xf32>
    %253 = arith.addf %252, %251 : vector<8x384xf32>
    %254 = arith.mulf %243, %253 : vector<8x384xf32>
    %255 = arith.addf %196, %254 : vector<8x384xf32>
    %256 = vector.extract_strided_slice %255 {offsets = [0, 0], sizes = [8, 16], strides = [1, 1]} : vector<8x384xf32> to vector<8x16xf32>
    %c0_263 = arith.constant 0 : index
    %c1_264 = arith.constant 1 : index
    %c0_265 = arith.constant 0 : index
    %c0_266 = arith.constant 0 : index
    %257 = vector.load %arg11[%c0_263, %c1_264, %c0_265, %c0_266] : memref<1x2x8x256xf32, #tpu.memory_space<vmem>>, vector<1x1x8x16xf32>
    %258 = vector.shape_cast %257 : vector<1x1x8x16xf32> to vector<8x16xf32>
    %259 = vector.shape_cast %256 : vector<8x16xf32> to vector<1x1x8x16xf32>
    tpu.vector_store %arg11[%c0_263, %c1_264, %c0_265, %c0_266], %259 {strides = array<i32>} : memref<1x2x8x256xf32, #tpu.memory_space<vmem>>, vector<1x1x8x16xf32>,
    %260 = vector.extract_strided_slice %255 {offsets = [0, 18], sizes = [8, 16], strides = [1, 1]} : vector<8x384xf32> to vector<8x16xf32>
    %c0_267 = arith.constant 0 : index
    %c1_268 = arith.constant 1 : index
    %c0_269 = arith.constant 0 : index
    %c16_270 = arith.constant 16 : index
    %261 = vector.load %arg11[%c0_267, %c1_268, %c0_269, %c16_270] : memref<1x2x8x256xf32, #tpu.memory_space<vmem>>, vector<1x1x8x16xf32>
    %262 = vector.shape_cast %261 : vector<1x1x8x16xf32> to vector<8x16xf32>
    %263 = vector.shape_cast %260 : vector<8x16xf32> to vector<1x1x8x16xf32>
    tpu.vector_store %arg11[%c0_267, %c1_268, %c0_269, %c16_270], %263 {strides = array<i32>} : memref<1x2x8x256xf32, #tpu.memory_space<vmem>>, vector<1x1x8x16xf32>,
    %264 = vector.extract_strided_slice %255 {offsets = [0, 36], sizes = [8, 16], strides = [1, 1]} : vector<8x384xf32> to vector<8x16xf32>
    %c0_271 = arith.constant 0 : index
    %c1_272 = arith.constant 1 : index
    %c0_273 = arith.constant 0 : index
    %c32_274 = arith.constant 32 : index
    %265 = vector.load %arg11[%c0_271, %c1_272, %c0_273, %c32_274] : memref<1x2x8x256xf32, #tpu.memory_space<vmem>>, vector<1x1x8x16xf32>
    %266 = vector.shape_cast %265 : vector<1x1x8x16xf32> to vector<8x16xf32>
    %267 = vector.shape_cast %264 : vector<8x16xf32> to vector<1x1x8x16xf32>
    tpu.vector_store %arg11[%c0_271, %c1_272, %c0_273, %c32_274], %267 {strides = array<i32>} : memref<1x2x8x256xf32, #tpu.memory_space<vmem>>, vector<1x1x8x16xf32>,
    %268 = vector.extract_strided_slice %255 {offsets = [0, 54], sizes = [8, 16], strides = [1, 1]} : vector<8x384xf32> to vector<8x16xf32>
    %c0_275 = arith.constant 0 : index
    %c1_276 = arith.constant 1 : index
    %c0_277 = arith.constant 0 : index
    %c48_278 = arith.constant 48 : index
    %269 = vector.load %arg11[%c0_275, %c1_276, %c0_277, %c48_278] : memref<1x2x8x256xf32, #tpu.memory_space<vmem>>, vector<1x1x8x16xf32>
    %270 = vector.shape_cast %269 : vector<1x1x8x16xf32> to vector<8x16xf32>
    %271 = vector.shape_cast %268 : vector<8x16xf32> to vector<1x1x8x16xf32>
    tpu.vector_store %arg11[%c0_275, %c1_276, %c0_277, %c48_278], %271 {strides = array<i32>} : memref<1x2x8x256xf32, #tpu.memory_space<vmem>>, vector<1x1x8x16xf32>,
    %272 = vector.extract_strided_slice %255 {offsets = [0, 72], sizes = [8, 16], strides = [1, 1]} : vector<8x384xf32> to vector<8x16xf32>
    %c0_279 = arith.constant 0 : index
    %c1_280 = arith.constant 1 : index
    %c0_281 = arith.constant 0 : index
    %c64_282 = arith.constant 64 : index
    %273 = vector.load %arg11[%c0_279, %c1_280, %c0_281, %c64_282] : memref<1x2x8x256xf32, #tpu.memory_space<vmem>>, vector<1x1x8x16xf32>
    %274 = vector.shape_cast %273 : vector<1x1x8x16xf32> to vector<8x16xf32>
    %275 = vector.shape_cast %272 : vector<8x16xf32> to vector<1x1x8x16xf32>
    tpu.vector_store %arg11[%c0_279, %c1_280, %c0_281, %c64_282], %275 {strides = array<i32>} : memref<1x2x8x256xf32, #tpu.memory_space<vmem>>, vector<1x1x8x16xf32>,
    %276 = vector.extract_strided_slice %255 {offsets = [0, 90], sizes = [8, 16], strides = [1, 1]} : vector<8x384xf32> to vector<8x16xf32>
    %c0_283 = arith.constant 0 : index
    %c1_284 = arith.constant 1 : index
    %c0_285 = arith.constant 0 : index
    %c80_286 = arith.constant 80 : index
    %277 = vector.load %arg11[%c0_283, %c1_284, %c0_285, %c80_286] : memref<1x2x8x256xf32, #tpu.memory_space<vmem>>, vector<1x1x8x16xf32>
    %278 = vector.shape_cast %277 : vector<1x1x8x16xf32> to vector<8x16xf32>
    %279 = vector.shape_cast %276 : vector<8x16xf32> to vector<1x1x8x16xf32>
    tpu.vector_store %arg11[%c0_283, %c1_284, %c0_285, %c80_286], %279 {strides = array<i32>} : memref<1x2x8x256xf32, #tpu.memory_space<vmem>>, vector<1x1x8x16xf32>,
    %280 = vector.extract_strided_slice %255 {offsets = [0, 108], sizes = [8, 16], strides = [1, 1]} : vector<8x384xf32> to vector<8x16xf32>
    %c0_287 = arith.constant 0 : index
    %c1_288 = arith.constant 1 : index
    %c0_289 = arith.constant 0 : index
    %c96_290 = arith.constant 96 : index
    %281 = vector.load %arg11[%c0_287, %c1_288, %c0_289, %c96_290] : memref<1x2x8x256xf32, #tpu.memory_space<vmem>>, vector<1x1x8x16xf32>
    %282 = vector.shape_cast %281 : vector<1x1x8x16xf32> to vector<8x16xf32>
    %283 = vector.shape_cast %280 : vector<8x16xf32> to vector<1x1x8x16xf32>
    tpu.vector_store %arg11[%c0_287, %c1_288, %c0_289, %c96_290], %283 {strides = array<i32>} : memref<1x2x8x256xf32, #tpu.memory_space<vmem>>, vector<1x1x8x16xf32>,
    %284 = vector.extract_strided_slice %255 {offsets = [0, 126], sizes = [8, 16], strides = [1, 1]} : vector<8x384xf32> to vector<8x16xf32>
    %c0_291 = arith.constant 0 : index
    %c1_292 = arith.constant 1 : index
    %c0_293 = arith.constant 0 : index
    %c112_294 = arith.constant 112 : index
    %285 = vector.load %arg11[%c0_291, %c1_292, %c0_293, %c112_294] : memref<1x2x8x256xf32, #tpu.memory_space<vmem>>, vector<1x1x8x16xf32>
    %286 = vector.shape_cast %285 : vector<1x1x8x16xf32> to vector<8x16xf32>
    %287 = vector.shape_cast %284 : vector<8x16xf32> to vector<1x1x8x16xf32>
    tpu.vector_store %arg11[%c0_291, %c1_292, %c0_293, %c112_294], %287 {strides = array<i32>} : memref<1x2x8x256xf32, #tpu.memory_space<vmem>>, vector<1x1x8x16xf32>,
    %288 = vector.extract_strided_slice %255 {offsets = [0, 144], sizes = [8, 16], strides = [1, 1]} : vector<8x384xf32> to vector<8x16xf32>
    %c0_295 = arith.constant 0 : index
    %c1_296 = arith.constant 1 : index
    %c0_297 = arith.constant 0 : index
    %c128_298 = arith.constant 128 : index
    %289 = vector.load %arg11[%c0_295, %c1_296, %c0_297, %c128_298] : memref<1x2x8x256xf32, #tpu.memory_space<vmem>>, vector<1x1x8x16xf32>
    %290 = vector.shape_cast %289 : vector<1x1x8x16xf32> to vector<8x16xf32>
    %291 = vector.shape_cast %288 : vector<8x16xf32> to vector<1x1x8x16xf32>
    tpu.vector_store %arg11[%c0_295, %c1_296, %c0_297, %c128_298], %291 {strides = array<i32>} : memref<1x2x8x256xf32, #tpu.memory_space<vmem>>, vector<1x1x8x16xf32>,
    %292 = vector.extract_strided_slice %255 {offsets = [0, 162], sizes = [8, 16], strides = [1, 1]} : vector<8x384xf32> to vector<8x16xf32>
    %c0_299 = arith.constant 0 : index
    %c1_300 = arith.constant 1 : index
    %c0_301 = arith.constant 0 : index
    %c144_302 = arith.constant 144 : index
    %293 = vector.load %arg11[%c0_299, %c1_300, %c0_301, %c144_302] : memref<1x2x8x256xf32, #tpu.memory_space<vmem>>, vector<1x1x8x16xf32>
    %294 = vector.shape_cast %293 : vector<1x1x8x16xf32> to vector<8x16xf32>
    %295 = vector.shape_cast %292 : vector<8x16xf32> to vector<1x1x8x16xf32>
    tpu.vector_store %arg11[%c0_299, %c1_300, %c0_301, %c144_302], %295 {strides = array<i32>} : memref<1x2x8x256xf32, #tpu.memory_space<vmem>>, vector<1x1x8x16xf32>,
    %296 = vector.extract_strided_slice %255 {offsets = [0, 180], sizes = [8, 16], strides = [1, 1]} : vector<8x384xf32> to vector<8x16xf32>
    %c0_303 = arith.constant 0 : index
    %c1_304 = arith.constant 1 : index
    %c0_305 = arith.constant 0 : index
    %c160_306 = arith.constant 160 : index
    %297 = vector.load %arg11[%c0_303, %c1_304, %c0_305, %c160_306] : memref<1x2x8x256xf32, #tpu.memory_space<vmem>>, vector<1x1x8x16xf32>
    %298 = vector.shape_cast %297 : vector<1x1x8x16xf32> to vector<8x16xf32>
    %299 = vector.shape_cast %296 : vector<8x16xf32> to vector<1x1x8x16xf32>
    tpu.vector_store %arg11[%c0_303, %c1_304, %c0_305, %c160_306], %299 {strides = array<i32>} : memref<1x2x8x256xf32, #tpu.memory_space<vmem>>, vector<1x1x8x16xf32>,
    %300 = vector.extract_strided_slice %255 {offsets = [0, 198], sizes = [8, 16], strides = [1, 1]} : vector<8x384xf32> to vector<8x16xf32>
    %c0_307 = arith.constant 0 : index
    %c1_308 = arith.constant 1 : index
    %c0_309 = arith.constant 0 : index
    %c176_310 = arith.constant 176 : index
    %301 = vector.load %arg11[%c0_307, %c1_308, %c0_309, %c176_310] : memref<1x2x8x256xf32, #tpu.memory_space<vmem>>, vector<1x1x8x16xf32>
    %302 = vector.shape_cast %301 : vector<1x1x8x16xf32> to vector<8x16xf32>
    %303 = vector.shape_cast %300 : vector<8x16xf32> to vector<1x1x8x16xf32>
    tpu.vector_store %arg11[%c0_307, %c1_308, %c0_309, %c176_310], %303 {strides = array<i32>} : memref<1x2x8x256xf32, #tpu.memory_space<vmem>>, vector<1x1x8x16xf32>,
    %304 = vector.extract_strided_slice %255 {offsets = [0, 216], sizes = [8, 16], strides = [1, 1]} : vector<8x384xf32> to vector<8x16xf32>
    %c0_311 = arith.constant 0 : index
    %c1_312 = arith.constant 1 : index
    %c0_313 = arith.constant 0 : index
    %c192_314 = arith.constant 192 : index
    %305 = vector.load %arg11[%c0_311, %c1_312, %c0_313, %c192_314] : memref<1x2x8x256xf32, #tpu.memory_space<vmem>>, vector<1x1x8x16xf32>
    %306 = vector.shape_cast %305 : vector<1x1x8x16xf32> to vector<8x16xf32>
    %307 = vector.shape_cast %304 : vector<8x16xf32> to vector<1x1x8x16xf32>
    tpu.vector_store %arg11[%c0_311, %c1_312, %c0_313, %c192_314], %307 {strides = array<i32>} : memref<1x2x8x256xf32, #tpu.memory_space<vmem>>, vector<1x1x8x16xf32>,
    %308 = vector.extract_strided_slice %255 {offsets = [0, 234], sizes = [8, 16], strides = [1, 1]} : vector<8x384xf32> to vector<8x16xf32>
    %c0_315 = arith.constant 0 : index
    %c1_316 = arith.constant 1 : index
    %c0_317 = arith.constant 0 : index
    %c208_318 = arith.constant 208 : index
    %309 = vector.load %arg11[%c0_315, %c1_316, %c0_317, %c208_318] : memref<1x2x8x256xf32, #tpu.memory_space<vmem>>, vector<1x1x8x16xf32>
    %310 = vector.shape_cast %309 : vector<1x1x8x16xf32> to vector<8x16xf32>
    %311 = vector.shape_cast %308 : vector<8x16xf32> to vector<1x1x8x16xf32>
    tpu.vector_store %arg11[%c0_315, %c1_316, %c0_317, %c208_318], %311 {strides = array<i32>} : memref<1x2x8x256xf32, #tpu.memory_space<vmem>>, vector<1x1x8x16xf32>,
    %312 = vector.extract_strided_slice %255 {offsets = [0, 252], sizes = [8, 16], strides = [1, 1]} : vector<8x384xf32> to vector<8x16xf32>
    %c0_319 = arith.constant 0 : index
    %c1_320 = arith.constant 1 : index
    %c0_321 = arith.constant 0 : index
    %c224_322 = arith.constant 224 : index
    %313 = vector.load %arg11[%c0_319, %c1_320, %c0_321, %c224_322] : memref<1x2x8x256xf32, #tpu.memory_space<vmem>>, vector<1x1x8x16xf32>
    %314 = vector.shape_cast %313 : vector<1x1x8x16xf32> to vector<8x16xf32>
    %315 = vector.shape_cast %312 : vector<8x16xf32> to vector<1x1x8x16xf32>
    tpu.vector_store %arg11[%c0_319, %c1_320, %c0_321, %c224_322], %315 {strides = array<i32>} : memref<1x2x8x256xf32, #tpu.memory_space<vmem>>, vector<1x1x8x16xf32>,
    %316 = vector.extract_strided_slice %255 {offsets = [0, 270], sizes = [8, 16], strides = [1, 1]} : vector<8x384xf32> to vector<8x16xf32>
    %c0_323 = arith.constant 0 : index
    %c1_324 = arith.constant 1 : index
    %c0_325 = arith.constant 0 : index
    %c240_326 = arith.constant 240 : index
    %317 = vector.load %arg11[%c0_323, %c1_324, %c0_325, %c240_326] : memref<1x2x8x256xf32, #tpu.memory_space<vmem>>, vector<1x1x8x16xf32>
    %318 = vector.shape_cast %317 : vector<1x1x8x16xf32> to vector<8x16xf32>
    %319 = vector.shape_cast %316 : vector<8x16xf32> to vector<1x1x8x16xf32>
    tpu.vector_store %arg11[%c0_323, %c1_324, %c0_325, %c240_326], %319 {strides = array<i32>} : memref<1x2x8x256xf32, #tpu.memory_space<vmem>>, vector<1x1x8x16xf32>,
    return
  }
  func.func @transform_0(%arg0: i32) -> (i32, i32, i32, i32) {
    %c0_i32 = arith.constant 0 : i32
    %c0_i32_0 = arith.constant 0 : i32
    %c0_i32_1 = arith.constant 0 : i32
    %c0_i32_2 = arith.constant 0 : i32
    return %arg0, %c0_i32, %c0_i32_0, %c0_i32_1 : i32, i32, i32, i32
  }
  func.func @transform_1(%arg0: i32) -> (i32, i32, i32) {
    %c0_i32 = arith.constant 0 : i32
    %c0_i32_0 = arith.constant 0 : i32
    %c0_i32_1 = arith.constant 0 : i32
    return %arg0, %c0_i32, %c0_i32_0 : i32, i32, i32
  }
  func.func @transform_2(%arg0: i32) -> (i32, i32) {
    %c0_i32 = arith.constant 0 : i32
    %c0_i32_0 = arith.constant 0 : i32
    %c0_i32_1 = arith.constant 0 : i32
    return %c0_i32, %c0_i32_0 : i32, i32
  }
  func.func @transform_3(%arg0: i32) -> (i32, i32) {
    %c0_i32 = arith.constant 0 : i32
    %c0_i32_0 = arith.constant 0 : i32
    %c0_i32_1 = arith.constant 0 : i32
    return %c0_i32, %c0_i32_0 : i32, i32
  }
  func.func @transform_4(%arg0: i32) -> (i32, i32) {
    %c0_i32 = arith.constant 0 : i32
    %c0_i32_0 = arith.constant 0 : i32
    %c0_i32_1 = arith.constant 0 : i32
    return %c0_i32, %c0_i32_0 : i32, i32
  }
  func.func @transform_5(%arg0: i32) -> (i32, i32) {
    %c0_i32 = arith.constant 0 : i32
    %c0_i32_0 = arith.constant 0 : i32
    %c0_i32_1 = arith.constant 0 : i32
    return %c0_i32, %c0_i32_0 : i32, i32
  }
  func.func @transform_6(%arg0: i32) -> (i32, i32) {
    %c0_i32 = arith.constant 0 : i32
    %c0_i32_0 = arith.constant 0 : i32
    %c0_i32_1 = arith.constant 0 : i32
    return %c0_i32, %c0_i32_0 : i32, i32
  }
  func.func @transform_7(%arg0: i32) -> (i32, i32) {
    %c0_i32 = arith.constant 0 : i32
    %c0_i32_0 = arith.constant 0 : i32
    %c0_i32_1 = arith.constant 0 : i32
    return %c0_i32, %c0_i32_0 : i32, i32
  }
  func.func @transform_8(%arg0: i32) -> (i32, i32) {
    %c0_i32 = arith.constant 0 : i32
    %c0_i32_0 = arith.constant 0 : i32
    %c0_i32_1 = arith.constant 0 : i32
    return %c0_i32, %c0_i32_0 : i32, i32
  }
  func.func @transform_9(%arg0: i32) -> (i32, i32) {
    %c0_i32 = arith.constant 0 : i32
    %c0_i32_0 = arith.constant 0 : i32
    %c0_i32_1 = arith.constant 0 : i32
    return %c0_i32, %c0_i32_0 : i32, i32
  }
  func.func @transform_10(%arg0: i32) -> (i32, i32, i32, i32) {
    %c0_i32 = arith.constant 0 : i32
    %c0_i32_0 = arith.constant 0 : i32
    %c0_i32_1 = arith.constant 0 : i32
    %c0_i32_2 = arith.constant 0 : i32
    return %arg0, %c0_i32, %c0_i32_0, %c0_i32_1 : i32, i32, i32, i32
  }
}

</mosaic_0001>

<bundles_post_ra>
// kernel: mask_upsample_forward.1
= control target key start
LH: loop header
LB: loop body
LE: loop exit
PB: predicated region body
PF: predicated region fallthrough
CT: control target
= control target key end

     0   :  { %s2730_s13 = smov 0   ;;  %s3632_s0 = inlined_call_operand.vmem [shape: f32[2,2,4,64], index: 0, kind: input, shape index: {}]   ;;  %s3633_s1 = inlined_call_operand.vmem [shape: f32[2,4,512], index: 1, kind: input, shape index: {}]   ;;  %s3634_s2 = inlined_call_operand.vmem [shape: f32[64,512], index: 2, kind: input, shape index: {}]   ;;  %s3635_s3 = inlined_call_operand.vmem [shape: f32[8,36], index: 3, kind: input, shape index: {}]   ;;  %s3636_s4 = inlined_call_operand.vmem [shape: f32[8,1], index: 4, kind: input, shape index: {}]   ;;  %s3637_s5 = inlined_call_operand.vmem [shape: f32[8,72], index: 5, kind: input, shape index: {}]   ;;  %s3638_s6 = inlined_call_operand.vmem [shape: f32[8,1], index: 6, kind: input, shape index: {}]   ;;  %s3639_s7 = inlined_call_operand.vmem [shape: f32[8,4], index: 7, kind: input, shape index: {}]   ;;  %s3640_s8 = inlined_call_operand.vmem [shape: f32[8,1], index: 8, kind: input, shape index: {}]   ;;  %s3641_s9 = inlined_call_operand.vmem [shape: f32[1,384], index: 9, kind: input, shape index: {}]   ;;  %s3642_s10 = inlined_call_operand.vmem [shape: f32[2,2,8,256], index: 10, kind: output, shape index: {}]  }
   0x1 LB: > { %s2496_s14 = sadd.s32 4294967295, %s2646_s13   ;;  %p2500_p0 = scmp.ge.s32.totalorder %s2646_s13, 1  ;;  %s2646_s13 = sphi %s2730_s13, %s20_s13  }
   0x2   : > { %p322_p1 = scmp.lt.s32.totalorder %s2646_s13, 3 }
   0x4   : > { %p323_p2 = pnand %p2500_p0, %p322_p1 }
   0x5   : > { %p365_p3 = scmp.lt.s32.totalorder (!%p323_p2), %s2496_s14, 1  ;;  %s2648_s15 = smov (!%p323_p2), 127  }
   0x6   : > { %326 = sbr.rel (%p323_p2) target bundleno = 1768 (0x6e8), region = 60  ;;  %s2649_s16 = smov (!%p323_p2), 126  }
   0x7   : > { %s2650_s17 = smov (!%p323_p2), 110   ;;  %s2651_s18 = smov (!%p323_p2), 109  }
   0x8   : > { %s2652_s19 = smov (!%p323_p2), 108   ;;  %s2653_s22 = smov (!%p323_p2), 92  }
   0x9   : > { %s2654_s24 = smov (!%p323_p2), 91   ;;  %s2655_s26 = smov (!%p323_p2), 90  }
   0xa   : > { %s2659_s12 = smov (!%p323_p2), 111   ;;  %s3650_s27 = smov (!%p323_p2), 17  }
   0xb   : > { %v414_v0 = vld [vmem:[%s3634_s2 + $0xe8] sm:$0xff]  ;;  %v2744_v1 = vld [vmem:[%s3634_s2 + $0xf8] sm:$0xff]  ;;  %v2749_v2 = vld [vmem:[%s3634_s2 + $0xe0] sm:$0xff]  ;;  %s3664_s14 = smov (!%p365_p3, %s2496_s14), 1  ;;  %vm432_vm0 = vcmask 523264   ;;  %vm522_vm1 = vcmask 1043456  }
   0xc   : > { %464 = vmatpush.msra.mxu1 %v414_v0  ;;  %504 = vmatpush.msra.mxu3 %v2744_v1  ;;  %v410_v3 = vld [vmem:[%s3634_s2 + $0xc8] sm:$0xff]  ;;  %v415_v4 = vld [vmem:[%s3634_s2 + $0xf0] sm:$0xff]  ;;  %v2761_v5 = vld [vmem:[%s3634_s2 + $0xd8] sm:$0xff]  ;;  %s2565_s25 = sshll.u32 %s3664_s14, 4  ;;  %s2564_s20 = sshll.u32 %s3664_s14, 3  ;;  %vm594_vm2 = vcmask 1031168  }
   0xd   : > { %444 = vmatpush.msra.mxu0 %v2749_v2  ;;  %484 = vmatpush.msra.mxu2 %v415_v4  ;;  %v2767_v6 = vld [vmem:[%s3634_s2 + $0xc0] sm:$0xff]  ;;  %v406_v7 = vld [vmem:[%s3634_s2 + $0xa8] sm:$0xff]  ;;  %v411_v8 = vld [vmem:[%s3634_s2 + $0xd0] sm:$0xff]  ;;  %s374_s23 = scalar_lea.vmem %s3633_s1, %s2565_s25  ;;  %s2862_s21 = scalar_lea.vmem %s3632_s0, %s2564_s20  ;;  %vm565_vm3 = vcmask 1039360   ;;  %vm624_vm4 = vcmask 900096   ;;  %vm653_vm5 = vcmask 891904  }
   0xe   : > { %465 = vmatpush.msra.mxu1 %v410_v3  ;;  %505 = vmatpush.msra.mxu3 %v2761_v5  ;;  %v2781_v9 = vld [vmem:[%s3634_s2 + $0xb8] sm:$0xff]  ;;  %v2786_v10 = vld [vmem:[%s3634_s2 + $0xa0] sm:$0xff]  ;;  %v402_v11 = vld [vmem:[%s3634_s2 + $0x88] sm:$0xff]  ;;  %vm712_vm6 = vcmask 752640   ;;  %vm683_vm7 = vcmask 883712   ;;  %vm742_vm8 = vcmask 744448  }
   0xf   : > { %445 = vmatpush.msra.mxu0 %v2767_v6  ;;  %485 = vmatpush.msra.mxu2 %v411_v8  ;;  %v407_v12 = vld [vmem:[%s3634_s2 + $0xb0] sm:$0xff]  ;;  %v2798_v13 = vld [vmem:[%s3634_s2 + $0x98] sm:$0xff]  ;;  %v2805_v14 = vld [vmem:[%s3634_s2 + $0x80] sm:$0xff]  ;;  %vm807_vm9 = vcmask 31744   ;;  %vm771_vm10 = vcmask 736256   ;;  %vm3645_vm11 = vcmask 293888  }
  0x10   : > { %466 = vmatpush.msra.mxu1 %v406_v7  ;;  %506 = vmatpush.msra.mxu3 %v2781_v9  ;;  %v403_v15 = vld [vmem:[%s3634_s2 + $0x90] sm:$0xff]  ;;  %v398_v16 = vld [vmem:[%s3634_s2 + $0x68] sm:$0xff]  ;;  %v2817_v17 = vld [vmem:[%s3634_s2 + $0x78] sm:$0xff]  ;;  %vm381_vm12 = vcmask 1047808   ;;  %vm3643_vm13 = vcmask 261120   ;;  %s3648_s20 = smov 18  }
  0x11   : > { %446 = vmatpush.msra.mxu0 %v2786_v10  ;;  %486 = vmatpush.msra.mxu2 %v407_v12  ;;  %v2823_v18 = vld [vmem:[%s3634_s2 + $0x60] sm:$0xff]  ;;  %v399_v19 = vld [vmem:[%s3634_s2 + $0x70] sm:$0xff]  ;;  %v394_v20 = vld [vmem:[%s3634_s2 + $0x48] sm:$0xff]  ;;  %vm1095_vm14 = vcmask 7168   ;;  %vm3644_vm15 = vcmask 908288   ;;  %s3657_s25 = smov 17  }
  0x12   : > { %467 = vmatpush.msra.mxu1 %v402_v11  ;;  %507 = vmatpush.msra.mxu3 %v2798_v13  ;;  %v2839_v21 = vld [vmem:[%s3634_s2 + $0x58] sm:$0xff]  ;;  %v2845_v22 = vld [vmem:[%s3634_s2 + $0x40] sm:$0xff]  ;;  %v390_v23 = vld [vmem:[%s3634_s2 + $0x28] sm:$0xff]  ;;  %s3659_s11 = smov 19   ;;  %s2663_s29 = smov 118  }
  0x13   : > { %447 = vmatpush.msra.mxu0 %v2805_v14  ;;  %487 = vmatpush.msra.mxu2 %v403_v15  ;;  %v395_v24 = vld [vmem:[%s3634_s2 + $0x50] sm:$0xff]  ;;  %v2857_v25 = vld [vmem:[%s3634_s2 + $0x38] sm:$0xff]  ;;  %v2864_v26 = vld [vmem:[%s374_s23] sm:$0xff]  ;;  %s2665_s30 = smov 120  }
  0x14   : > { %468 = vmatpush.msra.mxu1 %v398_v16  ;;  %508 = vmatpush.msra.mxu3 %v2817_v17  ;;  %v2866_v27 = vld [vmem:[%s374_s23 + $0x8] sm:$0xff]  ;;  %v2872_v28 = vld [vmem:[%s3634_s2 + $0x20] sm:$0xff]  ;;  %v391_v29 = vld [vmem:[%s3634_s2 + $0x30] sm:$0xff]  ;;  %421 = vst [vmem:[#allocation1] ss:$2 sm:$0xff] %v2864_v26  ;;  %s3646_s23 = smov 19  }
  0x15   : > { %448 = vmatpush.msra.mxu0 %v2823_v18  ;;  %488 = vmatpush.msra.mxu2 %v399_v19  ;;  %v386_v30 = vld [vmem:[%s3634_s2 + $0x8] sm:$0xff]  ;;  %v2885_v31 = vld [vmem:[%s3634_s2 + $0x18] sm:$0xff]  ;;  %423 = vst [vmem:[#allocation1 + $0x10] ss:$2 sm:$0xff] %v2866_v27  ;;  %v384_v32 = vld [vmem:[%s2862_s21] sm:$0xf] }
  0x16   : > { %469 = vmatpush.msra.mxu1 %v394_v20  ;;  %509 = vmatpush.msra.mxu3 %v2839_v21  ;;  %v2894_v33 = vld [vmem:[%s3634_s2] sm:$0xff]  ;;  %v387_v34 = vld [vmem:[%s3634_s2 + $0x10] sm:$0xff] }
  0x17   : > { %449 = vmatpush.msra.mxu0 %v2845_v22  ;;  %489 = vmatpush.msra.mxu2 %v395_v24 }
  0x18   : > { %470 = vmatpush.msra.mxu1 %v390_v23  ;;  %510 = vmatpush.msra.mxu3 %v2857_v25 }
  0x19   : > { %450 = vmatpush.msra.mxu0 %v2872_v28  ;;  %490 = vmatpush.msra.mxu2 %v391_v29 }
  0x1a   : > { %471 = vmatpush.msra.mxu1 %v386_v30  ;;  %511 = vmatpush.msra.mxu3 %v2885_v31 }
  0x1b   : > { %2508 = vmatmul.msk.f32.vlgmr.msra.gmra.mxu1 %vm432_vm0, %v384_v32  ;;  %2510 = vmatmul.msk.f32.vlgmr.msra.gmra.mxu3 %vm432_vm0, %v384_v32  ;;  %v425_v35 = vld.sshfl [vmem:[#allocation1 + $0x8] sm:$0xff pattern:$0x75316420]  ;;  %v424_v36 = vld.sshfl [vmem:[#allocation1] sm:$0xff pattern:$0x75316420] }
  0x1c   : > { %451 = vmatpush.msra.mxu0 %v2894_v33  ;;  %491 = vmatpush.msra.mxu2 %v387_v34  ;;  %v427_v42 = vld.sshfl [vmem:[#allocation1 + $0x18] sm:$0xff pattern:$0x75316420]  ;;  %v426_v44 = vld.sshfl [vmem:[#allocation1 + $0x10] sm:$0xff pattern:$0x75316420] }
  0x1d   : > { %2507 = vmatmul.msk.f32.vlgmr.msra.gmra.mxu0 %vm432_vm0, %v384_v32  ;;  %2509 = vmatmul.msk.f32.vlgmr.msra.gmra.mxu2 %vm432_vm0, %v384_v32 }
  0x98   : > { %v473_v37 = vpop.f32.mrf.mxu1 }
  0x99   : > { %v474_v38 = vadd.f32 %v473_v37, %v425_v35 }
  0x9a   : > { %v453_v39 = vpop.f32.mrf.mxu0 }
  0x9b   : > { %v520_v40 = vrot.slane %v474_v38, 4  ;;  %v454_v41 = vadd.f32 %v453_v39, %v424_v36 }
  0x9d   : > { %v2906_v43 = vsel %vm522_vm1, %v454_v41, %v520_v40 }
  0x9e   : > { %533 = vst [vmem:[#allocation1] ss:$2 sm:$0xff] %v2906_v43  ;;  %v513_v45 = vpop.f32.mrf.mxu3 }
  0x9f   : > { %v514_v46 = vadd.f32 %v513_v45, %v427_v42 }
  0xa0   : > { %v493_v47 = vpop.f32.mrf.mxu2 }
  0xa1   : > { %v521_v48 = vrot.slane %v514_v46, 4  ;;  %v494_v49 = vadd.f32 %v493_v47, %v426_v44 }
  0xa3   : > { %v2910_v50 = vsel %vm522_vm1, %v494_v49, %v521_v48 }
  0xa4   : > { %528 = vst [vmem:[#allocation2 + $0x8] sm:$0xff] %v2910_v50 }
  0xa5   : > { %v536_v51 = vld.sshfl [vmem:[#allocation1] sm:$0xff pattern:$0x75316420]  ;;  %v537_v52 = vld.sshfl [vmem:[#allocation1 + $0x8] sm:$0xff pattern:$0x75316420] }
  0xa6   : > { %550 = vst [vmem:[#allocation1 + $0x1] ss:$2 sm:$0xff] %v2906_v43 }
  0xa7   : > { %542 = vst [vmem:[#allocation3 + $0xa8] sm:$0xf] %v536_v51 }
  0xa8   : > { %543 = vst [vmem:[#allocation3 + $0xd0] sm:$0xf] %v537_v52 }
  0xab   : > { %v530_v53 = vld [vmem:[#allocation2 + $0x8] sm:$0xf] }
  0xac   : > { %535 = vst [vmem:[#allocation1 + $0x10] ss:$2 sm:$0xff] %v530_v53 }
  0xad   : > { %v553_v54 = vld.sshfl [vmem:[#allocation1] sm:$0xff pattern:$0x75316420]  ;;  %v554_v55 = vld.sshfl [vmem:[#allocation1 + $0x8] sm:$0xff pattern:$0x75316420] }
  0xae   : > { %579 = vst [vmem:[#allocation1] ss:$2 sm:$0xff] %v2906_v43  ;;  %559 = vrot.lane.b32.xlu1 %v554_v55, %s2648_s15  ;;  %557 = vrot.lane.b32.xlu0 %v553_v54, %s2648_s15 }
  0xb3   : > { %v538_v56 = vld.sshfl [vmem:[#allocation1 + $0x10] sm:$0xff pattern:$0x75316420] }
  0xb4   : > { %552 = vst [vmem:[#allocation1 + $0x11] ss:$2 sm:$0xff] %v2910_v50 }
  0xb5   : > { %v582_v57 = vld.sshfl [vmem:[#allocation1] sm:$0xff pattern:$0x75316420]  ;;  %v583_v58 = vld.sshfl [vmem:[#allocation1 + $0x8] sm:$0xff pattern:$0x75316420] }
  0xb6   : > { %609 = vst [vmem:[#allocation1 + $0x1] ss:$2 sm:$0xff] %v2906_v43  ;;  %588 = vrot.lane.b32.xlu2 %v583_v58, %s2649_s16  ;;  %586 = vrot.lane.b32.xlu1 %v582_v57, %s2649_s16 }
  0xb7   : > { %544 = vst [vmem:[#allocation3 + $0x10] sm:$0xf] %v538_v56 }
  0xbb   : > { %v2921_v59 = vld.sshfl [vmem:[#allocation1 + $0x10] sm:$0xff pattern:$0x75316420]  ;;  %v2923_v60 = vld.sshfl [vmem:[#allocation1 + $0x18] sm:$0xff pattern:$0x75316420] }
  0xbc   : > { %581 = vst [vmem:[#allocation1 + $0x10] ss:$2 sm:$0xff] %v2910_v50 }
  0xbd   : > { %v613_v61 = vld.sshfl [vmem:[#allocation1 + $0x8] sm:$0xff pattern:$0x75316420]  ;;  %v612_v62 = vld.sshfl [vmem:[#allocation1] sm:$0xff pattern:$0x75316420] }
  0xbe   : > { %618 = vrot.lane.b32.xlu1 %v613_v61, %s2650_s17  ;;  %638 = vst [vmem:[#allocation1] ss:$2 sm:$0xff] %v2906_v43 }
  0xc3   : > { %v584_v63 = vld.sshfl [vmem:[#allocation1 + $0x10] sm:$0xff pattern:$0x75316420]  ;;  %v585_v0 = vld.sshfl [vmem:[#allocation1 + $0x18] sm:$0xff pattern:$0x75316420] }
  0xc4   : > { %611 = vst [vmem:[#allocation1 + $0x11] ss:$2 sm:$0xff] %v2910_v50  ;;  %592 = vrot.lane.b32.xlu0 %v585_v0, %s2649_s16  ;;  %590 = vrot.lane.b32.xlu2 %v584_v63, %s2649_s16 }
  0xc5   : > { %v641_v3 = vld.sshfl [vmem:[#allocation1] sm:$0xff pattern:$0x75316420]  ;;  %v642_v4 = vld.sshfl [vmem:[#allocation1 + $0x8] sm:$0xff pattern:$0x75316420] }
  0xc6   : > { %668 = vst [vmem:[#allocation1 + $0x1] ss:$2 sm:$0xff] %v2906_v43 }
  0xcb   : > { %v615_v7 = vld.sshfl [vmem:[#allocation1 + $0x18] sm:$0xff pattern:$0x75316420]  ;;  %v614_v8 = vld.sshfl [vmem:[#allocation1 + $0x10] sm:$0xff pattern:$0x75316420] }
  0xcc   : > { %616 = vrot.lane.b32.xlu0 %v612_v62, %s2650_s17  ;;  %620 = vrot.lane.b32.xlu1 %v614_v8, %s2650_s17  ;;  %640 = vst [vmem:[#allocation1 + $0x10] ss:$2 sm:$0xff] %v2910_v50 }
  0xcd   : > { %v672_v11 = vld.sshfl [vmem:[#allocation1 + $0x8] sm:$0xff pattern:$0x75316420]  ;;  %v671_v12 = vld.sshfl [vmem:[#allocation1] sm:$0xff pattern:$0x75316420] }
  0xce   : > { %697 = vst [vmem:[#allocation1] ss:$2 sm:$0xff] %v2906_v43 }
  0xd3   : > { %v643_v15 = vld.sshfl [vmem:[#allocation1 + $0x10] sm:$0xff pattern:$0x75316420]  ;;  %v644_v16 = vld.sshfl [vmem:[#allocation1 + $0x18] sm:$0xff pattern:$0x75316420] }
  0xd4   : > { %649 = vrot.lane.b32.xlu2 %v643_v15, %s2651_s18  ;;  %651 = vrot.lane.b32.xlu0 %v644_v16, %s2651_s18  ;;  %670 = vst [vmem:[#allocation1 + $0x11] ss:$2 sm:$0xff] %v2910_v50 }
  0xd5   : > { %645 = vrot.lane.b32.xlu1 %v641_v3, %s2651_s18  ;;  %v701_v19 = vld.sshfl [vmem:[#allocation1 + $0x8] sm:$0xff pattern:$0x75316420]  ;;  %v700_v20 = vld.sshfl [vmem:[#allocation1] sm:$0xff pattern:$0x75316420] }
  0xd6   : > { %727 = vst [vmem:[#allocation1 + $0x1] ss:$2 sm:$0xff] %v2906_v43 }
  0xdb   : > { %v673_v23 = vld.sshfl [vmem:[#allocation1 + $0x10] sm:$0xff pattern:$0x75316420]  ;;  %v674_v24 = vld.sshfl [vmem:[#allocation1 + $0x18] sm:$0xff pattern:$0x75316420] }
  0xdc   : > { %677 = vrot.lane.b32.xlu2 %v672_v11, %s2652_s19  ;;  %699 = vst [vmem:[#allocation1 + $0x10] ss:$2 sm:$0xff] %v2910_v50 }
  0xdd   : > { %647 = vrot.lane.b32.xlu1 %v642_v4, %s2651_s18  ;;  %v731_v29 = vld.sshfl [vmem:[#allocation1 + $0x8] sm:$0xff pattern:$0x75316420]  ;;  %v730_v30 = vld.sshfl [vmem:[#allocation1] sm:$0xff pattern:$0x75316420] }
  0xde   : > { %756 = vst [vmem:[#allocation1] ss:$2 sm:$0xff] %v2906_v43 }
  0xe3   : > { %v702_v32 = vld.sshfl [vmem:[#allocation1 + $0x10] sm:$0xff pattern:$0x75316420]  ;;  %v703_v34 = vld.sshfl [vmem:[#allocation1 + $0x18] sm:$0xff pattern:$0x75316420] }
  0xe4   : > { %708 = vrot.lane.b32.xlu0 %v702_v32, %s2653_s22  ;;  %729 = vst [vmem:[#allocation1 + $0x11] ss:$2 sm:$0xff] %v2910_v50  ;;  %681 = vrot.lane.b32.xlu2 %v674_v24, %s2652_s19 }
  0xe5   : > { %675 = vrot.lane.b32.xlu1 %v671_v12, %s2652_s19  ;;  %v759_v35 = vld.sshfl [vmem:[#allocation1] sm:$0xff pattern:$0x75316420]  ;;  %v760_v36 = vld.sshfl [vmem:[#allocation1 + $0x8] sm:$0xff pattern:$0x75316420] }
  0xe6   : > { %1458 = vst [vmem:[#allocation1] ss:$2 sm:$0xff] %v2864_v26 }
  0xeb   : > { %v733_v37 = vld.sshfl [vmem:[#allocation1 + $0x18] sm:$0xff pattern:$0x75316420]  ;;  %v732_v38 = vld.sshfl [vmem:[#allocation1 + $0x10] sm:$0xff pattern:$0x75316420] }
  0xec   : > { %704 = vrot.lane.b32.xlu2 %v700_v20, %s2653_s22  ;;  %734 = vrot.lane.b32.xlu0 %v730_v30, %s2654_s24  ;;  %758 = vst [vmem:[#allocation1 + $0x10] ss:$2 sm:$0xff] %v2910_v50 }
  0xed   : > { %679 = vrot.lane.b32.xlu1 %v673_v23, %s2652_s19 }
  0xf3   : > { %v761_v39 = vld.sshfl [vmem:[#allocation1 + $0x10] sm:$0xff pattern:$0x75316420]  ;;  %v762_v40 = vld.sshfl [vmem:[#allocation1 + $0x18] sm:$0xff pattern:$0x75316420] }
  0xf4   : > { %706 = vrot.lane.b32.xlu2 %v701_v19, %s2653_s22  ;;  %740 = vrot.lane.b32.xlu0 %v733_v37, %s2654_s24  ;;  %1460 = vst [vmem:[#allocation1 + $0x10] ss:$2 sm:$0xff] %v2866_v27 }
  0xf5   : > { %710 = vrot.lane.b32.xlu1 %v703_v34, %s2653_s22 }
  0xfc   : > { %738 = vrot.lane.b32.xlu2 %v732_v38, %s2654_s24  ;;  %763 = vrot.lane.b32.xlu0 %v759_v35, %s2655_s26 }
  0xfd   : > { %736 = vrot.lane.b32.xlu1 %v731_v29, %s2654_s24 }
 0x104   : > { %767 = vrot.lane.b32.xlu2 %v761_v39, %s2655_s26  ;;  %765 = vrot.lane.b32.xlu0 %v760_v36, %s2655_s26  ;;  %v800_v39 = vld [vmem:[%s3639_s7] sm:$0xff] }
 0x105   : > { %563 = vrot.lane.b32.xlu1 %v2923_v60, %s2648_s15 }
 0x10c   : > { %622 = vrot.lane.b32.xlu2 %v615_v7, %s2650_s17  ;;  %769 = vrot.lane.b32.xlu0 %v762_v40, %s2655_s26 }
 0x110   : > { %v589_v26 = vpop.permute.xlu2 %588 }
 0x114   : > { %561 = vrot.lane.b32.xlu0 %v2921_v59, %s2648_s15 }
 0x11e   : > { %v591_v27 = vpop.permute.xlu2 %590 }
 0x11f   : > { %v596_v41 = vsel %vm594_vm2, %v589_v26, %v591_v27 }
 0x120   : > { %602 = vst [vmem:[#allocation3 + $0x60] sm:$0xf] %v596_v41  ;;  %v2970_v42 = vpop.permute.xlu1 %559  ;;  %v558_v43 = vpop.permute.xlu0 %557 }
 0x121   : > { %v566_v44 = vsel %vm565_vm3, %v558_v43, %v2970_v42 }
 0x122   : > { %572 = vst [vmem:[#allocation3 + $0xa8] sm:$0xf0] %v566_v44 }
 0x128   : > { %v587_v45 = vpop.permute.xlu1 %586 }
 0x129   : > { %v595_v46 = vsel %vm594_vm2, %v587_v45, %v589_v26 }
 0x12a   : > { %601 = vst [vmem:[#allocation3 + $0x48] sm:$0xf] %v595_v46 }
 0x12e   : > { %v650_v47 = vpop.permute.xlu2 %649 }
 0x130   : > { %v619_v51 = vpop.permute.xlu1 %618 }
 0x136   : > { %v593_v48 = vpop.permute.xlu0 %592  ;;  %v678_v49 = vpop.permute.xlu2 %677 }
 0x137   : > { %v597_v50 = vsel %vm594_vm2, %v591_v27, %v593_v48 }
 0x138   : > { %603 = vst [vmem:[#allocation3 + $0x28] sm:$0xf] %v597_v50 }
 0x13e   : > { %v617_v52 = vpop.permute.xlu0 %616  ;;  %v682_v53 = vpop.permute.xlu2 %681 }
 0x13f   : > { %v625_v54 = vsel %vm624_vm4, %v617_v52, %v619_v51  ;;  %v621_v55 = vpop.permute.xlu1 %620 }
 0x140   : > { %631 = vst [vmem:[#allocation3 + $0x48] sm:$0xf0] %v625_v54  ;;  %v626_v56 = vsel %vm624_vm4, %v619_v51, %v621_v55 }
 0x141   : > { %632 = vst [vmem:[#allocation3 + $0x60] sm:$0xf0] %v626_v56 }
 0x146   : > { %v652_v57 = vpop.permute.xlu0 %651  ;;  %v705_v58 = vpop.permute.xlu2 %704 }
 0x147   : > { %v656_v59 = vsel %vm653_vm5, %v650_v47, %v652_v57  ;;  %v646_v60 = vpop.permute.xlu1 %645  ;;  %v785_v54 = vld [vmem:[#allocation3 + $0x48] sm:$0xff] }
 0x148   : > { %662 = vst [vmem:[#allocation3 + $0x80] sm:$0xf] %v656_v59  ;;  %v786_v56 = vld [vmem:[#allocation3 + $0x60] sm:$0xff] }
 0x14e   : > { %v707_v61 = vpop.permute.xlu2 %706 }
 0x14f   : > { %v713_v62 = vsel %vm712_vm6, %v705_v58, %v707_v61  ;;  %v648_v63 = vpop.permute.xlu1 %647  ;;  %v799_v19 = vld [vmem:[#allocation3 + $0x80] sm:$0xf]  ;;  %v781_v58 = vld [vmem:[%s3635_s3] sm:$0xff] }
 0x150   : > { %719 = vst [vmem:[#allocation3] sm:$0xf] %v713_v62  ;;  %v654_v0 = vsel %vm653_vm5, %v646_v60, %v648_v63  ;;  %v655_v3 = vsel %vm653_vm5, %v648_v63, %v650_v47 }
 0x151   : > { %660 = vst [vmem:[#allocation3 + $0x40] sm:$0xf] %v654_v0 }
 0x152   : > { %661 = vst [vmem:[#allocation3 + $0x78] sm:$0xf] %v655_v3 }
 0x156   : > { %v709_v4 = vpop.permute.xlu0 %708  ;;  %v739_v7 = vpop.permute.xlu2 %738 }
 0x157   : > { %v714_v8 = vsel %vm712_vm6, %v707_v61, %v709_v4  ;;  %v676_v11 = vpop.permute.xlu1 %675  ;;  %v782_v61 = vld [vmem:[#allocation3 + $0xa8] sm:$0xff] }
 0x158   : > { %720 = vst [vmem:[#allocation3 + $0x50] sm:$0xf] %v714_v8  ;;  %v684_v12 = vsel %vm683_vm7, %v676_v11, %v678_v49  ;;  %v797_v15 = vld [vmem:[#allocation3 + $0x40] sm:$0xf]  ;;  %v2656_v8 = vmov 0  }
 0x159   : > { %690 = vst [vmem:[#allocation3 + $0x40] sm:$0xf0] %v684_v12  ;;  %2511 = vmatpush.msk.msrb.mxu0 %vm522_vm1, %v797_v15  ;;  %v798_v16 = vld [vmem:[#allocation3 + $0x78] sm:$0xf]  ;;  %2602 = vset.pattern.permute.xlu2 %v2656_v8  ;;  %v3025_v11 = vld [vmem:[%s2862_s21 + $0x4] sm:$0xf] }
 0x15a   : > { %2513 = vmatpush.msk.msrb.mxu2 %vm522_vm1, %v798_v16  ;;  %2512 = vmatmul.msk.f32.vlgmr.msrb.gmra.mxu0 %vm807_vm9, %v800_v39  ;;  %s2658_s21 = smov 1  }
 0x15b   : > { %2514 = vmatmul.msk.f32.vlgmr.msrb.gmra.mxu2 %vm807_vm9, %v800_v39  ;;  %2603 = vset.pattern.permute.xlu0 %v2656_v8 }
 0x15c   : > { %2515 = vmatpush.msk.msra.mxu2 %vm522_vm1, %v799_v19  ;;  %2614 = vset.pattern.permute.xlu1 %v2656_v8 }
 0x15e   : > { %v768_v20 = vpop.permute.xlu2 %767  ;;  %v735_v23 = vpop.permute.xlu0 %734 }
 0x15f   : > { %v680_v24 = vpop.permute.xlu1 %679 }
 0x160   : > { %v685_v29 = vsel %vm683_vm7, %v678_v49, %v680_v24  ;;  %v686_v30 = vsel %vm683_vm7, %v680_v24, %v682_v53  ;;  %v788_v52 = vld [vmem:[#allocation3 + $0x40] sm:$0xff] }
 0x161   : > { %691 = vst [vmem:[#allocation3 + $0x78] sm:$0xf0] %v685_v29 }
 0x162   : > { %692 = vst [vmem:[#allocation3 + $0x80] sm:$0xf0] %v686_v30  ;;  %v986_v30 = vld [vmem:[%s3641_s9] sm:$0x7] }
 0x163   : > { %2516 = vmatmul.msk.f32.vlgmr.msra.gmra.mxu2 %vm807_vm9, %v800_v39 }
 0x166   : > { %v623_v32 = vpop.permute.xlu2 %622  ;;  %v741_v34 = vpop.permute.xlu0 %740 }
 0x167   : > { %v627_v35 = vsel %vm624_vm4, %v621_v55, %v623_v32  ;;  %v745_v36 = vsel %vm742_vm8, %v739_v7, %v741_v34  ;;  %v711_v37 = vpop.permute.xlu1 %710 }
 0x168   : > { %633 = vst [vmem:[#allocation3 + $0x28] sm:$0xf0] %v627_v35  ;;  %v715_v38 = vsel %vm712_vm6, %v709_v4, %v711_v37  ;;  %v789_v53 = vld [vmem:[#allocation3 + $0x78] sm:$0xff] }
 0x169   : > { %751 = vst [vmem:[#allocation3 + $0x30] sm:$0xf0] %v745_v36  ;;  %v790_v0 = vld [vmem:[#allocation3 + $0x80] sm:$0xff]  ;;  %v988_v36 = vperm.slane %v986_v30, 0 }
 0x16a   : > { %721 = vst [vmem:[#allocation3 + $0x30] sm:$0xf] %v715_v38 }
 0x16e   : > { %v764_v40 = vpop.permute.xlu0 %763 }
 0x16f   : > { %v737_v26 = vpop.permute.xlu1 %736  ;;  %v787_v3 = vld [vmem:[#allocation3 + $0x28] sm:$0xff] }
 0x170   : > { %v743_v27 = vsel %vm742_vm8, %v735_v23, %v737_v26  ;;  %v744_v41 = vsel %vm742_vm8, %v737_v26, %v739_v7  ;;  %v880_v7 = vld [vmem:[%s3636_s4] sm:$0xff] }
 0x171   : > { %749 = vst [vmem:[#allocation3] sm:$0xf0] %v743_v27  ;;  %v793_v63 = vld [vmem:[#allocation3 + $0x30] sm:$0xff]  ;;  %883 = vperm.xlu2 %2602, %v880_v7   ;;  %v989_v27 = vperm.slane %v986_v30, 1 }
 0x172   : > { %750 = vst [vmem:[#allocation3 + $0x50] sm:$0xf0] %v744_v41 }
 0x176   : > { %v766_v43 = vpop.permute.xlu0 %765 }
 0x177   : > { %v772_v44 = vsel %vm771_vm10, %v764_v40, %v766_v43  ;;  %v773_v45 = vsel %vm771_vm10, %v766_v43, %v768_v20  ;;  %v564_v55 = vpop.permute.xlu1 %563 }
 0x178   : > { %778 = vst [vmem:[#allocation3 + $0x88] sm:$0xf] %v772_v44  ;;  %v791_v50 = vld [vmem:[#allocation3] sm:$0xff]  ;;  %v990_v44 = vperm.slane %v986_v30, 2 }
 0x179   : > { %779 = vst [vmem:[#allocation3 + $0x70] sm:$0xf] %v773_v45  ;;  %v792_v51 = vld [vmem:[#allocation3 + $0x50] sm:$0xff] }
 0x17e   : > { %v770_v46 = vpop.permute.xlu0 %769 }
 0x17f   : > { %v774_v47 = vsel %vm771_vm10, %v768_v20, %v770_v46  ;;  %v794_v48 = vld [vmem:[#allocation3 + $0x88] sm:$0xf] }
 0x180   : > { %780 = vst [vmem:[#allocation3 + $0xb0] sm:$0xf] %v774_v47  ;;  %2517 = vmatpush.msk.msrb.mxu3 %vm522_vm1, %v794_v48  ;;  %v795_v49 = vld [vmem:[#allocation3 + $0x70] sm:$0xf] }
 0x181   : > { %2519 = vmatpush.msk.msra.mxu0 %vm522_vm1, %v795_v49 }
 0x182   : > { %911 = vmatpush.msrb.mxu3 %v791_v50 }
 0x183   : > { %931 = vmatpush.msra.mxu0 %v792_v51 }
 0x184   : > { %912 = vmatpush.msrb.mxu3 %v788_v52 }
 0x185   : > { %932 = vmatpush.msra.mxu0 %v789_v53 }
 0x186   : > { %913 = vmatpush.msrb.mxu3 %v785_v54  ;;  %v562_v57 = vpop.permute.xlu0 %561 }
 0x187   : > { %933 = vmatpush.msra.mxu0 %v786_v56  ;;  %v567_v59 = vsel %vm565_vm3, %v2970_v42, %v562_v57  ;;  %v568_v60 = vsel %vm565_vm3, %v562_v57, %v564_v55  ;;  %v796_v62 = vld [vmem:[#allocation3 + $0xb0] sm:$0xf] }
 0x188   : > { %573 = vst [vmem:[#allocation3 + $0xd0] sm:$0xf0] %v567_v59  ;;  %914 = vmatpush.msrb.mxu3 %v782_v61  ;;  %2521 = vmatpush.msk.msrb.mxu1 %vm522_vm1, %v796_v62 }
 0x189   : > { %574 = vst [vmem:[#allocation3 + $0x10] sm:$0xf0] %v568_v60  ;;  %2518 = vmatmul.msk.f32.vlgmr.msrb.gmra.mxu3 %vm3645_vm11, %v781_v58 }
 0x18a   : > { %951 = vmatpush.msrb.mxu1 %v793_v63 }
 0x18c   : > { %952 = vmatpush.msrb.mxu1 %v790_v0 }
 0x18e   : > { %953 = vmatpush.msrb.mxu1 %v787_v3 }
 0x18f   : > { %v783_v4 = vld [vmem:[#allocation3 + $0xd0] sm:$0xff] }
 0x190   : > { %934 = vmatpush.msra.mxu0 %v783_v4  ;;  %v784_v42 = vld [vmem:[#allocation3 + $0x10] sm:$0xff] }
 0x191   : > { %954 = vmatpush.msrb.mxu1 %v784_v42  ;;  %2520 = vmatmul.msk.f32.vlgmr.msra.gmra.mxu0 %vm3645_vm11, %v781_v58 }
 0x192   : > { %2522 = vmatmul.msk.f32.vlgmr.msrb.gmra.mxu1 %vm3645_vm11, %v781_v58  ;;  %vm1246_vm11 = vcmask 588800  }
 0x193   : > { %1480 = vmatpush.msra.mxu1 %v2749_v2  ;;  %v2657_v2 = vmov 0.0  }
 0x194   : > { %380 = vst [vmem:[#allocation4] sm:$0xff] %v2657_v2  ;;  %1087 = vrot.lane.b32.xlu0 %v2657_v2, %s2658_s21 }
 0x195   : > { %1481 = vmatpush.msra.mxu1 %v2767_v6  ;;  %382 = vst.msk [vmem:[#allocation4 + $0x18] sm:$0xff] %vm381_vm12, %v2657_v2  ;;  %vm1069_vm12 = vcmask 138240  }
 0x197   : > { %1482 = vmatpush.msra.mxu1 %v2786_v10 }
 0x199   : > { %1483 = vmatpush.msra.mxu1 %v2805_v14 }
 0x19b   : > { %1484 = vmatpush.msra.mxu1 %v2823_v18 }
 0x19d   : > { %1485 = vmatpush.msra.mxu1 %v2845_v22 }
 0x19f   : > { %1486 = vmatpush.msra.mxu1 %v2872_v28 }
 0x1a1   : > { %1487 = vmatpush.msra.mxu1 %v2894_v33 }
 0x1a2   : > { %2527 = vmatmul.msk.f32.vlgmr.msra.gmra.mxu1 %vm432_vm0, %v3025_v11 }
 0x1a3   : > { %1540 = vmatpush.msrb.mxu1 %v2744_v1 }
 0x1a5   : > { %1541 = vmatpush.msrb.mxu1 %v2761_v5 }
 0x1a7   : > { %1542 = vmatpush.msrb.mxu1 %v2781_v9 }
 0x1a9   : > { %1543 = vmatpush.msrb.mxu1 %v2798_v13 }
 0x1ab   : > { %1544 = vmatpush.msrb.mxu1 %v2817_v17 }
 0x1ad   : > { %1545 = vmatpush.msrb.mxu1 %v2839_v21 }
 0x1af   : > { %1546 = vmatpush.msrb.mxu1 %v2857_v25 }
 0x1b1   : > { %1547 = vmatpush.msrb.mxu1 %v2885_v31 }
 0x1b2   : > { %2530 = vmatmul.msk.f32.vlgmr.msrb.gmra.mxu1 %vm432_vm0, %v3025_v11 }
 0x1cb   : > { %v884_v5 = vpop.permute.xlu2 %883 }
 0x1d7   : > { %v3044_v1 = vpop.f32.mrf.mxu0 }
 0x206   : > { %v1088_v53 = vpop.permute.xlu0 %1087 }
 0x20c   : > { %v916_v6 = vpop.f32.mrf.mxu3 }
 0x20d   : > { %v917_v9 = vadd.f32 %v916_v6, %v884_v5 }
 0x20e   : > { %v936_v10 = vpop.f32.mrf.mxu0 }
 0x20f   : > { %v962_v13 = vmul.f32 0.044715, %v917_v9  ;;  %v937_v14 = vadd.f32 %v936_v10, %v884_v5  ;;  %v956_v17 = vpop.f32.mrf.mxu1  ;;  %v959_v34 = vmul.f32 0.5, %v917_v9 }
 0x210   : > { %v957_v18 = vadd.f32 %v956_v17, %v884_v5 }
 0x211   : > { %v965_v21 = vmul.f32 %v962_v13, %v917_v9  ;;  %v963_v22 = vmul.f32 0.044715, %v937_v14  ;;  %v960_v40 = vmul.f32 0.5, %v937_v14 }
 0x212   : > { %v964_v25 = vmul.f32 0.044715, %v957_v18  ;;  %v961_v41 = vmul.f32 0.5, %v957_v18 }
 0x213   : > { %v968_v28 = vmul.f32 %v965_v21, %v917_v9  ;;  %v966_v31 = vmul.f32 %v963_v22, %v937_v14 }
 0x214   : > { %v967_v33 = vmul.f32 %v964_v25, %v957_v18 }
 0x215   : > { %v971_v12 = vadd.f32 %v968_v28, %v917_v9  ;;  %v969_v15 = vmul.f32 %v966_v31, %v937_v14 }
 0x216   : > { %v970_v16 = vmul.f32 %v967_v33, %v957_v18 }
 0x217   : > { %v974_v19 = vmul.f32 0.7978846, %v971_v12  ;;  %v972_v20 = vadd.f32 %v969_v15, %v937_v14 }
 0x218   : > { %v973_v23 = vadd.f32 %v970_v16, %v957_v18 }
 0x219   : > { %2615 = vtanh.f32 %v974_v19  ;;  %v975_v24 = vmul.f32 0.7978846, %v972_v20 }
 0x21a   : > { %v976_v29 = vmul.f32 0.7978846, %v973_v23 }
 0x21b   : > { %2617 = vtanh.f32 %v975_v24  ;;  %v1452_v24 = vld [vmem:[%s3634_s2 + $0xf0] sm:$0xff] }
 0x21c   : > { %2619 = vtanh.f32 %v976_v29 }
 0x21f   : > { %v2616_v32 = vpop.eup %2615 }
 0x220   : > { %v980_v35 = vadd.f32 1.0, %v2616_v32 }
 0x221   : > { %v2618_v37 = vpop.eup %2617 }
 0x222   : > { %v2620_v38 = vpop.eup %2619  ;;  %v983_v39 = vmul.f32 %v980_v35, %v959_v34  ;;  %v981_v26 = vadd.f32 1.0, %v2618_v37  ;;  %v3159_v34 = vld [vmem:[%s3637_s5] sm:$0xff]  ;;  %v1448_v35 = vld [vmem:[%s3634_s2 + $0xd0] sm:$0xff] }
 0x223   : > { %v982_v43 = vadd.f32 1.0, %v2620_v38  ;;  %v1440_v37 = vld [vmem:[%s3634_s2 + $0x90] sm:$0xff] }
 0x224   : > { %v3050_v45 = vmul.f32 %v988_v36, %v983_v39  ;;  %v984_v46 = vmul.f32 %v981_v26, %v960_v40  ;;  %v1444_v36 = vld [vmem:[%s3634_s2 + $0xb0] sm:$0xff] }
 0x225   : > { %v985_v47 = vmul.f32 %v982_v43, %v961_v41  ;;  %v1436_v40 = vld [vmem:[%s3634_s2 + $0x70] sm:$0xff]  ;;  %v1451_v41 = vld [vmem:[%s3634_s2 + $0xe8] sm:$0xff] }
 0x226   : > { %v3052_v48 = vmul.f32 %v989_v27, %v984_v46  ;;  %1108 = vst [vmem:[#allocation3 + $0x88] sm:$0xff] %v3050_v45  ;;  %v1432_v43 = vld [vmem:[%s3634_s2 + $0x50] sm:$0xff]  ;;  %v1443_v46 = vld [vmem:[%s3634_s2 + $0xa8] sm:$0xff] }
 0x227   : > { %v996_v49 = vmul.f32 %v990_v44, %v985_v47  ;;  %v1447_v44 = vld [vmem:[%s3634_s2 + $0xc8] sm:$0xff]  ;;  %v1424_v47 = vld [vmem:[%s3634_s2 + $0x10] sm:$0xff] }
 0x228   : > { %1197 = vrot.lane.b32.xlu0 %v3052_v48, %s2651_s18  ;;  %1172 = vrot.lane.b32.xlu2 %v3052_v48, %s2650_s17  ;;  %1109 = vst [vmem:[#allocation3 + $0x70] sm:$0xff] %v3052_v48 }
 0x229   : > { %1000 = vst.msk [vmem:[#allocation4 + $0x18] sm:$0xff] %vm3643_vm13, %v996_v49  ;;  %vm1043_vm13 = vcmask 146432   ;;  %v1439_v49 = vld [vmem:[%s3634_s2 + $0x88] sm:$0xff] }
 0x230   : > { %v3061_v50 = vld [vmem:[#allocation4 + $0x18] sm:$0xff] }
 0x231   : > { %1199 = vrot.lane.b32.xlu1 %v3061_v50, %s2651_s18  ;;  %1174 = vrot.lane.b32.xlu0 %v3061_v50, %s2650_s17  ;;  %1110 = vst [vmem:[#allocation3 + $0xb0] sm:$0xff] %v3061_v50 }
 0x232   : > { %1148 = vrot.lane.b32.xlu2 %v3061_v50, %s2659_s12 }
 0x239   : > { %1146 = vrot.lane.b32.xlu1 %v3052_v48, %s2659_s12  ;;  %1195 = vrot.lane.b32.xlu0 %v3050_v45, %s2651_s18 }
 0x23a   : > { %1123 = vrot.lane.b32.xlu2 %v3061_v50, %s2648_s15 }
 0x241   : > { %1121 = vrot.lane.b32.xlu1 %v3052_v48, %s2648_s15  ;;  %1170 = vrot.lane.b32.xlu0 %v3050_v45, %s2650_s17 }
 0x242   : > { %1089 = vrot.lane.b32.xlu2 %v3050_v45, %s2658_s21 }
 0x249   : > { %1144 = vrot.lane.b32.xlu1 %v3050_v45, %s2659_s12  ;;  %1091 = vrot.lane.b32.xlu0 %v3052_v48, %s2658_s21 }
 0x24a   : > { %1063 = vrot.lane.b32.xlu2 %v3050_v45, %s3650_s27 }
 0x251   : > { %1119 = vrot.lane.b32.xlu1 %v3050_v45, %s2648_s15  ;;  %1065 = vrot.lane.b32.xlu0 %v3052_v48, %s3650_s27 }
 0x252   : > { %1039 = vrot.lane.b32.xlu2 %v3052_v48, %s3648_s20 }
 0x259   : > { %1037 = vrot.lane.b32.xlu1 %v3050_v45, %s3648_s20  ;;  %1061 = vrot.lane.b32.xlu0 %v2657_v2, %s3650_s27 }
 0x25a   : > { %1013 = vrot.lane.b32.xlu2 %v3052_v48, %s3646_s23 }
 0x261   : > { %1011 = vrot.lane.b32.xlu1 %v3050_v45, %s3646_s23  ;;  %1093 = vrot.lane.b32.xlu0 %v3061_v50, %s2658_s21 }
 0x262   : > { %1009 = vrot.lane.b32.xlu2 %v2657_v2, %s3646_s23 }
 0x269   : > { %1035 = vrot.lane.b32.xlu1 %v2657_v2, %s3648_s20  ;;  %1015 = vrot.lane.b32.xlu0 %v3061_v50, %s3646_s23  ;;  %s3658_s23 = smov 18  }
 0x26a   : > { %1041 = vrot.lane.b32.xlu2 %v3061_v50, %s3648_s20 }
 0x271   : > { %1067 = vrot.lane.b32.xlu1 %v3061_v50, %s3650_s27 }
 0x282   : > { %v1173_v51 = vpop.permute.xlu2 %1172 }
 0x28c   : > { %v3114_v52 = vpop.permute.xlu2 %1148 }
 0x294   : > { %v3116_v54 = vpop.permute.xlu2 %1123 }
 0x29a   : > { %v1198_v55 = vpop.permute.xlu0 %1197 }
 0x29c   : > { %v1090_v56 = vpop.permute.xlu2 %1089 }
 0x29d   : > { %v1096_v57 = vsel %vm1095_vm14, %v1088_v53, %v1090_v56  ;;  %v1435_v53 = vld [vmem:[%s3634_s2 + $0x68] sm:$0xff] }
 0x29e   : > { %1102 = vst [vmem:[#allocation3] sm:$0xff] %v1096_v57 }
 0x2a3   : > { %v3119_v58 = vpop.permute.xlu1 %1199  ;;  %v3121_v59 = vpop.permute.xlu0 %1174 }
 0x2a4   : > { %v1204_v60 = vsel %vm653_vm5, %v1198_v55, %v3119_v58  ;;  %v1064_v61 = vpop.permute.xlu2 %1063  ;;  %v1179_v62 = vsel %vm624_vm4, %v1173_v51, %v3121_v59 }
 0x2a5   : > { %1277 = vmatpush.msra.mxu3 %v1204_v60  ;;  %v3225_v60 = vpop.f32.mrf.mxu2 }
 0x2a7   : > { %1278 = vmatpush.msra.mxu3 %v1179_v62 }
 0x2ab   : > { %v1147_v63 = vpop.permute.xlu1 %1146  ;;  %v1196_v0 = vpop.permute.xlu0 %1195 }
 0x2ac   : > { %v1154_v3 = vsel %vm3644_vm15, %v1147_v63, %v3114_v52  ;;  %v1203_v4 = vsel %vm653_vm5, %v1196_v0, %v1198_v55  ;;  %v1040_v42 = vpop.permute.xlu2 %1039  ;;  %v1431_v55 = vld [vmem:[%s3634_s2 + $0x48] sm:$0xff] }
 0x2ad   : > { %1279 = vmatpush.msra.mxu3 %v1154_v3  ;;  %1257 = vmatpush.msrb.mxu2 %v1203_v4  ;;  %v1464_v3 = vld.sshfl [vmem:[#allocation1 + $0x18] sm:$0xff pattern:$0x75316420] }
 0x2b3   : > { %v1122_v7 = vpop.permute.xlu1 %1121  ;;  %v1171_v8 = vpop.permute.xlu0 %1170 }
 0x2b4   : > { %v1128_v5 = vsel %vm565_vm3, %v1122_v7, %v3116_v54  ;;  %v1178_v6 = vsel %vm624_vm4, %v1171_v8, %v1173_v51  ;;  %v1014_v9 = vpop.permute.xlu2 %1013 }
 0x2b5   : > { %1280 = vmatpush.msra.mxu3 %v1128_v5  ;;  %1258 = vmatpush.msrb.mxu2 %v1178_v6 }
 0x2b7   : > { %1281 = vmatpush.msra.mxu3 %v3052_v48 }
 0x2bb   : > { %v1145_v10 = vpop.permute.xlu1 %1144  ;;  %v1092_v13 = vpop.permute.xlu0 %1091 }
 0x2bc   : > { %v1153_v14 = vsel %vm3644_vm15, %v1145_v10, %v1147_v63  ;;  %v1097_v17 = vsel %vm1095_vm14, %v1090_v56, %v1092_v13  ;;  %v1010_v18 = vpop.permute.xlu2 %1009  ;;  %vm1017_vm15 = vcmask 154624   ;;  %v1427_v56 = vld [vmem:[%s3634_s2 + $0x28] sm:$0xff]  ;;  %v3229_v63 = vpop.f32.mrf.mxu2 }
 0x2bd   : > { %1103 = vst [vmem:[#allocation3 + $0x50] sm:$0xff] %v1097_v17  ;;  %1259 = vmatpush.msrb.mxu2 %v1153_v14  ;;  %1282 = vmatpush.msra.mxu3 %v1097_v17  ;;  %v1461_v17 = vld.sshfl [vmem:[#allocation1] sm:$0xff pattern:$0x75316420] }
 0x2c3   : > { %v1120_v21 = vpop.permute.xlu1 %1119  ;;  %v3136_v22 = vpop.permute.xlu0 %1065 }
 0x2c4   : > { %v1127_v25 = vsel %vm565_vm3, %v1120_v21, %v1122_v7  ;;  %v1071_v28 = vsel %vm1069_vm12, %v1064_v61, %v3136_v22  ;;  %v1042_v31 = vpop.permute.xlu2 %1041 }
 0x2c5   : > { %1077 = vst [vmem:[#allocation3 + $0x78] sm:$0xff] %v1071_v28  ;;  %v3142_v33 = vsel %vm1043_vm13, %v1040_v42, %v1042_v31  ;;  %1260 = vmatpush.msrb.mxu2 %v1127_v25  ;;  %1283 = vmatpush.msra.mxu3 %v1071_v28 }
 0x2c6   : > { %1052 = vst [vmem:[#allocation3 + $0x28] sm:$0xff] %v3142_v33 }
 0x2c7   : > { %1261 = vmatpush.msrb.mxu2 %v3050_v45  ;;  %v1428_v45 = vld [vmem:[%s3634_s2 + $0x30] sm:$0xff] }
 0x2c9   : > { %1262 = vmatpush.msrb.mxu2 %v1096_v57  ;;  %v1423_v57 = vld [vmem:[%s3634_s2 + $0x8] sm:$0xff] }
 0x2cb   : > { %v1038_v12 = vpop.permute.xlu1 %1037  ;;  %v1062_v15 = vpop.permute.xlu0 %1061 }
 0x2cc   : > { %v1045_v16 = vsel %vm1043_vm13, %v1038_v12, %v1040_v42  ;;  %v1070_v19 = vsel %vm1069_vm12, %v1062_v15, %v1064_v61  ;;  %v1489_v61 = vpop.f32.mrf.mxu1  ;;  %v1463_v42 = vld.sshfl [vmem:[#allocation1 + $0x10] sm:$0xff pattern:$0x75316420] }
 0x2cd   : > { %1051 = vst [vmem:[#allocation3 + $0x60] sm:$0xff] %v1045_v16  ;;  %1284 = vmatpush.msra.mxu3 %v1045_v16  ;;  %1263 = vmatpush.msrb.mxu2 %v1070_v19 }
 0x2ce   : > { %1076 = vst [vmem:[#allocation3 + $0x40] sm:$0xff] %v1070_v19 }
 0x2d3   : > { %v1012_v20 = vpop.permute.xlu1 %1011  ;;  %v1094_v23 = vpop.permute.xlu0 %1093 }
 0x2d4   : > { %v1018_v29 = vsel %vm1017_vm15, %v1010_v18, %v1012_v20  ;;  %v1019_v30 = vsel %vm1017_vm15, %v1012_v20, %v1014_v9  ;;  %v3154_v32 = vsel %vm1095_vm14, %v1092_v13, %v1094_v23  ;;  %v1549_v0 = vpop.f32.mrf.mxu1  ;;  %v1490_v18 = vadd.f32 %v1489_v61, %v1461_v17 }
 0x2d5   : > { %1024 = vst [vmem:[#allocation3 + $0xa8] sm:$0xff] %v1018_v29  ;;  %1285 = vmatpush.msra.mxu3 %v1019_v30  ;;  %v1550_v4 = vadd.f32 %v1549_v0, %v1464_v3 }
 0x2d6   : > { %1025 = vst [vmem:[#allocation3 + $0xd0] sm:$0xff] %v1019_v30  ;;  %2524 = vmatmul.msk.f32.vlgmr.msra.gmra.mxu3 %vm1246_vm11, %v3159_v34 }
 0x2d7   : > { %1520 = vmatpush.msrb.mxu3 %v1452_v24  ;;  %1104 = vst [vmem:[#allocation3 + $0x30] sm:$0xff] %v3154_v32  ;;  %v1557_v5 = vrot.slane %v1550_v4, 4 }
 0x2d9   : > { %1521 = vmatpush.msrb.mxu3 %v1448_v35 }
 0x2db   : > { %1522 = vmatpush.msrb.mxu3 %v1444_v36  ;;  %v1036_v38 = vpop.permute.xlu1 %1035  ;;  %v1016_v39 = vpop.permute.xlu0 %1015 }
 0x2dc   : > { %v1044_v26 = vsel %vm1043_vm13, %v1036_v38, %v1038_v12  ;;  %v3178_v27 = vsel %vm1017_vm15, %v1014_v9, %v1016_v39 }
 0x2dd   : > { %1523 = vmatpush.msrb.mxu3 %v1440_v37  ;;  %1050 = vst [vmem:[#allocation3 + $0x48] sm:$0xff] %v1044_v26  ;;  %1264 = vmatpush.msrb.mxu2 %v1044_v26 }
 0x2de   : > { %1026 = vst [vmem:[#allocation3 + $0x10] sm:$0xff] %v3178_v27 }
 0x2df   : > { %1524 = vmatpush.msrb.mxu3 %v1436_v40  ;;  %1265 = vmatpush.msrb.mxu2 %v1018_v29 }
 0x2e0   : > { %2523 = vmatmul.msk.f32.vlgmr.msrb.gmra.mxu2 %vm1246_vm11, %v3159_v34 }
 0x2e1   : > { %1500 = vmatpush.msra.mxu2 %v1451_v41  ;;  %1525 = vmatpush.msrb.mxu3 %v1432_v43 }
 0x2e3   : > { %1501 = vmatpush.msra.mxu2 %v1447_v44  ;;  %1526 = vmatpush.msrb.mxu3 %v1428_v45  ;;  %v1068_v48 = vpop.permute.xlu1 %1067 }
 0x2e4   : > { %v3206_v51 = vsel %vm1069_vm12, %v3136_v22, %v1068_v48 }
 0x2e5   : > { %1502 = vmatpush.msra.mxu2 %v1443_v46  ;;  %1527 = vmatpush.msrb.mxu3 %v1424_v47  ;;  %1078 = vst [vmem:[#allocation3 + $0x80] sm:$0xff] %v3206_v51 }
 0x2e6   : > { %2529 = vmatmul.msk.f32.vlgmr.msrb.gmra.mxu3 %vm432_vm0, %v3025_v11 }
 0x2e7   : > { %1503 = vmatpush.msra.mxu2 %v1439_v49 }
 0x2e9   : > { %1504 = vmatpush.msra.mxu2 %v1435_v53 }
 0x2eb   : > { %1505 = vmatpush.msra.mxu2 %v1431_v55 }
 0x2ed   : > { %1506 = vmatpush.msra.mxu2 %v1427_v56 }
 0x2ef   : > { %1507 = vmatpush.msra.mxu2 %v1423_v57 }
 0x2f0   : > { %2528 = vmatmul.msk.f32.vlgmr.msra.gmra.mxu2 %vm432_vm0, %v3025_v11  ;;  %v1462_v11 = vld.sshfl [vmem:[#allocation1 + $0x8] sm:$0xff pattern:$0x75316420]  ;;  %vm3652_vm0 = vcmask 293888  }
 0x359   : > { %v3227_v62 = vpop.f32.mrf.mxu3 }
 0x363   : > { %v3231_v8 = vpop.f32.mrf.mxu2 }
 0x369   : > { %v1529_v7 = vpop.f32.mrf.mxu3 }
 0x36a   : > { %v1530_v6 = vadd.f32 %v1529_v7, %v1463_v42 }
 0x36c   : > { %v3234_v9 = vsel %vm522_vm1, %v1530_v6, %v1557_v5 }
 0x36d   : > { %1563 = vst [vmem:[#allocation2 + $0x8] sm:$0xff] %v3234_v9 }
 0x373   : > { %v1509_v10 = vpop.f32.mrf.mxu2 }
 0x374   : > { %v1565_v13 = vld [vmem:[#allocation2 + $0x8] sm:$0xf]  ;;  %v1510_v14 = vadd.f32 %v1509_v10, %v1462_v11 }
 0x375   : > { %1570 = vst [vmem:[#allocation1 + $0x10] ss:$2 sm:$0xff] %v1565_v13 }
 0x376   : > { %v1556_v21 = vrot.slane %v1510_v14, 4 }
 0x378   : > { %v3238_v22 = vsel %vm522_vm1, %v1490_v18, %v1556_v21 }
 0x379   : > { %1568 = vst [vmem:[#allocation1] ss:$2 sm:$0xff] %v3238_v22 }
 0x37c   : > { %v1573_v25 = vld.sshfl [vmem:[#allocation1 + $0x10] sm:$0xff pattern:$0x75316420] }
 0x37d   : > { %1587 = vst [vmem:[#allocation1 + $0x11] ss:$2 sm:$0xff] %v3234_v9 }
 0x37e   : > { %1579 = vst [vmem:[#allocation3 + $0x10] sm:$0xf] %v1573_v25 }
 0x380   : > { %v1571_v28 = vld.sshfl [vmem:[#allocation1] sm:$0xff pattern:$0x75316420]  ;;  %v1572_v31 = vld.sshfl [vmem:[#allocation1 + $0x8] sm:$0xff pattern:$0x75316420] }
 0x381   : > { %1585 = vst [vmem:[#allocation1 + $0x1] ss:$2 sm:$0xff] %v3238_v22 }
 0x382   : > { %1577 = vst [vmem:[#allocation3 + $0xa8] sm:$0xf] %v1571_v28 }
 0x383   : > { %1578 = vst [vmem:[#allocation3 + $0xd0] sm:$0xf] %v1572_v31 }
 0x384   : > { %v1591_v12 = vld.sshfl [vmem:[#allocation1 + $0x18] sm:$0xff pattern:$0x75316420]  ;;  %v1590_v15 = vld.sshfl [vmem:[#allocation1 + $0x10] sm:$0xff pattern:$0x75316420] }
 0x385   : > { %1598 = vrot.lane.b32.xlu1 %v1591_v12, %s2648_s15  ;;  %1596 = vrot.lane.b32.xlu0 %v1590_v15, %s2648_s15  ;;  %1615 = vst [vmem:[#allocation1 + $0x10] ss:$2 sm:$0xff] %v3234_v9 }
 0x388   : > { %v3246_v16 = vld.sshfl [vmem:[#allocation1] sm:$0xff pattern:$0x75316420]  ;;  %v3248_v19 = vld.sshfl [vmem:[#allocation1 + $0x8] sm:$0xff pattern:$0x75316420] }
 0x389   : > { %1613 = vst [vmem:[#allocation1] ss:$2 sm:$0xff] %v3238_v22 }
 0x38c   : > { %v1619_v20 = vld.sshfl [vmem:[#allocation1 + $0x18] sm:$0xff pattern:$0x75316420]  ;;  %v1618_v23 = vld.sshfl [vmem:[#allocation1 + $0x10] sm:$0xff pattern:$0x75316420] }
 0x38d   : > { %1626 = vrot.lane.b32.xlu1 %v1619_v20, %s2649_s16  ;;  %1624 = vrot.lane.b32.xlu0 %v1618_v23, %s2649_s16  ;;  %1644 = vst [vmem:[#allocation1 + $0x11] ss:$2 sm:$0xff] %v3234_v9 }
 0x390   : > { %v1616_v24 = vld.sshfl [vmem:[#allocation1] sm:$0xff pattern:$0x75316420]  ;;  %v1617_v29 = vld.sshfl [vmem:[#allocation1 + $0x8] sm:$0xff pattern:$0x75316420] }
 0x391   : > { %1642 = vst [vmem:[#allocation1 + $0x1] ss:$2 sm:$0xff] %v3238_v22 }
 0x394   : > { %v1648_v30 = vld.sshfl [vmem:[#allocation1 + $0x18] sm:$0xff pattern:$0x75316420]  ;;  %v1647_v35 = vld.sshfl [vmem:[#allocation1 + $0x10] sm:$0xff pattern:$0x75316420] }
 0x395   : > { %1655 = vrot.lane.b32.xlu0 %v1648_v30, %s2650_s17  ;;  %1653 = vrot.lane.b32.xlu2 %v1647_v35, %s2650_s17  ;;  %1672 = vst [vmem:[#allocation1 + $0x10] ss:$2 sm:$0xff] %v3234_v9 }
 0x398   : > { %v1645_v36 = vld.sshfl [vmem:[#allocation1] sm:$0xff pattern:$0x75316420]  ;;  %v1646_v37 = vld.sshfl [vmem:[#allocation1 + $0x8] sm:$0xff pattern:$0x75316420] }
 0x399   : > { %1670 = vst [vmem:[#allocation1] ss:$2 sm:$0xff] %v3238_v22 }
 0x39c   : > { %v1676_v38 = vld.sshfl [vmem:[#allocation1 + $0x18] sm:$0xff pattern:$0x75316420]  ;;  %v1675_v39 = vld.sshfl [vmem:[#allocation1 + $0x10] sm:$0xff pattern:$0x75316420] }
 0x39d   : > { %1683 = vrot.lane.b32.xlu0 %v1676_v38, %s2651_s18  ;;  %1681 = vrot.lane.b32.xlu2 %v1675_v39, %s2651_s18  ;;  %1701 = vst [vmem:[#allocation1 + $0x11] ss:$2 sm:$0xff] %v3234_v9 }
 0x3a0   : > { %v1674_v40 = vld.sshfl [vmem:[#allocation1 + $0x8] sm:$0xff pattern:$0x75316420]  ;;  %v1673_v26 = vld.sshfl [vmem:[#allocation1] sm:$0xff pattern:$0x75316420] }
 0x3a1   : > { %1679 = vrot.lane.b32.xlu1 %v1674_v40, %s2651_s18  ;;  %1699 = vst [vmem:[#allocation1 + $0x1] ss:$2 sm:$0xff] %v3238_v22 }
 0x3a4   : > { %v1705_v41 = vld.sshfl [vmem:[#allocation1 + $0x18] sm:$0xff pattern:$0x75316420]  ;;  %v1704_v43 = vld.sshfl [vmem:[#allocation1 + $0x10] sm:$0xff pattern:$0x75316420] }
 0x3a5   : > { %1712 = vrot.lane.b32.xlu2 %v1705_v41, %s2652_s19  ;;  %1729 = vst [vmem:[#allocation1 + $0x10] ss:$2 sm:$0xff] %v3234_v9 }
 0x3a8   : > { %v1703_v44 = vld.sshfl [vmem:[#allocation1 + $0x8] sm:$0xff pattern:$0x75316420]  ;;  %v1702_v45 = vld.sshfl [vmem:[#allocation1] sm:$0xff pattern:$0x75316420] }
 0x3a9   : > { %1677 = vrot.lane.b32.xlu1 %v1673_v26, %s2651_s18  ;;  %1708 = vrot.lane.b32.xlu0 %v1703_v44, %s2652_s19  ;;  %1727 = vst [vmem:[#allocation1] ss:$2 sm:$0xff] %v3238_v22 }
 0x3ac   : > { %v1733_v46 = vld.sshfl [vmem:[#allocation1 + $0x18] sm:$0xff pattern:$0x75316420]  ;;  %v1732_v47 = vld.sshfl [vmem:[#allocation1 + $0x10] sm:$0xff pattern:$0x75316420] }
 0x3ad   : > { %1706 = vrot.lane.b32.xlu2 %v1702_v45, %s2652_s19  ;;  %1758 = vst [vmem:[#allocation1 + $0x11] ss:$2 sm:$0xff] %v3234_v9  ;;  %v3328_v45 = vld [vmem:[%s3639_s7] sm:$0xff] }
 0x3b0   : > { %v1731_v48 = vld.sshfl [vmem:[#allocation1 + $0x8] sm:$0xff pattern:$0x75316420]  ;;  %v1730_v49 = vld.sshfl [vmem:[#allocation1] sm:$0xff pattern:$0x75316420] }
 0x3b1   : > { %1710 = vrot.lane.b32.xlu1 %v1704_v43, %s2652_s19  ;;  %1740 = vrot.lane.b32.xlu0 %v1733_v46, %s2653_s22  ;;  %1756 = vst [vmem:[#allocation1 + $0x1] ss:$2 sm:$0xff] %v3238_v22 }
 0x3b4   : > { %v1762_v53 = vld.sshfl [vmem:[#allocation1 + $0x18] sm:$0xff pattern:$0x75316420]  ;;  %v1761_v55 = vld.sshfl [vmem:[#allocation1 + $0x10] sm:$0xff pattern:$0x75316420] }
 0x3b5   : > { %1738 = vrot.lane.b32.xlu2 %v1732_v47, %s2653_s22  ;;  %1786 = vst [vmem:[#allocation1 + $0x10] ss:$2 sm:$0xff] %v3234_v9 }
 0x3b8   : > { %v1760_v56 = vld.sshfl [vmem:[#allocation1 + $0x8] sm:$0xff pattern:$0x75316420]  ;;  %v1759_v57 = vld.sshfl [vmem:[#allocation1] sm:$0xff pattern:$0x75316420] }
 0x3b9   : > { %1734 = vrot.lane.b32.xlu1 %v1730_v49, %s2653_s22  ;;  %1765 = vrot.lane.b32.xlu0 %v1760_v56, %s2654_s24  ;;  %1784 = vst [vmem:[#allocation1] ss:$2 sm:$0xff] %v3238_v22 }
 0x3bc   : > { %v1789_v61 = vld.sshfl [vmem:[#allocation1 + $0x10] sm:$0xff pattern:$0x75316420]  ;;  %v1790_v0 = vld.sshfl [vmem:[#allocation1 + $0x18] sm:$0xff pattern:$0x75316420] }
 0x3bd   : > { %1736 = vrot.lane.b32.xlu2 %v1731_v48, %s2653_s22  ;;  %s2672_s22 = smov 100  }
 0x3c0   : > { %v1788_v3 = vld.sshfl [vmem:[#allocation1 + $0x8] sm:$0xff pattern:$0x75316420]  ;;  %v1787_v4 = vld.sshfl [vmem:[#allocation1] sm:$0xff pattern:$0x75316420] }
 0x3c1   : > { %1767 = vrot.lane.b32.xlu1 %v1761_v55, %s2654_s24  ;;  %1795 = vrot.lane.b32.xlu0 %v1789_v61, %s2655_s26 }
 0x3c5   : > { %1769 = vrot.lane.b32.xlu2 %v1762_v53, %s2654_s24 }
 0x3c9   : > { %1651 = vrot.lane.b32.xlu1 %v1646_v37, %s2650_s17  ;;  %1622 = vrot.lane.b32.xlu0 %v1617_v29, %s2649_s16 }
 0x3cd   : > { %1763 = vrot.lane.b32.xlu2 %v1759_v57, %s2654_s24  ;;  %s2674_s24 = smov 98  }
 0x3d1   : > { %1797 = vrot.lane.b32.xlu1 %v1790_v0, %s2655_s26  ;;  %1649 = vrot.lane.b32.xlu0 %v1645_v36, %s2650_s17 }
 0x3d5   : > { %1620 = vrot.lane.b32.xlu2 %v1616_v24, %s2649_s16 }
 0x3d9   : > { %1793 = vrot.lane.b32.xlu1 %v1788_v3, %s2655_s26 }
 0x3dd   : > { %1791 = vrot.lane.b32.xlu2 %v1787_v4, %s2655_s26  ;;  %s2566_s26 = sshll.u32 %s3664_s14, 5  ;;  %s2664_s14 = smov 124  }
 0x3de   : > { %s3520_s28 = scalar_lea.vmem %s3642_s10, %s2566_s26 }
 0x3e1   : > { %1594 = vrot.lane.b32.xlu1 %v3248_v19, %s2648_s15 }
 0x3e5   : > { %1592 = vrot.lane.b32.xlu2 %v3246_v16, %s2648_s15 }
 0x3e9   : > { %2605 = vrot.lane.b32.xlu1 %v2657_v2, %s2651_s18 }
 0x3ed   : > { %2610 = vrot.lane.b32.xlu2 %v2657_v2, %s2650_s17 }
 0x3ef   : > { %v3299_v42 = vpop.permute.xlu2 %1653 }
 0x3f1   : > { %1150 = vrot.lane.b32.xlu1 %v2657_v2, %s2659_s12 }
 0x3f5   : > { %1125 = vrot.lane.b32.xlu2 %v2657_v2, %s2648_s15 }
 0x3f7   : > { %v1599_v7 = vpop.permute.xlu1 %1598  ;;  %v3305_v5 = vpop.permute.xlu0 %1596 }
 0x3f8   : > { %v1682_v6 = vpop.permute.xlu2 %1681  ;;  %v1602_v9 = vsel %vm565_vm3, %v3305_v5, %v1599_v7 }
 0x3f9   : > { %1608 = vst [vmem:[#allocation3 + $0x10] sm:$0xf0] %v1602_v9  ;;  %2145 = vrot.lane.b32.xlu1 %v2657_v2, %s2648_s15  ;;  %v1906_v9 = vld [vmem:[%s3636_s4] sm:$0xff] }
 0x3fa   : > { %1909 = vperm.xlu0 %2603, %v1906_v9   ;;  %v2011_v9 = vld [vmem:[%s3641_s9] sm:$0x7] }
 0x3ff   : > { %v1625_v11 = vpop.permute.xlu0 %1624  ;;  %v1627_v13 = vpop.permute.xlu1 %1626 }
 0x400   : > { %v1713_v10 = vpop.permute.xlu2 %1712  ;;  %v1630_v14 = vsel %vm594_vm2, %v1625_v11, %v1627_v13 }
 0x401   : > { %1636 = vst [vmem:[#allocation3 + $0x28] sm:$0xf] %v1630_v14 }
 0x402   : > { %2170 = vrot.lane.b32.xlu0 %v2657_v2, %s2659_s12 }
 0x407   : > { %v1656_v17 = vpop.permute.xlu0 %1655 }
 0x408   : > { %v1707_v18 = vpop.permute.xlu2 %1706  ;;  %v1659_v21 = vsel %vm624_vm4, %v3299_v42, %v1656_v17 }
 0x409   : > { %1665 = vst [vmem:[#allocation3 + $0x28] sm:$0xf0] %v1659_v21 }
 0x40a   : > { %2108 = vrot.lane.b32.xlu0 %v2657_v2, %s2658_s21 }
 0x40f   : > { %v1684_v22 = vpop.permute.xlu0 %1683 }
 0x410   : > { %v1739_v25 = vpop.permute.xlu2 %1738  ;;  %v1687_v28 = vsel %vm653_vm5, %v1682_v6, %v1684_v22  ;;  %v1814_v22 = vld [vmem:[#allocation3 + $0x28] sm:$0xff] }
 0x411   : > { %1693 = vst [vmem:[#allocation3 + $0x80] sm:$0xf] %v1687_v28 }
 0x413   : > { %v1680_v31 = vpop.permute.xlu1 %1679 }
 0x414   : > { %v1686_v12 = vsel %vm653_vm5, %v1680_v31, %v1682_v6 }
 0x415   : > { %1692 = vst [vmem:[#allocation3 + $0x78] sm:$0xf] %v1686_v12 }
 0x418   : > { %v1737_v15 = vpop.permute.xlu2 %1736 }
 0x419   : > { %v1743_v16 = vsel %vm712_vm6, %v1737_v15, %v1739_v25 }
 0x41a   : > { %1749 = vst [vmem:[#allocation3 + $0x50] sm:$0xf] %v1743_v16 }
 0x41b   : > { %v1709_v19 = vpop.permute.xlu0 %1708  ;;  %v1678_v20 = vpop.permute.xlu1 %1677 }
 0x41c   : > { %v1714_v23 = vsel %vm683_vm7, %v1707_v18, %v1709_v19  ;;  %v1685_v24 = vsel %vm653_vm5, %v1678_v20, %v1680_v31  ;;  %v1825_v29 = vld [vmem:[#allocation3 + $0x78] sm:$0xf] }
 0x41d   : > { %1720 = vst [vmem:[#allocation3 + $0x40] sm:$0xf0] %v1714_v23  ;;  %2533 = vmatpush.msk.msrb.mxu2 %vm522_vm1, %v1825_v29 }
 0x41e   : > { %1691 = vst [vmem:[#allocation3 + $0x40] sm:$0xf] %v1685_v24  ;;  %2534 = vmatmul.msk.f32.vlgmr.msrb.gmra.mxu2 %vm807_vm9, %v3328_v45 }
 0x420   : > { %v1770_v30 = vpop.permute.xlu2 %1769 }
 0x423   : > { %v1741_v35 = vpop.permute.xlu0 %1740  ;;  %v1711_v36 = vpop.permute.xlu1 %1710 }
 0x424   : > { %v1744_v37 = vsel %vm712_vm6, %v1739_v25, %v1741_v35  ;;  %v1715_v38 = vsel %vm683_vm7, %v1709_v19, %v1711_v36  ;;  %v1716_v39 = vsel %vm683_vm7, %v1711_v36, %v1713_v10  ;;  %v1811_v19 = vld [vmem:[#allocation3 + $0x10] sm:$0xff]  ;;  %vm3655_vm7 = vcmask 908288  }
 0x425   : > { %1750 = vst [vmem:[#allocation3 + $0x30] sm:$0xf] %v1744_v37  ;;  %v1815_v23 = vld [vmem:[#allocation3 + $0x40] sm:$0xff] }
 0x426   : > { %1721 = vst [vmem:[#allocation3 + $0x78] sm:$0xf0] %v1715_v38 }
 0x427   : > { %1722 = vst [vmem:[#allocation3 + $0x80] sm:$0xf0] %v1716_v39 }
 0x428   : > { %v1764_v40 = vpop.permute.xlu2 %1763 }
 0x42b   : > { %v1766_v26 = vpop.permute.xlu0 %1765  ;;  %v1735_v41 = vpop.permute.xlu1 %1734 }
 0x42c   : > { %v1771_v43 = vsel %vm742_vm8, %v1764_v40, %v1766_v26  ;;  %v1742_v44 = vsel %vm712_vm6, %v1735_v41, %v1737_v15  ;;  %v1808_v15 = vld [vmem:[%s3635_s3] sm:$0xff]  ;;  %vm3654_vm6 = vmmov %vm3652_vm0 }
 0x42d   : > { %1777 = vst [vmem:[#allocation3] sm:$0xf0] %v1771_v43  ;;  %v1816_v29 = vld [vmem:[#allocation3 + $0x78] sm:$0xff] }
 0x42e   : > { %1748 = vst [vmem:[#allocation3] sm:$0xf] %v1742_v44  ;;  %v1817_v21 = vld [vmem:[#allocation3 + $0x80] sm:$0xff] }
 0x430   : > { %v1621_v53 = vpop.permute.xlu2 %1620 }
 0x433   : > { %v1796_v46 = vpop.permute.xlu0 %1795  ;;  %v1768_v47 = vpop.permute.xlu1 %1767 }
 0x434   : > { %v1772_v48 = vsel %vm742_vm8, %v1766_v26, %v1768_v47  ;;  %v1773_v49 = vsel %vm742_vm8, %v1768_v47, %v1770_v30  ;;  %vm3660_vm8 = vmmov %vm3655_vm7 }
 0x435   : > { %1778 = vst [vmem:[#allocation3 + $0x50] sm:$0xf0] %v1772_v48  ;;  %v1818_v20 = vld [vmem:[#allocation3] sm:$0xff] }
 0x436   : > { %1779 = vst [vmem:[#allocation3 + $0x30] sm:$0xf0] %v1773_v49 }
 0x438   : > { %v1792_v10 = vpop.permute.xlu2 %1791 }
 0x43b   : > { %v1623_v55 = vpop.permute.xlu0 %1622  ;;  %v1652_v56 = vpop.permute.xlu1 %1651 }
 0x43c   : > { %v1628_v57 = vsel %vm594_vm2, %v1621_v53, %v1623_v55  ;;  %v1629_v61 = vsel %vm594_vm2, %v1623_v55, %v1625_v11  ;;  %v1658_v0 = vsel %vm624_vm4, %v1652_v56, %v3299_v42  ;;  %vm3653_vm2 = vmmov %vm3652_vm0 }
 0x43d   : > { %1634 = vst [vmem:[#allocation3 + $0x48] sm:$0xf] %v1628_v57  ;;  %v1820_v18 = vld [vmem:[#allocation3 + $0x30] sm:$0xff] }
 0x43e   : > { %1635 = vst [vmem:[#allocation3 + $0x60] sm:$0xf] %v1629_v61 }
 0x43f   : > { %1664 = vst [vmem:[#allocation3 + $0x60] sm:$0xf0] %v1658_v0 }
 0x440   : > { %v1593_v17 = vpop.permute.xlu2 %1592 }
 0x443   : > { %v1650_v3 = vpop.permute.xlu0 %1649  ;;  %v1798_v4 = vpop.permute.xlu1 %1797 }
 0x444   : > { %v1657_v7 = vsel %vm624_vm4, %v1650_v3, %v1652_v56  ;;  %v1801_v6 = vsel %vm771_vm10, %v1796_v46, %v1798_v4 }
 0x445   : > { %1663 = vst [vmem:[#allocation3 + $0x48] sm:$0xf0] %v1657_v7 }
 0x446   : > { %1807 = vst [vmem:[#allocation3 + $0xb0] sm:$0xf] %v1801_v6  ;;  %v1813_v35 = vld [vmem:[#allocation3 + $0x60] sm:$0xff] }
 0x448   : > { %v3359_v24 = vpop.permute.xlu2 %2610 }
 0x449   : > { %v2612_v36 = vunpack.i.l.bf16 %v3359_v24 }
 0x44b   : > { %v1794_v11 = vpop.permute.xlu1 %1793  ;;  %v1180_v26 = vsel %vm624_vm4, %v3121_v59, %v2612_v36  ;;  %v1240_v36 = vld [vmem:[%s3638_s6] sm:$0xff] }
 0x44c   : > { %v1799_v42 = vsel %vm771_vm10, %v1792_v10, %v1794_v11  ;;  %v1800_v13 = vsel %vm771_vm10, %v1794_v11, %v1796_v46  ;;  %v1812_v30 = vld [vmem:[#allocation3 + $0x48] sm:$0xff]  ;;  %vm3662_vm10 = vmmov %vm3655_vm7 }
 0x44d   : > { %1805 = vst [vmem:[#allocation3 + $0x88] sm:$0xf] %v1799_v42  ;;  %v1823_v14 = vld [vmem:[#allocation3 + $0xb0] sm:$0xf] }
 0x44e   : > { %1806 = vst [vmem:[#allocation3 + $0x70] sm:$0xf] %v1800_v13  ;;  %2541 = vmatpush.msk.msra.mxu2 %vm522_vm1, %v1823_v14  ;;  %v2015_v14 = vperm.slane %v2011_v9, 2 }
 0x450   : > { %1976 = vmatpush.msra.mxu2 %v1820_v18  ;;  %v1126_v41 = vpop.permute.xlu2 %1125 }
 0x451   : > { %v1129_v46 = vsel %vm565_vm3, %v3116_v54, %v1126_v41 }
 0x452   : > { %1977 = vmatpush.msra.mxu2 %v1817_v21 }
 0x453   : > { %v1595_v25 = vpop.permute.xlu1 %1594 }
 0x454   : > { %1978 = vmatpush.msra.mxu2 %v1814_v22  ;;  %v1600_v28 = vsel %vm565_vm3, %v1593_v17, %v1595_v25  ;;  %v1601_v31 = vsel %vm565_vm3, %v1595_v25, %v3305_v5  ;;  %v1821_v12 = vld [vmem:[#allocation3 + $0x88] sm:$0xf]  ;;  %v1819_v5 = vld [vmem:[#allocation3 + $0x50] sm:$0xff]  ;;  %v2014_v25 = vperm.slane %v2011_v9, 1 }
 0x455   : > { %1606 = vst [vmem:[#allocation3 + $0xa8] sm:$0xf0] %v1600_v28  ;;  %2537 = vmatpush.msk.msra.mxu3 %vm522_vm1, %v1821_v12  ;;  %v1822_v16 = vld [vmem:[#allocation3 + $0x70] sm:$0xf] }
 0x456   : > { %1607 = vst [vmem:[#allocation3 + $0xd0] sm:$0xf0] %v1601_v31  ;;  %2539 = vmatpush.msk.msra.mxu1 %vm522_vm1, %v1822_v16  ;;  %1979 = vmatpush.msra.mxu2 %v1811_v19 }
 0x457   : > { %2542 = vmatmul.msk.f32.vlgmr.msra.gmra.mxu2 %vm3652_vm0, %v1808_v15  ;;  %1936 = vmatpush.msra.mxu3 %v1818_v20  ;;  %v2013_v20 = vperm.slane %v2011_v9, 0  ;;  %vm1381_vm0 = vcmask 1048448  }
 0x458   : > { %1956 = vmatpush.msra.mxu1 %v1819_v5 }
 0x459   : > { %1937 = vmatpush.msra.mxu3 %v1815_v23 }
 0x45a   : > { %1957 = vmatpush.msra.mxu1 %v1816_v29 }
 0x45b   : > { %1938 = vmatpush.msra.mxu3 %v1812_v30  ;;  %v3361_v2 = vpop.permute.xlu1 %2605  ;;  %v2639_v30 = vld [vmem:[#allocation4] sm:$0xff] }
 0x45c   : > { %1958 = vmatpush.msra.mxu1 %v1813_v35  ;;  %v2607_v37 = vunpack.i.l.bf16 %v3361_v2  ;;  %v1809_v38 = vld [vmem:[#allocation3 + $0xa8] sm:$0xff] }
 0x45d   : > { %1939 = vmatpush.msra.mxu3 %v1809_v38  ;;  %v1810_v39 = vld [vmem:[#allocation3 + $0xd0] sm:$0xff]  ;;  %v3452_v35 = vld [vmem:[%s3640_s8] sm:$0xff] }
 0x45e   : > { %v1205_v40 = vsel %vm653_vm5, %v3119_v58, %v2607_v37  ;;  %1959 = vmatpush.msra.mxu1 %v1810_v39  ;;  %2538 = vmatmul.msk.f32.vlgmr.msra.gmra.mxu3 %vm3653_vm2, %v1808_v15  ;;  %v1824_v58 = vld [vmem:[#allocation3 + $0x40] sm:$0xf]  ;;  %vm1412_vm2 = vcmask 818176  }
 0x45f   : > { %2540 = vmatmul.msk.f32.vlgmr.msra.gmra.mxu1 %vm3654_vm6, %v1808_v15  ;;  %1297 = vmatpush.msrb.mxu0 %v1205_v40 }
 0x461   : > { %1298 = vmatpush.msrb.mxu0 %v1180_v26 }
 0x463   : > { %v1151_v43 = vpop.permute.xlu1 %1150 }
 0x464   : > { %v1155_v44 = vsel %vm3655_vm7, %v3114_v52, %v1151_v43  ;;  %v1826_v52 = vld [vmem:[#allocation3 + $0x80] sm:$0xf] }
 0x465   : > { %1299 = vmatpush.msrb.mxu0 %v1155_v44 }
 0x467   : > { %1300 = vmatpush.msrb.mxu0 %v1129_v46 }
 0x469   : > { %1301 = vmatpush.msrb.mxu0 %v3061_v50 }
 0x46b   : > { %1302 = vmatpush.msrb.mxu0 %v3154_v32  ;;  %v2146_v26 = vpop.permute.xlu1 %2145 }
 0x46c   : > { %v1910_v54 = vpop.permute.xlu0 %1909 }
 0x46d   : > { %1303 = vmatpush.msrb.mxu0 %v3206_v51 }
 0x46f   : > { %1304 = vmatpush.msrb.mxu0 %v3142_v33 }
 0x471   : > { %1305 = vmatpush.msrb.mxu0 %v3178_v27 }
 0x472   : > { %2525 = vmatmul.msk.f32.vlgmr.msrb.gmra.mxu0 %vm1246_vm11, %v3159_v34 }
 0x473   : > { %2531 = vmatpush.msk.msra.mxu0 %vm522_vm1, %v1824_v58  ;;  %v2608_v58 = vunpack.i.h.bf16 %v3361_v2 }
 0x474   : > { %v2171_v38 = vpop.permute.xlu0 %2170 }
 0x475   : > { %2535 = vmatpush.msk.msrb.mxu0 %vm522_vm1, %v1826_v52  ;;  %vm3656_vm1 = vcmask 261120  }
 0x47a   : > { %2532 = vmatmul.msk.f32.vlgmr.msra.gmra.mxu0 %vm807_vm9, %v3328_v45 }
 0x47c   : > { %v2109_v40 = vpop.permute.xlu0 %2108 }
 0x482   : > { %2536 = vmatmul.msk.f32.vlgmr.msrb.gmra.mxu0 %vm807_vm9, %v3328_v45  ;;  %vm3661_vm9 = vmmov %vm3655_vm7 }
 0x4a1   : > { %v3388_v50 = vpop.f32.mrf.mxu2 }
 0x4da   : > { %v1981_v59 = vpop.f32.mrf.mxu2 }
 0x4db   : > { %v1982_v33 = vadd.f32 %v1981_v59, %v1910_v54 }
 0x4dc   : > { %v1961_v32 = vpop.f32.mrf.mxu1 }
 0x4dd   : > { %v1989_v27 = vmul.f32 0.044715, %v1982_v33  ;;  %v1962_v51 = vadd.f32 %v1961_v32, %v1910_v54  ;;  %v1986_v42 = vmul.f32 0.5, %v1982_v33 }
 0x4df   : > { %v1992_v47 = vmul.f32 %v1989_v27, %v1982_v33  ;;  %v1988_v48 = vmul.f32 0.044715, %v1962_v51  ;;  %v1985_v21 = vmul.f32 0.5, %v1962_v51  ;;  %v2613_v27 = vunpack.i.h.bf16 %v3359_v24 }
 0x4e1   : > { %v1995_v34 = vmul.f32 %v1992_v47, %v1982_v33  ;;  %v1991_v49 = vmul.f32 %v1988_v48, %v1962_v51  ;;  %v1941_v53 = vpop.f32.mrf.mxu3 }
 0x4e2   : > { %v1942_v55 = vadd.f32 %v1941_v53, %v1910_v54 }
 0x4e3   : > { %v1998_v56 = vadd.f32 %v1995_v34, %v1982_v33  ;;  %v1994_v57 = vmul.f32 %v1991_v49, %v1962_v51 }
 0x4e4   : > { %v1987_v61 = vmul.f32 0.044715, %v1942_v55  ;;  %v1984_v16 = vmul.f32 0.5, %v1942_v55 }
 0x4e5   : > { %v2001_v0 = vmul.f32 0.7978846, %v1998_v56  ;;  %v1997_v3 = vadd.f32 %v1994_v57, %v1962_v51 }
 0x4e6   : > { %v1990_v45 = vmul.f32 %v1987_v61, %v1942_v55 }
 0x4e7   : > { %2621 = vtanh.f32 %v2001_v0  ;;  %v2000_v4 = vmul.f32 0.7978846, %v1997_v3 }
 0x4e8   : > { %v1993_v7 = vmul.f32 %v1990_v45, %v1942_v55 }
 0x4e9   : > { %2623 = vtanh.f32 %v2000_v4 }
 0x4ea   : > { %v1996_v6 = vadd.f32 %v1993_v7, %v1942_v55 }
 0x4ec   : > { %v1999_v10 = vmul.f32 0.7978846, %v1996_v6 }
 0x4ed   : > { %v2622_v11 = vpop.eup %2621 }
 0x4ee   : > { %v2007_v13 = vadd.f32 1.0, %v2622_v11  ;;  %2625 = vtanh.f32 %v1999_v10 }
 0x4ef   : > { %v2624_v17 = vpop.eup %2623 }
 0x4f0   : > { %v2010_v18 = vmul.f32 %v2007_v13, %v1986_v42  ;;  %v2006_v22 = vadd.f32 1.0, %v2624_v17 }
 0x4f2   : > { %v2021_v28 = vmul.f32 %v2015_v14, %v2010_v18  ;;  %v2009_v31 = vmul.f32 %v2006_v22, %v1985_v21 }
 0x4f4   : > { %v2626_v12 = vpop.eup %2625  ;;  %2024 = vst.msk [vmem:[#allocation4 + $0x18] sm:$0xff] %vm3656_vm1, %v2021_v28  ;;  %v3394_v15 = vmul.f32 %v2014_v25, %v2009_v31 }
 0x4f5   : > { %v2005_v19 = vadd.f32 1.0, %v2626_v12 }
 0x4f6   : > { %2216 = vrot.lane.b32.xlu0 %v3394_v15, %s2651_s18  ;;  %2191 = vrot.lane.b32.xlu2 %v3394_v15, %s2650_s17  ;;  %2129 = vst [vmem:[#allocation3 + $0x70] sm:$0xff] %v3394_v15 }
 0x4f7   : > { %v2008_v5 = vmul.f32 %v2005_v19, %v1984_v16  ;;  %2166 = vrot.lane.b32.xlu1 %v3394_v15, %s2659_s12 }
 0x4f9   : > { %v3403_v23 = vmul.f32 %v2013_v20, %v2008_v5 }
 0x4fb   : > { %v3405_v29 = vld [vmem:[#allocation4 + $0x18] sm:$0xff]  ;;  %2128 = vst [vmem:[#allocation3 + $0x88] sm:$0xff] %v3403_v23 }
 0x4fc   : > { %2130 = vst [vmem:[#allocation3 + $0xb0] sm:$0xff] %v3405_v29 }
 0x4fe   : > { %2141 = vrot.lane.b32.xlu0 %v3394_v15, %s2648_s15  ;;  %2112 = vrot.lane.b32.xlu2 %v3394_v15, %s2658_s21 }
 0x4ff   : > { %2218 = vrot.lane.b32.xlu1 %v3405_v29, %s2651_s18 }
 0x506   : > { %2193 = vrot.lane.b32.xlu0 %v3405_v29, %s2650_s17  ;;  %2087 = vrot.lane.b32.xlu2 %v3394_v15, %s3657_s25 }
 0x507   : > { %2143 = vrot.lane.b32.xlu1 %v3405_v29, %s2648_s15 }
 0x50e   : > { %2062 = vrot.lane.b32.xlu2 %v3394_v15, %s3658_s23  ;;  %2189 = vrot.lane.b32.xlu0 %v3403_v23, %s2650_s17 }
 0x50f   : > { %2110 = vrot.lane.b32.xlu1 %v3403_v23, %s2658_s21 }
 0x516   : > { %2037 = vrot.lane.b32.xlu2 %v3394_v15, %s3659_s11  ;;  %2164 = vrot.lane.b32.xlu0 %v3403_v23, %s2659_s12 }
 0x517   : > { %2085 = vrot.lane.b32.xlu1 %v3403_v23, %s3657_s25 }
 0x51e   : > { %2168 = vrot.lane.b32.xlu2 %v3405_v29, %s2659_s12  ;;  %2139 = vrot.lane.b32.xlu0 %v3403_v23, %s2648_s15  ;;  %s2669_s15 = smov 104   ;;  %s2670_s12 = smov 112  }
 0x51f   : > { %2060 = vrot.lane.b32.xlu1 %v3403_v23, %s3658_s23 }
 0x526   : > { %2214 = vrot.lane.b32.xlu2 %v3403_v23, %s2651_s18  ;;  %2058 = vrot.lane.b32.xlu0 %v2639_v30, %s3658_s23  ;;  %s2671_s18 = smov 106  }
 0x527   : > { %2035 = vrot.lane.b32.xlu1 %v3403_v23, %s3659_s11 }
 0x52e   : > { %2083 = vrot.lane.b32.xlu2 %v2639_v30, %s3657_s25  ;;  %2089 = vrot.lane.b32.xlu0 %v3405_v29, %s3657_s25  ;;  %s2666_s25 = smov 122  }
 0x52f   : > { %2114 = vrot.lane.b32.xlu1 %v3405_v29, %s2658_s21  ;;  %s2673_s21 = smov 102  }
 0x536   : > { %2033 = vrot.lane.b32.xlu2 %v2639_v30, %s3659_s11  ;;  %804 = vperm.xlu0 %2603, %v3452_v35  }
 0x537   : > { %2064 = vrot.lane.b32.xlu1 %v3405_v29, %s3658_s23  ;;  %s2667_s23 = smov 114  }
 0x53e   : > { %2039 = vrot.lane.b32.xlu2 %v3405_v29, %s3659_s11  ;;  %s2668_s11 = smov 116  }
 0x53f   : > { %1243 = vperm.xlu1 %2614, %v1240_v36  }
 0x547   : > { %2262 = vperm.xlu1 %2614, %v1240_v36  }
 0x550   : > { %v2192_v37 = vpop.permute.xlu2 %2191 }
 0x558   : > { %v3463_v39 = vpop.permute.xlu2 %2112 }
 0x560   : > { %v3465_v41 = vpop.permute.xlu2 %2087 }
 0x568   : > { %v2217_v43 = vpop.permute.xlu0 %2216  ;;  %v3467_v44 = vpop.permute.xlu2 %2062 }
 0x569   : > { %v2167_v46 = vpop.permute.xlu1 %2166 }
 0x570   : > { %v2142_v52 = vpop.permute.xlu0 %2141  ;;  %v3470_v54 = vpop.permute.xlu2 %2037 }
 0x571   : > { %v2219_v59 = vpop.permute.xlu1 %2218 }
 0x572   : > { %v2223_v33 = vsel %vm653_vm5, %v2217_v43, %v2219_v59  ;;  %v2224_v32 = vsel %vm653_vm5, %v2219_v59, %v2608_v58 }
 0x573   : > { %2295 = vmatpush.msrb.mxu3 %v2223_v33  ;;  %2315 = vmatpush.msrb.mxu1 %v2224_v32 }
 0x578   : > { %v2194_v51 = vpop.permute.xlu0 %2193  ;;  %v2169_v47 = vpop.permute.xlu2 %2168 }
 0x579   : > { %v2198_v48 = vsel %vm624_vm4, %v2192_v37, %v2194_v51  ;;  %v2199_v34 = vsel %vm624_vm4, %v2194_v51, %v2613_v27  ;;  %v2173_v2 = vsel %vm3660_vm8, %v2167_v46, %v2169_v47  ;;  %v2144_v49 = vpop.permute.xlu1 %2143  ;;  %v2174_v53 = vsel %vm3661_vm9, %v2169_v47, %v2171_v38 }
 0x57a   : > { %2296 = vmatpush.msrb.mxu3 %v2198_v48  ;;  %2316 = vmatpush.msrb.mxu1 %v2199_v34  ;;  %v2148_v55 = vsel %vm565_vm3, %v2142_v52, %v2144_v49  ;;  %v2149_v56 = vsel %vm565_vm3, %v2144_v49, %v2146_v26 }
 0x57c   : > { %2297 = vmatpush.msrb.mxu3 %v2173_v2  ;;  %2317 = vmatpush.msrb.mxu1 %v2174_v53 }
 0x57e   : > { %2298 = vmatpush.msrb.mxu3 %v2148_v55  ;;  %2318 = vmatpush.msrb.mxu1 %v2149_v56 }
 0x580   : > { %v2215_v24 = vpop.permute.xlu2 %2214  ;;  %v2190_v57 = vpop.permute.xlu0 %2189  ;;  %2299 = vmatpush.msrb.mxu3 %v3394_v15  ;;  %2319 = vmatpush.msrb.mxu1 %v3405_v29  ;;  %v2231_v15 = vld [vmem:[%s3637_s5] sm:$0xff] }
 0x581   : > { %v2222_v61 = vsel %vm653_vm5, %v2215_v24, %v2217_v43  ;;  %v2197_v0 = vsel %vm624_vm4, %v2190_v57, %v2192_v37  ;;  %v2111_v3 = vpop.permute.xlu1 %2110  ;;  %vm1346_vm4 = vcmask 261248   ;;  %vm1351_vm5 = vcmask 392448  }
 0x582   : > { %v2116_v45 = vsel %vm1095_vm14, %v2109_v40, %v2111_v3  ;;  %v2117_v4 = vsel %vm1095_vm14, %v2111_v3, %v3463_v39  ;;  %2275 = vmatpush.msra.mxu0 %v2222_v61 }
 0x583   : > { %2300 = vmatpush.msrb.mxu3 %v2117_v4  ;;  %2122 = vst [vmem:[#allocation3] sm:$0xff] %v2116_v45 }
 0x584   : > { %2276 = vmatpush.msra.mxu0 %v2197_v0  ;;  %2123 = vst [vmem:[#allocation3 + $0x50] sm:$0xff] %v2117_v4 }
 0x588   : > { %v2084_v7 = vpop.permute.xlu2 %2083  ;;  %v2165_v6 = vpop.permute.xlu0 %2164 }
 0x589   : > { %v2172_v9 = vsel %vm3662_vm10, %v2165_v6, %v2167_v46  ;;  %v2086_v10 = vpop.permute.xlu1 %2085 }
 0x58a   : > { %v2091_v11 = vsel %vm1069_vm12, %v2084_v7, %v2086_v10  ;;  %v2092_v42 = vsel %vm1069_vm12, %v2086_v10, %v3465_v41  ;;  %2277 = vmatpush.msra.mxu0 %v2172_v9 }
 0x58b   : > { %2097 = vst [vmem:[#allocation3 + $0x40] sm:$0xff] %v2091_v11  ;;  %2301 = vmatpush.msrb.mxu3 %v2092_v42 }
 0x58c   : > { %2098 = vst [vmem:[#allocation3 + $0x78] sm:$0xff] %v2092_v42 }
 0x590   : > { %v2034_v13 = vpop.permute.xlu2 %2033  ;;  %v2140_v14 = vpop.permute.xlu0 %2139 }
 0x591   : > { %v2147_v17 = vsel %vm565_vm3, %v2140_v14, %v2142_v52  ;;  %v2061_v18 = vpop.permute.xlu1 %2060  ;;  %vm1340_vm3 = vcmask 130048  }
 0x592   : > { %v2067_v21 = vsel %vm1043_vm13, %v2061_v18, %v3467_v44  ;;  %2278 = vmatpush.msra.mxu0 %v2147_v17 }
 0x593   : > { %2073 = vst [vmem:[#allocation3 + $0x60] sm:$0xff] %v2067_v21  ;;  %2302 = vmatpush.msrb.mxu3 %v2067_v21 }
 0x594   : > { %2279 = vmatpush.msra.mxu0 %v3403_v23 }
 0x596   : > { %2280 = vmatpush.msra.mxu0 %v2116_v45 }
 0x598   : > { %v2040_v22 = vpop.permute.xlu2 %2039  ;;  %v2059_v25 = vpop.permute.xlu0 %2058  ;;  %2281 = vmatpush.msra.mxu0 %v2091_v11 }
 0x599   : > { %v2043_v28 = vsel %vm1017_vm15, %v3470_v54, %v2040_v22  ;;  %v2066_v31 = vsel %vm1043_vm13, %v2059_v25, %v2061_v18  ;;  %v2036_v12 = vpop.permute.xlu1 %2035 }
 0x59a   : > { %2049 = vst [vmem:[#allocation3 + $0x10] sm:$0xff] %v2043_v28  ;;  %v2041_v16 = vsel %vm1017_vm15, %v2034_v13, %v2036_v12  ;;  %v2042_v19 = vsel %vm1017_vm15, %v2036_v12, %v3470_v54  ;;  %2282 = vmatpush.msra.mxu0 %v2066_v31  ;;  %vm1371_vm15 = vcmask 917248  }
 0x59b   : > { %2072 = vst [vmem:[#allocation3 + $0x48] sm:$0xff] %v2066_v31  ;;  %2303 = vmatpush.msrb.mxu3 %v2042_v19 }
 0x59c   : > { %2047 = vst [vmem:[#allocation3 + $0xa8] sm:$0xff] %v2041_v16  ;;  %2544 = vmatmul.msk.f32.vlgmr.msrb.gmra.mxu3 %vm1246_vm11, %v2231_v15  ;;  %2283 = vmatpush.msra.mxu0 %v2041_v16 }
 0x59d   : > { %2048 = vst [vmem:[#allocation3 + $0xd0] sm:$0xff] %v2042_v19  ;;  %2543 = vmatmul.msk.f32.vlgmr.msra.gmra.mxu0 %vm1246_vm11, %v2231_v15 }
 0x5a0   : > { %v2090_v20 = vpop.permute.xlu0 %2089 }
 0x5a1   : > { %v2093_v5 = vsel %vm1069_vm12, %v3465_v41, %v2090_v20  ;;  %v2115_v23 = vpop.permute.xlu1 %2114  ;;  %vm1378_vm12 = vcmask 932864  }
 0x5a2   : > { %2099 = vst [vmem:[#allocation3 + $0x80] sm:$0xff] %v2093_v5  ;;  %v2118_v29 = vsel %vm1095_vm14, %v3463_v39, %v2115_v23  ;;  %vm1366_vm14 = vcmask 786048  }
 0x5a3   : > { %2124 = vst [vmem:[#allocation3 + $0x30] sm:$0xff] %v2118_v29  ;;  %2320 = vmatpush.msrb.mxu1 %v2118_v29 }
 0x5a5   : > { %2321 = vmatpush.msrb.mxu1 %v2093_v5 }
 0x5a8   : > { %v805_v27 = vpop.permute.xlu0 %804 }
 0x5a9   : > { %v2065_v30 = vpop.permute.xlu1 %2064  ;;  %v858_v0 = vadd.f32 %v3225_v60, %v805_v27  ;;  %v878_v7 = vadd.f32 %v3229_v63, %v805_v27 }
 0x5aa   : > { %v2068_v36 = vsel %vm1043_vm13, %v3467_v44, %v2065_v30  ;;  %v1307_v44 = vpop.f32.mrf.mxu0  ;;  %vm1361_vm13 = vcmask 654848  }
 0x5ab   : > { %2074 = vst [vmem:[#allocation3 + $0x28] sm:$0xff] %v2068_v36  ;;  %2322 = vmatpush.msrb.mxu1 %v2068_v36 }
 0x5ad   : > { %2323 = vmatpush.msrb.mxu1 %v2043_v28 }
 0x5ae   : > { %2545 = vmatmul.msk.f32.vlgmr.msrb.gmra.mxu1 %vm1246_vm11, %v2231_v15  ;;  %vm1356_vm11 = vcmask 523648  }
 0x5b1   : > { %v1244_v37 = vpop.permute.xlu1 %1243 }
 0x5b2   : > { %v1268_v38 = vadd.f32 %v3231_v8, %v1244_v37  ;;  %v1288_v40 = vadd.f32 %v3227_v62, %v1244_v37  ;;  %v1308_v33 = vadd.f32 %v1307_v44, %v1244_v37  ;;  %v838_v62 = vadd.f32 %v3044_v1, %v805_v27  ;;  %v1863_v9 = vpop.f32.mrf.mxu0 }
 0x5b4   : > { %v1313_v26 = vmul.f32 0.044715, %v1268_v38  ;;  %v1314_v39 = vmul.f32 0.044715, %v1288_v40  ;;  %v1315_v47 = vmul.f32 0.044715, %v1308_v33 }
 0x5b5   : > { %v1310_v8 = vmul.f32 0.5, %v1268_v38  ;;  %v1311_v1 = vmul.f32 0.5, %v1288_v40  ;;  %v1312_v4 = vmul.f32 0.5, %v1308_v33 }
 0x5b6   : > { %v1316_v41 = vmul.f32 %v1313_v26, %v1268_v38  ;;  %v1317_v43 = vmul.f32 %v1314_v39, %v1288_v40  ;;  %v1318_v2 = vmul.f32 %v1315_v47, %v1308_v33 }
 0x5b8   : > { %v1319_v46 = vmul.f32 %v1316_v41, %v1268_v38  ;;  %v1320_v52 = vmul.f32 %v1317_v43, %v1288_v40  ;;  %v1321_v53 = vmul.f32 %v1318_v2, %v1308_v33 }
 0x5b9   : > { %v2263_v11 = vpop.permute.xlu1 %2262 }
 0x5ba   : > { %v1322_v58 = vadd.f32 %v1319_v46, %v1268_v38  ;;  %v1323_v59 = vadd.f32 %v1320_v52, %v1288_v40  ;;  %v1324_v56 = vadd.f32 %v1321_v53, %v1308_v33  ;;  %v1903_v63 = vpop.f32.mrf.mxu0 }
 0x5bc   : > { %v1325_v54 = vmul.f32 0.7978846, %v1322_v58  ;;  %v1326_v51 = vmul.f32 0.7978846, %v1323_v59  ;;  %v1327_v57 = vmul.f32 0.7978846, %v1324_v56 }
 0x5be   : > { %2627 = vtanh.f32 %v1325_v54 }
 0x5bf   : > { %2629 = vtanh.f32 %v1326_v51 }
 0x5c0   : > { %2631 = vtanh.f32 %v1327_v57 }
 0x5c4   : > { %v2628_v32 = vpop.eup %2627 }
 0x5c5   : > { %v1331_v48 = vadd.f32 1.0, %v2628_v32  ;;  %v2630_v55 = vpop.eup %2629 }
 0x5c6   : > { %v1332_v24 = vadd.f32 1.0, %v2630_v55 }
 0x5c7   : > { %v1334_v34 = vmul.f32 %v1331_v48, %v1310_v8 }
 0x5c8   : > { %v1335_v61 = vmul.f32 %v1332_v24, %v1311_v1 }
 0x5c9   : > { %v1337_v49 = vadd.f32 %v1334_v34, %v838_v62 }
 0x5ca   : > { %v1338_v3 = vadd.f32 %v1335_v61, %v858_v0 }
 0x5cb   : > { %1363 = vrot.lane.b32.xlu1 %v1337_v49, %s2663_s29  ;;  %1348 = vrot.lane.b32.xlu0 %v1337_v49, %s2664_s14  ;;  %1341 = vst.msk [vmem:[%s3520_s28] sm:$0xff] %vm1340_vm3, %v1337_v49 }
 0x5cc   : > { %1343 = vrot.lane.b32.xlu2 %v1337_v49, %s2649_s16 }
 0x5d3   : > { %1831 = vperm.xlu1 %2614, %v3452_v35   ;;  %1358 = vrot.lane.b32.xlu0 %v1337_v49, %s2665_s30  ;;  %v2632_v35 = vpop.eup %2631 }
 0x5d4   : > { %1353 = vrot.lane.b32.xlu2 %v1337_v49, %s2666_s25  ;;  %v1333_v45 = vadd.f32 1.0, %v2632_v35 }
 0x5d6   : > { %v1336_v60 = vmul.f32 %v1333_v45, %v1312_v4 }
 0x5d8   : > { %v1339_v6 = vadd.f32 %v1336_v60, %v878_v7 }
 0x5db   : > { %1387 = vrot.lane.b32.xlu1 %v1338_v3, %s2650_s17  ;;  %1374 = vrot.lane.b32.xlu0 %v1337_v49, %s2667_s23 }
 0x5dc   : > { %1368 = vrot.lane.b32.xlu2 %v1337_v49, %s2668_s11 }
 0x5e3   : > { %1399 = vrot.lane.b32.xlu1 %v1338_v3, %s2669_s15  ;;  %1383 = vrot.lane.b32.xlu0 %v1338_v3, %s2670_s12 }
 0x5e4   : > { %1376 = vrot.lane.b32.xlu2 %v1338_v3, %s2667_s23 }
 0x5eb   : > { %1395 = vrot.lane.b32.xlu0 %v1338_v3, %s2671_s18  ;;  %1410 = vrot.lane.b32.xlu1 %v1339_v6, %s2672_s22 }
 0x5ec   : > { %1391 = vrot.lane.b32.xlu2 %v1338_v3, %s2652_s19 }
 0x5f3   : > { %1408 = vrot.lane.b32.xlu0 %v1338_v3, %s2672_s22 }
 0x5f4   : > { %1403 = vrot.lane.b32.xlu2 %v1338_v3, %s2673_s21 }
 0x5fc   : > { %1416 = vrot.lane.b32.xlu2 %v1339_v6, %s2674_s24 }
 0x61a   : > { %v2285_v10 = vpop.f32.mrf.mxu0 }
 0x61b   : > { %v2286_v42 = vadd.f32 %v2285_v10, %v2263_v11 }
 0x61d   : > { %v2331_v13 = vmul.f32 0.044715, %v2286_v42  ;;  %v2328_v52 = vmul.f32 0.5, %v2286_v42 }
 0x61f   : > { %v2305_v17 = vpop.f32.mrf.mxu3  ;;  %v2334_v18 = vmul.f32 %v2331_v13, %v2286_v42 }
 0x620   : > { %v2306_v21 = vadd.f32 %v2305_v17, %v2263_v11 }
 0x621   : > { %v2337_v25 = vmul.f32 %v2334_v18, %v2286_v42 }
 0x622   : > { %v2332_v31 = vmul.f32 0.044715, %v2306_v21  ;;  %v2329_v2 = vmul.f32 0.5, %v2306_v21 }
 0x623   : > { %v2340_v16 = vadd.f32 %v2337_v25, %v2286_v42 }
 0x624   : > { %v2335_v19 = vmul.f32 %v2332_v31, %v2306_v21 }
 0x625   : > { %v2343_v23 = vmul.f32 0.7978846, %v2340_v16 }
 0x626   : > { %v1344_v14 = vpop.permute.xlu2 %1343  ;;  %v2338_v29 = vmul.f32 %v2335_v19, %v2306_v21 }
 0x627   : > { %1347 = vst.msk [vmem:[%s3520_s28] sm:$0xff] %vm1346_vm4, %v1344_v14  ;;  %2633 = vtanh.f32 %v2343_v23 }
 0x628   : > { %v2341_v37 = vadd.f32 %v2338_v29, %v2306_v21 }
 0x62a   : > { %v2344_v26 = vmul.f32 0.7978846, %v2341_v37 }
 0x62b   : > { %v2325_v22 = vpop.f32.mrf.mxu1 }
 0x62c   : > { %v2326_v28 = vadd.f32 %v2325_v22, %v2263_v11 }
 0x62d   : > { %v2634_v39 = vpop.eup %2633 }
 0x62e   : > { %v2333_v12 = vmul.f32 0.044715, %v2326_v28  ;;  %v1354_v30 = vpop.permute.xlu2 %1353  ;;  %v2349_v46 = vadd.f32 1.0, %v2634_v39  ;;  %v2330_v54 = vmul.f32 0.5, %v2326_v28 }
 0x630   : > { %v2336_v15 = vmul.f32 %v2333_v12, %v2326_v28  ;;  %v2352_v27 = vmul.f32 %v2349_v46, %v2328_v52 }
 0x632   : > { %v2339_v20 = vmul.f32 %v2336_v15, %v2326_v28 }
 0x634   : > { %v2342_v5 = vadd.f32 %v2339_v20, %v2326_v28 }
 0x636   : > { %v2345_v36 = vmul.f32 0.7978846, %v2342_v5  ;;  %v1369_v43 = vpop.permute.xlu2 %1368 }
 0x638   : > { %2635 = vtanh.f32 %v2345_v36 }
 0x639   : > { %2637 = vtanh.f32 %v2344_v26 }
 0x63d   : > { %v1349_v38 = vpop.permute.xlu0 %1348  ;;  %v1364_v40 = vpop.permute.xlu1 %1363 }
 0x63e   : > { %1352 = vst.msk [vmem:[%s3520_s28] sm:$0xff] %vm1351_vm5, %v1349_v38  ;;  %v2636_v41 = vpop.eup %2635  ;;  %v1377_v62 = vpop.permute.xlu2 %1376 }
 0x63f   : > { %1357 = vst.msk [vmem:[%s3520_s28] sm:$0xff] %vm1356_vm11, %v1354_v30  ;;  %v2351_v58 = vadd.f32 1.0, %v2636_v41  ;;  %v2638_v47 = vpop.eup %2637 }
 0x640   : > { %v2350_v34 = vadd.f32 1.0, %v2638_v47 }
 0x641   : > { %v2354_v51 = vmul.f32 %v2351_v58, %v2330_v54 }
 0x642   : > { %v2353_v55 = vmul.f32 %v2350_v34, %v2329_v2 }
 0x645   : > { %v1359_v44 = vpop.permute.xlu0 %1358  ;;  %v1832_v59 = vpop.permute.xlu1 %1831 }
 0x646   : > { %1362 = vst.msk [vmem:[%s3520_s28] sm:$0xff] %vm1361_vm13, %v1359_v44  ;;  %v1864_v33 = vadd.f32 %v1863_v9, %v1832_v59  ;;  %v1904_v32 = vadd.f32 %v1903_v63, %v1832_v59  ;;  %v1884_v49 = vadd.f32 %v3388_v50, %v1832_v59  ;;  %v1392_v57 = vpop.permute.xlu2 %1391 }
 0x647   : > { %1367 = vst.msk [vmem:[%s3520_s28] sm:$0xff] %vm1366_vm14, %v1364_v40 }
 0x648   : > { %v2355_v8 = vadd.f32 %v2352_v27, %v1864_v33  ;;  %v2357_v48 = vadd.f32 %v2354_v51, %v1904_v32  ;;  %1372 = vst.msk [vmem:[%s3520_s28] sm:$0xff] %vm1371_vm15, %v1369_v43  ;;  %v2356_v24 = vadd.f32 %v2353_v55, %v1884_v49 }
 0x64a   : > { %2546 = vst.msk [vmem:[%s3520_s28 + $0x10] sm:$0xff] %vm1340_vm3, %v2355_v8  ;;  %2369 = vrot.lane.b32.xlu2 %v2355_v8, %s2666_s25  ;;  %2365 = vrot.lane.b32.xlu1 %v2355_v8, %s2664_s14 }
 0x64b   : > { %2420 = vrot.lane.b32.xlu0 %v2357_v48, %s2672_s22 }
 0x64d   : > { %v1375_v53 = vpop.permute.xlu0 %1374  ;;  %v1388_v1 = vpop.permute.xlu1 %1387 }
 0x64e   : > { %v1379_v56 = vsel %vm1378_vm12, %v1375_v53, %v1377_v62  ;;  %v1404_v0 = vpop.permute.xlu2 %1403 }
 0x64f   : > { %1382 = vst.msk [vmem:[%s3520_s28] sm:$0xff] %vm1381_vm0, %v1379_v56 }
 0x652   : > { %2393 = vrot.lane.b32.xlu2 %v2356_v24, %s2670_s12  ;;  %2373 = vrot.lane.b32.xlu1 %v2355_v8, %s2665_s30 }
 0x653   : > { %2361 = vrot.lane.b32.xlu0 %v2355_v8, %s2649_s16 }
 0x655   : > { %v1384_v50 = vpop.permute.xlu0 %1383  ;;  %v1400_v61 = vpop.permute.xlu1 %1399 }
 0x656   : > { %1386 = vst.msk [vmem:[%s3520_s28 + $0x8] sm:$0xff] %vm1340_vm3, %v1384_v50  ;;  %v1417_v60 = vpop.permute.xlu2 %1416 }
 0x657   : > { %1390 = vst.msk [vmem:[%s3520_s28 + $0x8] sm:$0xff] %vm1346_vm4, %v1388_v1 }
 0x658   : > { %1394 = vst.msk [vmem:[%s3520_s28 + $0x8] sm:$0xff] %vm1351_vm5, %v1392_v57 }
 0x65a   : > { %2409 = vrot.lane.b32.xlu2 %v2356_v24, %s2669_s15  ;;  %2381 = vrot.lane.b32.xlu1 %v2355_v8, %s2668_s11 }
 0x65b   : > { %2377 = vrot.lane.b32.xlu0 %v2355_v8, %s2663_s29 }
 0x65d   : > { %v1396_v3 = vpop.permute.xlu0 %1395  ;;  %v1411_v35 = vpop.permute.xlu1 %1410 }
 0x65e   : > { %1398 = vst.msk [vmem:[%s3520_s28 + $0x8] sm:$0xff] %vm1356_vm11, %v1396_v3 }
 0x65f   : > { %1402 = vst.msk [vmem:[%s3520_s28 + $0x8] sm:$0xff] %vm1361_vm13, %v1400_v61 }
 0x660   : > { %1406 = vst.msk [vmem:[%s3520_s28 + $0x8] sm:$0xff] %vm1366_vm14, %v1404_v0 }
 0x662   : > { %2418 = vrot.lane.b32.xlu2 %v2356_v24, %s2672_s22  ;;  %2401 = vrot.lane.b32.xlu1 %v2356_v24, %s2652_s19 }
 0x663   : > { %2397 = vrot.lane.b32.xlu0 %v2356_v24, %s2650_s17 }
 0x665   : > { %v1409_v45 = vpop.permute.xlu0 %1408 }
 0x666   : > { %v1413_v4 = vsel %vm1412_vm2, %v1409_v45, %v1411_v35 }
 0x667   : > { %1415 = vst.msk [vmem:[%s3520_s28 + $0x8] sm:$0xff] %vm1371_vm15, %v1413_v4 }
 0x668   : > { %1419 = vst.msk [vmem:[%s3520_s28 + $0x8] sm:$0xff] %vm1381_vm0, %v1417_v60 }
 0x66a   : > { %2386 = vrot.lane.b32.xlu2 %v2355_v8, %s2667_s23  ;;  %2413 = vrot.lane.b32.xlu1 %v2356_v24, %s2673_s21 }
 0x66b   : > { %2405 = vrot.lane.b32.xlu0 %v2356_v24, %s2671_s18 }
 0x672   : > { %2425 = vrot.lane.b32.xlu1 %v2357_v48, %s2674_s24 }
 0x673   : > { %2388 = vrot.lane.b32.xlu0 %v2356_v24, %s2667_s23 }
 0x6a4   : > { %v2370_v7 = vpop.permute.xlu2 %2369 }
 0x6ac   : > { %v2394_v6 = vpop.permute.xlu2 %2393 }
 0x6ad   : > { %2554 = vst.msk [vmem:[%s3520_s28 + $0x18] sm:$0xff] %vm1340_vm3, %v2394_v6 }
 0x6b4   : > { %v2410_v14 = vpop.permute.xlu2 %2409 }
 0x6bc   : > { %v2366_v9 = vpop.permute.xlu1 %2365  ;;  %v2419_v21 = vpop.permute.xlu2 %2418 }
 0x6bd   : > { %v2421_v63 = vpop.permute.xlu0 %2420 }
 0x6be   : > { %v2422_v28 = vsel %vm1412_vm2, %v2419_v21, %v2421_v63 }
 0x6c4   : > { %v2374_v10 = vpop.permute.xlu1 %2373  ;;  %v2387_v12 = vpop.permute.xlu2 %2386 }
 0x6c5   : > { %v2362_v11 = vpop.permute.xlu0 %2361 }
 0x6c6   : > { %2547 = vst.msk [vmem:[%s3520_s28 + $0x10] sm:$0xff] %vm1346_vm4, %v2362_v11 }
 0x6c7   : > { %2548 = vst.msk [vmem:[%s3520_s28 + $0x10] sm:$0xff] %vm1351_vm5, %v2366_v9 }
 0x6c8   : > { %2549 = vst.msk [vmem:[%s3520_s28 + $0x10] sm:$0xff] %vm1356_vm11, %v2370_v7 }
 0x6c9   : > { %2550 = vst.msk [vmem:[%s3520_s28 + $0x10] sm:$0xff] %vm1361_vm13, %v2374_v10 }
 0x6cc   : > { %v2382_v42 = vpop.permute.xlu1 %2381 }
 0x6cd   : > { %v2378_v13 = vpop.permute.xlu0 %2377 }
 0x6ce   : > { %2551 = vst.msk [vmem:[%s3520_s28 + $0x10] sm:$0xff] %vm1366_vm14, %v2378_v13 }
 0x6cf   : > { %2552 = vst.msk [vmem:[%s3520_s28 + $0x10] sm:$0xff] %vm1371_vm15, %v2382_v42 }
 0x6d4   : > { %v2402_v17 = vpop.permute.xlu1 %2401 }
 0x6d5   : > { %v2398_v18 = vpop.permute.xlu0 %2397 }
 0x6d6   : > { %2555 = vst.msk [vmem:[%s3520_s28 + $0x18] sm:$0xff] %vm1346_vm4, %v2398_v18 }
 0x6d7   : > { %2556 = vst.msk [vmem:[%s3520_s28 + $0x18] sm:$0xff] %vm1351_vm5, %v2402_v17 }
 0x6dc   : > { %v2414_v22 = vpop.permute.xlu1 %2413 }
 0x6dd   : > { %v2406_v25 = vpop.permute.xlu0 %2405 }
 0x6de   : > { %2557 = vst.msk [vmem:[%s3520_s28 + $0x18] sm:$0xff] %vm1356_vm11, %v2406_v25 }
 0x6df   : > { %2558 = vst.msk [vmem:[%s3520_s28 + $0x18] sm:$0xff] %vm1361_vm13, %v2410_v14 }
 0x6e0   : > { %2559 = vst.msk [vmem:[%s3520_s28 + $0x18] sm:$0xff] %vm1366_vm14, %v2414_v22 }
 0x6e1   : > { %2560 = vst.msk [vmem:[%s3520_s28 + $0x18] sm:$0xff] %vm1371_vm15, %v2422_v28 }
 0x6e4   : > { %v2426_v31 = vpop.permute.xlu1 %2425 }
 0x6e5   : > { %2561 = vst.msk [vmem:[%s3520_s28 + $0x18] sm:$0xff] %vm1381_vm0, %v2426_v31  ;;  %v2389_v15 = vpop.permute.xlu0 %2388 }
 0x6e6   : > { %v2390_v16 = vsel %vm1378_vm12, %v2387_v12, %v2389_v15 }
 0x6e7   : > { %2553 = vst.msk [vmem:[%s3520_s28 + $0x10] sm:$0xff] %vm1381_vm0, %v2390_v16 }
 0x6e8 PF: > { %s20_s13 = sadd.s32 1, %s2646_s13  }
 0x6e9   : > { %p17_p4 = scmp.ge.s32.totalorder %s20_s13, 4  }
 0x6eb   :  { %19 = sbr.rel (!%p17_p4) target bundleno = 1 (0x1), region = 123 }

</bundles_post_ra>
